<compile_context>
chip_gen: v7x
topology: tpu7x:2x2x1
jax: 0.10.0
libtpu: 0.0.40
codegen_flags: <defaults>
</compile_context>

<pallas_src>
import jax
import jax.numpy as jnp
from jax import lax
from jax.experimental import pallas as pl
from jax.experimental.pallas import tpu as pltpu

EPS = 1e-5
_PREC_REF = lax.Precision.HIGHEST  # reference only


# ----------------------------------- kernel ----------------------------------
def _conv_block_kernel(xm_ref, xt_ref, xb_ref,
                       w1_ref, b1_ref,
                       w2_ref, b2_ref,
                       w34_ref, b34_ref,
                       o_ref, h1_ref):
    """One (batch, row-tile) step of the fused bottleneck block.

    xm_ref : (1, TH, Wo, Cin) bf16  -- main row tile (stride already applied)
    xt_ref : (1, 1,  Wo, Cin) bf16  -- input row just above the tile (clamped)
    xb_ref : (1, 1,  Wo, Cin) bf16  -- input row just below the tile (clamped)
    w1     : (Cin, C)       bf16    -- 1x1 conv, BN1 scale folded in
    w2     : (3, 3C, C)     bf16    -- 3x3 conv, BN2 scale folded in, rows (kw,Cin)
    w34    : (C + Cin, 4C)  bf16    -- [conv3 ; conv4 shortcut], BN3/4 folded in
    b1/b2  : (1, C)  f32, b34 : (1, 4C) f32 -- folded BN biases (conv bias incl.)
    o_ref  : (1, TH, Wo, 4C) bf16
    h1_ref : VMEM ((TH+2)*Wo + 2, C) bf16 -- H-padded conv1 output, flattened
             and shifted by +1 row so every 3x3 tap is an in-bounds ds read.
    """
    _, TH, Wo, Cin = xm_ref.shape
    C = w1_ref.shape[1]
    N2 = TH * Wo
    f32 = jnp.float32
    bf16 = jnp.bfloat16

    hid = pl.program_id(1)
    n_h = pl.num_programs(1)

    w1 = w1_ref[...]
    b1 = b1_ref[...]

    def conv1_bn_relu(x2d):  # bf16 (n, Cin) -> f32 (n, C)
        h = jnp.dot(x2d, w1, preferred_element_type=f32)
        return jnp.maximum(h + b1, 0.0)

    # --- conv1 (1x1) + BN1 + ReLU on the main rows -> h1 scratch (bf16) ------
    x2d = xm_ref[...].reshape(N2, Cin)
    h1_ref[pl.ds(1 + Wo, N2), :] = conv1_bn_relu(x2d).astype(bf16)

    # --- halo rows: one fused (2*Wo, Cin) matmul, gated to zero at the image
    #     border (where conv2's zero padding applies).  The scratch persists
    #     across grid steps, so border rows must be written explicitly. -------
    xh = jnp.concatenate([xt_ref[...].reshape(Wo, Cin),
                          xb_ref[...].reshape(Wo, Cin)], axis=0)
    h1_halo = conv1_bn_relu(xh)
    top_gate = (hid > 0).astype(f32)
    bot_gate = (hid < n_h - 1).astype(f32)
    h1_ref[pl.ds(1, Wo), :] = (h1_halo[:Wo] * top_gate).astype(bf16)
    h1_ref[pl.ds(1 + (TH + 1) * Wo, Wo), :] = (
        h1_halo[Wo:] * bot_gate).astype(bf16)

    # The two sentinel rows (only ever read under a zero mask) are cleared so
    # nothing uninitialized is ever touched.
    h1_ref[pl.ds(0, 1), :] = jnp.zeros((1, C), bf16)
    h1_ref[pl.ds((TH + 2) * Wo + 1, 1), :] = jnp.zeros((1, C), bf16)

    # --- conv2 (3x3, pad=1) + BN2 + ReLU: 3 matmuls with K = 3C --------------
    # Tap (dy, dx) for flattened output row i lives at scratch row
    # dy*Wo + dx + i; the left/right taps wrap across W rows and are masked
    # to zero at the first/last image column.
    col = lax.broadcasted_iota(jnp.int32, (TH, Wo, C), 1).reshape(N2, C)
    not_first_col = col != 0
    not_last_col = col != (Wo - 1)

    acc = jnp.zeros((N2, C), f32)
    for dy in range(3):
        left = h1_ref[pl.ds(dy * Wo + 0, N2), :]
        ctr = h1_ref[pl.ds(dy * Wo + 1, N2), :]
        right = h1_ref[pl.ds(dy * Wo + 2, N2), :]
        left = jnp.where(not_first_col, left, jnp.zeros_like(left))
        right = jnp.where(not_last_col, right, jnp.zeros_like(right))
        taps = jnp.concatenate([left, ctr, right], axis=-1)      # (N2, 3C) bf16
        acc += jnp.dot(taps, w2_ref[dy], preferred_element_type=f32)

    h2 = jnp.maximum(acc + b2_ref[...], 0.0)

    # --- conv3 (1x1) + BN3 and conv4 shortcut (1x1) + BN4, fused into one ----
    cat = jnp.concatenate([h2.astype(bf16), x2d], axis=-1)       # (N2, C+Cin)
    h34 = jnp.dot(cat, w34_ref[...], preferred_element_type=f32) + b34_ref[...]

    # --- residual add already included; final ReLU + bf16 writeback ----------
    out = jnp.maximum(h34, 0.0)
    o_ref[...] = out.reshape(o_ref.shape).astype(o_ref.dtype)


# ----------------------------------- planning --------------------------------
def _vmem_capacity_bytes():
    try:
        info = pltpu.get_tpu_info()
        cap = int(getattr(info, "vmem_capacity_bytes", 0))
        if cap > 0:
            return cap
    except Exception:
        pass
    return 64 * 1024 * 1024  # conservative default (v7x has 64 MiB per TC)


def _largest_divisor_leq(n, cap):
    cap = max(1, min(int(cap), n))
    for t in range(cap, 0, -1):
        if n % t == 0:
            return t
    return 1


def _plan_row_tile(Ho, Wo, Cin, C, C4, max_flat_rows=None):
    """Pick the H row tile (a divisor of Ho) and vmem_limit_bytes from the
    physical VMEM of the current generation (v5e/v6e: 128 MiB, v7x: 64 MiB),
    accounting for double-buffered I/O tiles, resident weights, the h1
    scratch and the in-kernel f32/bf16 temporaries."""
    bf, f4 = 2, 4
    phys = _vmem_capacity_bytes()
    budget = (phys * 3) // 4

    # TH-independent bytes: (double-buffered) weights + biases + 1-row halos.
    const = 2 * ((Cin * C + 9 * C * C + (C + Cin) * C4) * bf
                 + (2 * C + C4) * f4
                 + 2 * Wo * Cin * bf)
    # Bytes per flattened pixel row of the tile.
    per_pixel = (2 * Cin * bf + 2 * C4 * bf   # in/out tiles (x2 pipeline bufs)
                 + C * bf                     # h1 scratch
                 + 3 * C * bf + C * f4        # conv2 taps concat + f32 acc
                 + C * (f4 + bf)              # h2 (f32 + bf16 copy)
                 + (C + Cin) * bf             # [h2 | x] concat
                 + C4 * (f4 + bf))            # conv3/4 f32 acc + bf16 cast

    max_pixels = max((budget - const) // per_pixel, Wo)
    max_pixels = min(max_pixels, 8192)        # per-step overhead amortized by here
    if max_flat_rows is not None:
        max_pixels = min(max_pixels, max_flat_rows)
    TH = _largest_divisor_leq(Ho, max(max_pixels // Wo, 1))

    est = const + TH * Wo * per_pixel
    clamp = (phys * 7) // 8                   # ~56 MiB on v7x, ~112 MiB on v5e/v6e
    vmem_limit = int(min(max(2 * est, 32 * 1024 * 1024), clamp))
    return TH, vmem_limit


# ----------------------------------- wrapper ---------------------------------
def _fold_bn(conv_bias, gamma, beta, mean, var):
    scale = (gamma / jnp.sqrt(var + EPS)).astype(jnp.float32)
    bias = (beta + scale * (conv_bias - mean)).astype(jnp.float32)
    return scale.reshape(1, -1), bias.reshape(1, -1)


def conv_block_pallas_nhwc(x_nhwc, params, stride=1, max_flat_rows=None):
    """ConvBlock.forward on NHWC input; returns NHWC bf16 (preferred entry)."""
    # A 1x1 conv with stride s is exactly "subsample spatially, then matmul".
    x = x_nhwc[:, ::stride, ::stride, :].astype(jnp.bfloat16)
    B, Ho, Wo, Cin = x.shape
    bf16 = jnp.bfloat16

    s1, b1 = _fold_bn(params["b1"], *params["bn1"])
    s2, b2 = _fold_bn(params["b2"], *params["bn2"])
    s3, b3 = _fold_bn(params["b3"], *params["bn3"])
    s4, b4 = _fold_bn(params["b4"], *params["bn4"])

    # PyTorch (Cout, Cin, kh, kw) weights -> kernel layouts, BN scales folded
    # into the output-channel axis in f32, then cast to bf16 for the MXU.
    w1 = (jnp.transpose(params["w1"][:, :, 0, 0]) * s1).astype(bf16)      # (Cin, C)
    w2 = (jnp.transpose(params["w2"], (2, 3, 1, 0))
          * s2[None, None]).astype(bf16)                                   # (3,3,C,C)
    w3 = (jnp.transpose(params["w3"][:, :, 0, 0]) * s3).astype(bf16)      # (C, 4C)
    w4 = (jnp.transpose(params["w4"][:, :, 0, 0]) * s4).astype(bf16)      # (Cin, 4C)
    C, C4 = w1.shape[1], w3.shape[1]

    w2k = w2.reshape(3, 3 * C, C)                 # rows ordered (kw, Cin) per kh
    w34 = jnp.concatenate([w3, w4], axis=0)       # (C + Cin, 4C)
    b34 = b3 + b4

    TH, vmem_limit = _plan_row_tile(Ho, Wo, Cin, C, C4, max_flat_rows)
    nH = Ho // TH

    def _c2(b, h):
        return (0, 0)

    def _c3(b, h):
        return (0, 0, 0)

    in_specs = [
        # main row tile
        pl.BlockSpec((1, TH, Wo, Cin), lambda b, h: (b, h, 0, 0)),
        # 1-row halos (clamped to the image; gated to zero in-kernel at border)
        pl.BlockSpec((1, 1, Wo, Cin),
                     lambda b, h: (b, jnp.maximum(h * TH - 1, 0), 0, 0)),
        pl.BlockSpec((1, 1, Wo, Cin),
                     lambda b, h: (b, jnp.minimum((h + 1) * TH, Ho - 1), 0, 0)),
        # weights / folded-BN biases: full blocks, constant index_map
        pl.BlockSpec((Cin, C), _c2),
        pl.BlockSpec((1, C), _c2),
        pl.BlockSpec((3, 3 * C, C), _c3),
        pl.BlockSpec((1, C), _c2),
        pl.BlockSpec((C + Cin, C4), _c2),
        pl.BlockSpec((1, C4), _c2),
    ]
    out_spec = pl.BlockSpec((1, TH, Wo, C4), lambda b, h: (b, h, 0, 0))

    return pl.pallas_call(
        _conv_block_kernel,
        out_shape=jax.ShapeDtypeStruct((B, Ho, Wo, C4), jnp.bfloat16),
        grid=(B, nH),
        in_specs=in_specs,
        out_specs=out_spec,
        scratch_shapes=[pltpu.VMEM(((TH + 2) * Wo + 2, C), jnp.bfloat16)],
        compiler_params=pltpu.CompilerParams(
            dimension_semantics=("parallel", "parallel"),
            vmem_limit_bytes=vmem_limit),
    )(x, x, x, w1, b1, w2k, b2, w34, b34)


def conv_block_pallas(x_nchw, params, stride=1, max_flat_rows=None):
    """NCHW wrapper (PyTorch convention) for parity testing only."""
    x = jnp.transpose(x_nchw, (0, 2, 3, 1))
    out = conv_block_pallas_nhwc(x, params, stride=stride,
                                 max_flat_rows=max_flat_rows)
    return jnp.transpose(out, (0, 3, 1, 2))


# ----------------------------- reference (plain JAX) -------------------------
def _conv2d_ref(x, w, b, stride, padding):
    y = lax.conv_general_dilated(
        x, w, window_strides=(stride, stride),
        padding=[(padding, padding), (padding, padding)],
        dimension_numbers=("NCHW", "OIHW", "NCHW"), precision=_PREC_REF)
    return y + b[None, :, None, None]


def _bn_ref(x, gamma, beta, mean, var):
    inv = gamma / jnp.sqrt(var + EPS)
    return inv[None, :, None, None] * (x - mean[None, :, None, None]) \
        + beta[None, :, None, None]


def conv_block_ref(x, params, stride=1):
    residual = x
    h = jnp.maximum(_bn_ref(_conv2d_ref(x, params["w1"], params["b1"], stride, 0),
                            *params["bn1"]), 0.0)
    h = jnp.maximum(_bn_ref(_conv2d_ref(h, params["w2"], params["b2"], 1, 1),
                            *params["bn2"]), 0.0)
    h = _bn_ref(_conv2d_ref(h, params["w3"], params["b3"], 1, 0), *params["bn3"])
    r = _bn_ref(_conv2d_ref(residual, params["w4"], params["b4"], stride, 0),
                *params["bn4"])
    return jnp.maximum(h + r, 0.0)


# ----------------------------- parameter construction ------------------------
def make_params(key, in_channels, out_channels):
    c, c4 = out_channels, out_channels * 4
    ks = list(jax.random.split(key, 16))

    def w(k, shape):
        return (0.1 * jax.random.normal(k, shape)).astype(jnp.float32)

    def bn(k, n):
        k1, k2, k3, k4 = jax.random.split(k, 4)
        gamma = 1.0 + 0.1 * jax.random.normal(k1, (n,))
        beta = 0.1 * jax.random.normal(k2, (n,))
        mean = 0.1 * jax.random.normal(k3, (n,))
        var = 0.5 + jax.random.uniform(k4, (n,))
        return (gamma.astype(jnp.float32), beta.astype(jnp.float32),
                mean.astype(jnp.float32), var.astype(jnp.float32))

    return {
        "w1": w(ks[0], (c, in_channels, 1, 1)),  "b1": w(ks[1], (c,)),
        "w2": w(ks[2], (c, c, 3, 3)),            "b2": w(ks[3], (c,)),
        "w3": w(ks[4], (c4, c, 1, 1)),           "b3": w(ks[5], (c4,)),
        "w4": w(ks[6], (c4, in_channels, 1, 1)), "b4": w(ks[7], (c4,)),
        "bn1": bn(ks[8], c), "bn2": bn(ks[9], c),
        "bn3": bn(ks[10], c4), "bn4": bn(ks[11], c4),
    }


if __name__ == "__main__":
    key = jax.random.PRNGKey(0)
    kx1, kp1, kx2, kp2 = jax.random.split(key, 4)

    # Config 1: small shapes matching the module spec (NCHW in/out).
    x1 = jax.random.normal(kx1, (2, 4, 16, 16), dtype=jnp.float32)
    p1 = make_params(kp1, 4, 4)

    # Config 2: lane-dense channels (C4 = 128), closer to a real ResNet stage.
    x2 = jax.random.normal(kx2, (2, 32, 16, 16), dtype=jnp.float32)
    p2 = make_params(kp2, 32, 32)

    checks = [
        ("c1 stride1", x1, p1, 1, None),     # VMEM-derived tile (single H-tile)
        ("c1 stride2", x1, p1, 2, None),
        ("c1 multi-tile", x1, p1, 1, 64),    # forces 4 H-tiles -> halo path
        ("c2 stride1", x2, p2, 1, None),
        ("c2 multi-tile", x2, p2, 1, 128),   # 2 H-tiles, lane-dense channels
    ]

    for name, x, p, stride, max_rows in checks:
        out = jax.block_until_ready(
            conv_block_pallas(x, p, stride=stride, max_flat_rows=max_rows))
        ref = jax.block_until_ready(conv_block_ref(x, p, stride=stride))
        assert out.shape == ref.shape, (name, out.shape, ref.shape)
        out32 = out.astype(jnp.float32)
        err = float(jnp.max(jnp.abs(out32 - ref)))
        assert jnp.allclose(out32, ref, atol=3e-2, rtol=3e-2), (
            f"{name}: max abs err {err}")

    print("KERNEL_OK")
</pallas_src>

<mosaic_0001>
module attributes {stable_mosaic.version = 11 : i64} {
  func.func @_conv_block_kernel(%arg0: i32, %arg1: i32, %arg2: memref<1x16x16x4xbf16, #tpu.memory_space<vmem>>, %arg3: memref<1x1x16x4xbf16, #tpu.memory_space<vmem>>, %arg4: memref<1x1x16x4xbf16, #tpu.memory_space<vmem>>, %arg5: memref<4x4xbf16, #tpu.memory_space<vmem>>, %arg6: memref<1x4xf32, #tpu.memory_space<vmem>>, %arg7: memref<3x12x4xbf16, #tpu.memory_space<vmem>>, %arg8: memref<1x4xf32, #tpu.memory_space<vmem>>, %arg9: memref<8x16xbf16, #tpu.memory_space<vmem>>, %arg10: memref<1x16xf32, #tpu.memory_space<vmem>>, %arg11: memref<1x16x16x16xbf16, #tpu.memory_space<vmem>>, %arg12: memref<290x4xbf16, #tpu.memory_space<vmem>>) attributes {dimension_semantics = [#tpu.dimension_semantics<parallel>, #tpu.dimension_semantics<parallel>], iteration_bounds = array<i64: 2, 1>, scalar_prefetch = 0 : i64, scratch_operands = 1 : i64, tpu.core_type = #tpu.core_type<tc>, window_params = [{transform_indices = @transform_0, window_bounds = array<i64: 1, 16, 16, 4>}, {transform_indices = @transform_1, window_bounds = array<i64: 1, 1, 16, 4>}, {transform_indices = @transform_2, window_bounds = array<i64: 1, 1, 16, 4>}, {pipeline_mode = #tpu.pipeline_mode<synchronous>, transform_indices = @transform_3, window_bounds = array<i64: 4, 4>}, {pipeline_mode = #tpu.pipeline_mode<synchronous>, transform_indices = @transform_4, window_bounds = array<i64: 1, 4>}, {pipeline_mode = #tpu.pipeline_mode<synchronous>, transform_indices = @transform_5, window_bounds = array<i64: 3, 12, 4>}, {pipeline_mode = #tpu.pipeline_mode<synchronous>, transform_indices = @transform_6, window_bounds = array<i64: 1, 4>}, {pipeline_mode = #tpu.pipeline_mode<synchronous>, transform_indices = @transform_7, window_bounds = array<i64: 8, 16>}, {pipeline_mode = #tpu.pipeline_mode<synchronous>, transform_indices = @transform_8, window_bounds = array<i64: 1, 16>}, {transform_indices = @transform_9, window_bounds = array<i64: 1, 16, 16, 16>}]} {
    %c0 = arith.constant 0 : index
    %c0_0 = arith.constant 0 : index
    %0 = vector.load %arg5[%c0, %c0_0] : memref<4x4xbf16, #tpu.memory_space<vmem>>, vector<4x4xbf16>
    %c0_1 = arith.constant 0 : index
    %c0_2 = arith.constant 0 : index
    %1 = vector.load %arg6[%c0_1, %c0_2] : memref<1x4xf32, #tpu.memory_space<vmem>>, vector<1x4xf32>
    %c0_3 = arith.constant 0 : index
    %c0_4 = arith.constant 0 : index
    %c0_5 = arith.constant 0 : index
    %c0_6 = arith.constant 0 : index
    %2 = vector.load %arg2[%c0_3, %c0_4, %c0_5, %c0_6] : memref<1x16x16x4xbf16, #tpu.memory_space<vmem>>, vector<1x16x16x4xbf16>
    %3 = vector.shape_cast %2 : vector<1x16x16x4xbf16> to vector<256x4xbf16>
    %cst = arith.constant dense<0.000000e+00> : vector<256x4xf32>
    %4 = tpu.matmul %3, %0, %cst {dimension_numbers = #tpu.dot_dimension_numbers<[1], [0], [0], [1], [0, 0, 1, 1], [], []>} : vector<256x4xbf16>, vector<4x4xbf16>, vector<256x4xf32> -> vector<256x4xf32>
    %5 = vector.broadcast %1 : vector<1x4xf32> to vector<256x4xf32>
    %6 = arith.addf %4, %5 : vector<256x4xf32>
    %cst_7 = arith.constant 0.000000e+00 : f32
    %7 = vector.broadcast %cst_7 : f32 to vector<256x4xf32>
    %8 = arith.maximumf %6, %7 : vector<256x4xf32>
    %9 = arith.truncf %8 : vector<256x4xf32> to vector<256x4xbf16>
    %c17 = arith.constant 17 : index
    %c0_8 = arith.constant 0 : index
    %10 = vector.load %arg12[%c17, %c0_8] : memref<290x4xbf16, #tpu.memory_space<vmem>>, vector<256x4xbf16>
    tpu.vector_store %arg12[%c17, %c0_8], %9 {strides = array<i32>} : memref<290x4xbf16, #tpu.memory_space<vmem>>, vector<256x4xbf16>,
    %c0_9 = arith.constant 0 : index
    %c0_10 = arith.constant 0 : index
    %c0_11 = arith.constant 0 : index
    %c0_12 = arith.constant 0 : index
    %11 = vector.load %arg3[%c0_9, %c0_10, %c0_11, %c0_12] : memref<1x1x16x4xbf16, #tpu.memory_space<vmem>>, vector<1x1x16x4xbf16>
    %12 = vector.shape_cast %11 : vector<1x1x16x4xbf16> to vector<16x4xbf16>
    %c0_13 = arith.constant 0 : index
    %c0_14 = arith.constant 0 : index
    %c0_15 = arith.constant 0 : index
    %c0_16 = arith.constant 0 : index
    %13 = vector.load %arg4[%c0_13, %c0_14, %c0_15, %c0_16] : memref<1x1x16x4xbf16, #tpu.memory_space<vmem>>, vector<1x1x16x4xbf16>
    %14 = vector.shape_cast %13 : vector<1x1x16x4xbf16> to vector<16x4xbf16>
    %15 = tpu.concatenate %12, %14 in 0 : vector<16x4xbf16>, vector<16x4xbf16> -> vector<32x4xbf16>
    %cst_17 = arith.constant dense<0.000000e+00> : vector<32x4xf32>
    %16 = tpu.matmul %15, %0, %cst_17 {dimension_numbers = #tpu.dot_dimension_numbers<[1], [0], [0], [1], [0, 0, 1, 1], [], []>} : vector<32x4xbf16>, vector<4x4xbf16>, vector<32x4xf32> -> vector<32x4xf32>
    %17 = vector.broadcast %1 : vector<1x4xf32> to vector<32x4xf32>
    %18 = arith.addf %16, %17 : vector<32x4xf32>
    %cst_18 = arith.constant 0.000000e+00 : f32
    %19 = vector.broadcast %cst_18 : f32 to vector<32x4xf32>
    %20 = arith.maximumf %18, %19 : vector<32x4xf32>
    %c0_i32 = arith.constant 0 : i32
    %21 = arith.cmpi sgt, %arg1, %c0_i32 : i32
    %22 = arith.extui %21 : i1 to i32
    %23 = arith.sitofp %22 : i32 to f32
    %c0_i32_19 = arith.constant 0 : i32
    %24 = arith.cmpi slt, %arg1, %c0_i32_19 : i32
    %25 = arith.extui %24 : i1 to i32
    %26 = arith.sitofp %25 : i32 to f32
    %27 = vector.extract_strided_slice %20 {offsets = [0, 0], sizes = [16, 4], strides = [1, 1]} : vector<32x4xf32> to vector<16x4xf32>
    %28 = vector.broadcast %23 : f32 to vector<16x4xf32>
    %29 = arith.mulf %27, %28 : vector<16x4xf32>
    %30 = arith.truncf %29 : vector<16x4xf32> to vector<16x4xbf16>
    %c1 = arith.constant 1 : index
    %c0_20 = arith.constant 0 : index
    %31 = vector.load %arg12[%c1, %c0_20] : memref<290x4xbf16, #tpu.memory_space<vmem>>, vector<16x4xbf16>
    tpu.vector_store %arg12[%c1, %c0_20], %30 {strides = array<i32>} : memref<290x4xbf16, #tpu.memory_space<vmem>>, vector<16x4xbf16>,
    %32 = vector.extract_strided_slice %20 {offsets = [16, 0], sizes = [16, 4], strides = [1, 1]} : vector<32x4xf32> to vector<16x4xf32>
    %33 = vector.broadcast %26 : f32 to vector<16x4xf32>
    %34 = arith.mulf %32, %33 : vector<16x4xf32>
    %35 = arith.truncf %34 : vector<16x4xf32> to vector<16x4xbf16>
    %c273 = arith.constant 273 : index
    %c0_21 = arith.constant 0 : index
    %36 = vector.load %arg12[%c273, %c0_21] : memref<290x4xbf16, #tpu.memory_space<vmem>>, vector<16x4xbf16>
    tpu.vector_store %arg12[%c273, %c0_21], %35 {strides = array<i32>} : memref<290x4xbf16, #tpu.memory_space<vmem>>, vector<16x4xbf16>,
    %cst_22 = arith.constant 0.000000e+00 : bf16
    %37 = vector.broadcast %cst_22 : bf16 to vector<1x4xbf16>
    %c0_23 = arith.constant 0 : index
    %c0_24 = arith.constant 0 : index
    %38 = vector.load %arg12[%c0_23, %c0_24] : memref<290x4xbf16, #tpu.memory_space<vmem>>, vector<1x4xbf16>
    tpu.vector_store %arg12[%c0_23, %c0_24], %37 {strides = array<i32>} : memref<290x4xbf16, #tpu.memory_space<vmem>>, vector<1x4xbf16>,
    %cst_25 = arith.constant 0.000000e+00 : bf16
    %39 = vector.broadcast %cst_25 : bf16 to vector<1x4xbf16>
    %c289 = arith.constant 289 : index
    %c0_26 = arith.constant 0 : index
    %40 = vector.load %arg12[%c289, %c0_26] : memref<290x4xbf16, #tpu.memory_space<vmem>>, vector<1x4xbf16>
    tpu.vector_store %arg12[%c289, %c0_26], %39 {strides = array<i32>} : memref<290x4xbf16, #tpu.memory_space<vmem>>, vector<1x4xbf16>,
    %41 = tpu.iota {dimensions = array<i32: 1>} : vector<16x16x4xi32>
    %42 = vector.shape_cast %41 : vector<16x16x4xi32> to vector<256x4xi32>
    %c0_i32_27 = arith.constant 0 : i32
    %43 = vector.broadcast %c0_i32_27 : i32 to vector<256x4xi32>
    %44 = arith.cmpi ne, %42, %43 : vector<256x4xi32>
    %c15_i32 = arith.constant 15 : i32
    %45 = vector.broadcast %c15_i32 : i32 to vector<256x4xi32>
    %46 = arith.cmpi ne, %42, %45 : vector<256x4xi32>
    %cst_28 = arith.constant 0.000000e+00 : f32
    %47 = vector.broadcast %cst_28 : f32 to vector<256x4xf32>
    %c0_29 = arith.constant 0 : index
    %c0_30 = arith.constant 0 : index
    %48 = vector.load %arg12[%c0_29, %c0_30] : memref<290x4xbf16, #tpu.memory_space<vmem>>, vector<256x4xbf16>
    %c1_31 = arith.constant 1 : index
    %c0_32 = arith.constant 0 : index
    %49 = vector.load %arg12[%c1_31, %c0_32] : memref<290x4xbf16, #tpu.memory_space<vmem>>, vector<256x4xbf16>
    %c2 = arith.constant 2 : index
    %c0_33 = arith.constant 0 : index
    %50 = vector.load %arg12[%c2, %c0_33] : memref<290x4xbf16, #tpu.memory_space<vmem>>, vector<256x4xbf16>
    %cst_34 = arith.constant 0.000000e+00 : bf16
    %51 = vector.broadcast %cst_34 : bf16 to vector<256x4xbf16>
    %52 = arith.select %44, %48, %51 : vector<256x4xi1>, vector<256x4xbf16>
    %cst_35 = arith.constant 0.000000e+00 : bf16
    %53 = vector.broadcast %cst_35 : bf16 to vector<256x4xbf16>
    %54 = arith.select %46, %50, %53 : vector<256x4xi1>, vector<256x4xbf16>
    %55 = tpu.concatenate %52, %49, %54 in 1 : vector<256x4xbf16>, vector<256x4xbf16>, vector<256x4xbf16> -> vector<256x12xbf16>
    %c0_36 = arith.constant 0 : index
    %c0_37 = arith.constant 0 : index
    %c0_38 = arith.constant 0 : index
    %56 = vector.load %arg7[%c0_36, %c0_37, %c0_38] : memref<3x12x4xbf16, #tpu.memory_space<vmem>>, vector<1x12x4xbf16>
    %57 = vector.shape_cast %56 : vector<1x12x4xbf16> to vector<12x4xbf16>
    %cst_39 = arith.constant dense<0.000000e+00> : vector<256x4xf32>
    %58 = tpu.matmul %55, %57, %cst_39 {dimension_numbers = #tpu.dot_dimension_numbers<[1], [0], [0], [1], [0, 0, 1, 1], [], []>} : vector<256x12xbf16>, vector<12x4xbf16>, vector<256x4xf32> -> vector<256x4xf32>
    %59 = arith.addf %47, %58 : vector<256x4xf32>
    %c16 = arith.constant 16 : index
    %c0_40 = arith.constant 0 : index
    %60 = vector.load %arg12[%c16, %c0_40] : memref<290x4xbf16, #tpu.memory_space<vmem>>, vector<256x4xbf16>
    %c17_41 = arith.constant 17 : index
    %c0_42 = arith.constant 0 : index
    %61 = vector.load %arg12[%c17_41, %c0_42] : memref<290x4xbf16, #tpu.memory_space<vmem>>, vector<256x4xbf16>
    %c18 = arith.constant 18 : index
    %c0_43 = arith.constant 0 : index
    %62 = vector.load %arg12[%c18, %c0_43] : memref<290x4xbf16, #tpu.memory_space<vmem>>, vector<256x4xbf16>
    %cst_44 = arith.constant 0.000000e+00 : bf16
    %63 = vector.broadcast %cst_44 : bf16 to vector<256x4xbf16>
    %64 = arith.select %44, %60, %63 : vector<256x4xi1>, vector<256x4xbf16>
    %cst_45 = arith.constant 0.000000e+00 : bf16
    %65 = vector.broadcast %cst_45 : bf16 to vector<256x4xbf16>
    %66 = arith.select %46, %62, %65 : vector<256x4xi1>, vector<256x4xbf16>
    %67 = tpu.concatenate %64, %61, %66 in 1 : vector<256x4xbf16>, vector<256x4xbf16>, vector<256x4xbf16> -> vector<256x12xbf16>
    %c1_46 = arith.constant 1 : index
    %c0_47 = arith.constant 0 : index
    %c0_48 = arith.constant 0 : index
    %68 = vector.load %arg7[%c1_46, %c0_47, %c0_48] : memref<3x12x4xbf16, #tpu.memory_space<vmem>>, vector<1x12x4xbf16>
    %69 = vector.shape_cast %68 : vector<1x12x4xbf16> to vector<12x4xbf16>
    %cst_49 = arith.constant dense<0.000000e+00> : vector<256x4xf32>
    %70 = tpu.matmul %67, %69, %cst_49 {dimension_numbers = #tpu.dot_dimension_numbers<[1], [0], [0], [1], [0, 0, 1, 1], [], []>} : vector<256x12xbf16>, vector<12x4xbf16>, vector<256x4xf32> -> vector<256x4xf32>
    %71 = arith.addf %59, %70 : vector<256x4xf32>
    %c32 = arith.constant 32 : index
    %c0_50 = arith.constant 0 : index
    %72 = vector.load %arg12[%c32, %c0_50] : memref<290x4xbf16, #tpu.memory_space<vmem>>, vector<256x4xbf16>
    %c33 = arith.constant 33 : index
    %c0_51 = arith.constant 0 : index
    %73 = vector.load %arg12[%c33, %c0_51] : memref<290x4xbf16, #tpu.memory_space<vmem>>, vector<256x4xbf16>
    %c34 = arith.constant 34 : index
    %c0_52 = arith.constant 0 : index
    %74 = vector.load %arg12[%c34, %c0_52] : memref<290x4xbf16, #tpu.memory_space<vmem>>, vector<256x4xbf16>
    %cst_53 = arith.constant 0.000000e+00 : bf16
    %75 = vector.broadcast %cst_53 : bf16 to vector<256x4xbf16>
    %76 = arith.select %44, %72, %75 : vector<256x4xi1>, vector<256x4xbf16>
    %cst_54 = arith.constant 0.000000e+00 : bf16
    %77 = vector.broadcast %cst_54 : bf16 to vector<256x4xbf16>
    %78 = arith.select %46, %74, %77 : vector<256x4xi1>, vector<256x4xbf16>
    %79 = tpu.concatenate %76, %73, %78 in 1 : vector<256x4xbf16>, vector<256x4xbf16>, vector<256x4xbf16> -> vector<256x12xbf16>
    %c2_55 = arith.constant 2 : index
    %c0_56 = arith.constant 0 : index
    %c0_57 = arith.constant 0 : index
    %80 = vector.load %arg7[%c2_55, %c0_56, %c0_57] : memref<3x12x4xbf16, #tpu.memory_space<vmem>>, vector<1x12x4xbf16>
    %81 = vector.shape_cast %80 : vector<1x12x4xbf16> to vector<12x4xbf16>
    %cst_58 = arith.constant dense<0.000000e+00> : vector<256x4xf32>
    %82 = tpu.matmul %79, %81, %cst_58 {dimension_numbers = #tpu.dot_dimension_numbers<[1], [0], [0], [1], [0, 0, 1, 1], [], []>} : vector<256x12xbf16>, vector<12x4xbf16>, vector<256x4xf32> -> vector<256x4xf32>
    %83 = arith.addf %71, %82 : vector<256x4xf32>
    %c0_59 = arith.constant 0 : index
    %c0_60 = arith.constant 0 : index
    %84 = vector.load %arg8[%c0_59, %c0_60] : memref<1x4xf32, #tpu.memory_space<vmem>>, vector<1x4xf32>
    %85 = vector.broadcast %84 : vector<1x4xf32> to vector<256x4xf32>
    %86 = arith.addf %83, %85 : vector<256x4xf32>
    %cst_61 = arith.constant 0.000000e+00 : f32
    %87 = vector.broadcast %cst_61 : f32 to vector<256x4xf32>
    %88 = arith.maximumf %86, %87 : vector<256x4xf32>
    %89 = arith.truncf %88 : vector<256x4xf32> to vector<256x4xbf16>
    %90 = tpu.concatenate %89, %3 in 1 : vector<256x4xbf16>, vector<256x4xbf16> -> vector<256x8xbf16>
    %c0_62 = arith.constant 0 : index
    %c0_63 = arith.constant 0 : index
    %91 = vector.load %arg9[%c0_62, %c0_63] : memref<8x16xbf16, #tpu.memory_space<vmem>>, vector<8x16xbf16>
    %cst_64 = arith.constant dense<0.000000e+00> : vector<256x16xf32>
    %92 = tpu.matmul %90, %91, %cst_64 {dimension_numbers = #tpu.dot_dimension_numbers<[1], [0], [0], [1], [0, 0, 1, 1], [], []>} : vector<256x8xbf16>, vector<8x16xbf16>, vector<256x16xf32> -> vector<256x16xf32>
    %c0_65 = arith.constant 0 : index
    %c0_66 = arith.constant 0 : index
    %93 = vector.load %arg10[%c0_65, %c0_66] : memref<1x16xf32, #tpu.memory_space<vmem>>, vector<1x16xf32>
    %94 = vector.broadcast %93 : vector<1x16xf32> to vector<256x16xf32>
    %95 = arith.addf %92, %94 : vector<256x16xf32>
    %cst_67 = arith.constant 0.000000e+00 : f32
    %96 = vector.broadcast %cst_67 : f32 to vector<256x16xf32>
    %97 = arith.maximumf %95, %96 : vector<256x16xf32>
    %98 = vector.shape_cast %97 : vector<256x16xf32> to vector<1x16x16x16xf32>
    %99 = arith.truncf %98 : vector<1x16x16x16xf32> to vector<1x16x16x16xbf16>
    %c0_68 = arith.constant 0 : index
    %c0_69 = arith.constant 0 : index
    %c0_70 = arith.constant 0 : index
    %c0_71 = arith.constant 0 : index
    %100 = vector.load %arg11[%c0_68, %c0_69, %c0_70, %c0_71] : memref<1x16x16x16xbf16, #tpu.memory_space<vmem>>, vector<1x16x16x16xbf16>
    tpu.vector_store %arg11[%c0_68, %c0_69, %c0_70, %c0_71], %99 {strides = array<i32>} : memref<1x16x16x16xbf16, #tpu.memory_space<vmem>>, vector<1x16x16x16xbf16>,
    return
  }
  func.func @transform_0(%arg0: i32, %arg1: i32) -> (i32, i32, i32, i32) {
    %c0_i32 = arith.constant 0 : i32
    %c0_i32_0 = arith.constant 0 : i32
    %c0_i32_1 = arith.constant 0 : i32
    return %arg0, %arg1, %c0_i32, %c0_i32_0 : i32, i32, i32, i32
  }
  func.func @transform_1(%arg0: i32, %arg1: i32) -> (i32, i32, i32, i32) {
    %c16_i32 = arith.constant 16 : i32
    %0 = arith.muli %arg1, %c16_i32 : i32
    %c1_i32 = arith.constant 1 : i32
    %1 = arith.subi %0, %c1_i32 : i32
    %c0_i32 = arith.constant 0 : i32
    %2 = arith.maxsi %1, %c0_i32 : i32
    %c0_i32_0 = arith.constant 0 : i32
    %c0_i32_1 = arith.constant 0 : i32
    %c0_i32_2 = arith.constant 0 : i32
    return %arg0, %2, %c0_i32_0, %c0_i32_1 : i32, i32, i32, i32
  }
  func.func @transform_2(%arg0: i32, %arg1: i32) -> (i32, i32, i32, i32) {
    %c1_i32 = arith.constant 1 : i32
    %0 = arith.addi %arg1, %c1_i32 : i32
    %c16_i32 = arith.constant 16 : i32
    %1 = arith.muli %0, %c16_i32 : i32
    %c15_i32 = arith.constant 15 : i32
    %2 = arith.minsi %1, %c15_i32 : i32
    %c0_i32 = arith.constant 0 : i32
    %c0_i32_0 = arith.constant 0 : i32
    %c0_i32_1 = arith.constant 0 : i32
    return %arg0, %2, %c0_i32, %c0_i32_0 : i32, i32, i32, i32
  }
  func.func @transform_3(%arg0: i32, %arg1: i32) -> (i32, i32) {
    %c0_i32 = arith.constant 0 : i32
    %c0_i32_0 = arith.constant 0 : i32
    %c0_i32_1 = arith.constant 0 : i32
    return %c0_i32, %c0_i32_0 : i32, i32
  }
  func.func @transform_4(%arg0: i32, %arg1: i32) -> (i32, i32) {
    %c0_i32 = arith.constant 0 : i32
    %c0_i32_0 = arith.constant 0 : i32
    %c0_i32_1 = arith.constant 0 : i32
    return %c0_i32, %c0_i32_0 : i32, i32
  }
  func.func @transform_5(%arg0: i32, %arg1: i32) -> (i32, i32, i32) {
    %c0_i32 = arith.constant 0 : i32
    %c0_i32_0 = arith.constant 0 : i32
    %c0_i32_1 = arith.constant 0 : i32
    %c0_i32_2 = arith.constant 0 : i32
    return %c0_i32, %c0_i32_0, %c0_i32_1 : i32, i32, i32
  }
  func.func @transform_6(%arg0: i32, %arg1: i32) -> (i32, i32) {
    %c0_i32 = arith.constant 0 : i32
    %c0_i32_0 = arith.constant 0 : i32
    %c0_i32_1 = arith.constant 0 : i32
    return %c0_i32, %c0_i32_0 : i32, i32
  }
  func.func @transform_7(%arg0: i32, %arg1: i32) -> (i32, i32) {
    %c0_i32 = arith.constant 0 : i32
    %c0_i32_0 = arith.constant 0 : i32
    %c0_i32_1 = arith.constant 0 : i32
    return %c0_i32, %c0_i32_0 : i32, i32
  }
  func.func @transform_8(%arg0: i32, %arg1: i32) -> (i32, i32) {
    %c0_i32 = arith.constant 0 : i32
    %c0_i32_0 = arith.constant 0 : i32
    %c0_i32_1 = arith.constant 0 : i32
    return %c0_i32, %c0_i32_0 : i32, i32
  }
  func.func @transform_9(%arg0: i32, %arg1: i32) -> (i32, i32, i32, i32) {
    %c0_i32 = arith.constant 0 : i32
    %c0_i32_0 = arith.constant 0 : i32
    %c0_i32_1 = arith.constant 0 : i32
    return %arg0, %arg1, %c0_i32, %c0_i32_0 : i32, i32, i32, i32
  }
}

</mosaic_0001>

<bundles_post_ra>
// kernel: tpu_custom_call.1
= control target key start
LH: loop header
LB: loop body
LE: loop exit
PB: predicated region body
PF: predicated region fallthrough
CT: control target
= control target key end

     0   :  { %14 = vsyncpa [#allocation4], 0  ;;  %s6848_s0 = inlined_call_operand.vmem [shape: bf16[2,16,16,4], index: 0, kind: input, shape index: {}]   ;;  %s6849_s1 = inlined_call_operand.vmem [shape: bf16[2,16,16,4], index: 1, kind: input, shape index: {}]   ;;  %s6850_s2 = inlined_call_operand.vmem [shape: bf16[2,16,16,4], index: 2, kind: input, shape index: {}]   ;;  %s6851_s3 = inlined_call_operand.vmem [shape: bf16[4,4], index: 3, kind: input, shape index: {}]   ;;  %s6852_s4 = inlined_call_operand.vmem [shape: f32[1,4], index: 4, kind: input, shape index: {}]   ;;  %s6853_s5 = inlined_call_operand.vmem [shape: bf16[3,12,4], index: 5, kind: input, shape index: {}]   ;;  %s6854_s6 = inlined_call_operand.vmem [shape: f32[1,4], index: 6, kind: input, shape index: {}]   ;;  %s6855_s7 = inlined_call_operand.vmem [shape: bf16[8,16], index: 7, kind: input, shape index: {}]   ;;  %s6856_s8 = inlined_call_operand.vmem [shape: f32[1,16], index: 8, kind: input, shape index: {}]   ;;  %s6857_s9 = inlined_call_operand.hbm [shape: bf16[2,16,16,16], index: 9, kind: output, shape index: {}]  }
   0x1   :  { %16 = vsyncpa [#allocation4 + $0x1], 0  ;;  %s5225_s30 = smov 0   ;;  %s5227_s10 = smov 0  }
   0x2   :  { %s5229_s11 = smov 0   ;;  %s5231_s12 = smov 0  }
   0x3   :  { %s5233_s13 = smov 0   ;;  %s5235_s14 = smov 0  }
   0x4 LB: > { %s4214_s15 = sadd.s32 4294967295, %s5167_s14   ;;  %s4215_s16 = sadd.s32 4294967294, %s5167_s14   ;;  %s5167_s14 = sphi %s5235_s14, %s22_s14   ;;  %s5163_s13 = sphi %s5233_s13, %s6889_s13   ;;  %s5159_s12 = sphi %s5231_s12, %s6888_s12   ;;  %s5155_s11 = sphi %s5229_s11, %s6887_s11   ;;  %s5151_s10 = sphi %s5227_s10, %s6886_s10   ;;  %s5147_s30 = sphi %s5225_s30, %s6885_s30  }
   0x5   : > { %s34_s17 = sadd.s32 1, %s5163_s13  ;;  %s269_s18 = sadd.s32 1, %s5155_s11 }
   0x6   : > { %p36_p0 = scmp.ge.s32.totalorder %s34_s17, 2  ;;  %p279_p1 = scmp.ne.s32.totalorder %s5155_s11, %s5151_s10 }
   0x7   : > { %p280_p2 = scmp.eq.s32.totalorder %s4214_s15, 1  ;;  %p285_p3 = scmp.ne.s32.totalorder %s5151_s10, %s5147_s30 }
   0x8   : > { %s6891_s17 = smov (%p36_p0, %s34_s17), 0  ;;  %p286_p5 = scmp.eq.s32.totalorder %s4215_s16, 1 }
   0x9   : > { %p5265_p4 = por %p280_p2, %p279_p1  ;;  %s264_s20 = ssub.s32 %s5163_s13, %s6891_s17 }
   0xa   : > { %p4218_p6 = scmp.ge.s32.totalorder %s5167_s14, 1  ;;  %p267_p7 = scmp.eq.s32.totalorder %s264_s20, 0 }
   0xb   : > { %p5272_p8 = por %p286_p5, %p285_p3  ;;  %p376_p9 = scmp.lt.s32.totalorder %s5167_s14, 3 }
   0xc   : > { %s5278_s22 = scalar_select %p267_p7, %s5155_s11, %s269_s18  }
   0xd   : > { %p377_p10 = pnand %p4218_p6, %p376_p9 }
   0xf   : > { %380 = sbr.rel (%p377_p10) target bundleno = 1069 (0x42d), region = 56 }
  0x16   : > { %v492_v0 = vld [vmem:[%s6851_s3] sm:$0x3]  ;;  %vm661_vm0 = vcmask 1041408   ;;  %p444_p11 = scmp.lt.s32.totalorder %s5159_s12, 1  ;;  %vm612_vm1 = vcmask 31744   ;;  %v1478_v20 = vlaneseq  ;;  %vm5169_vm3 = vmmov 1  }
  0x17   : > { %4919 = vmatprep.subr.msk.bf16.mxu0 %vm661_vm0, %v492_v0  ;;  %4920 = vmatprep.subr.msk.bf16.mxu1 %vm661_vm0, %v492_v0  ;;  %v663_v1 = vsel %vm661_vm0, %v492_v0, 0  ;;  %vm5333_vm4 = vmpackc.low %vm5169_vm3, %vm5169_vm3  ;;  %v5170_v24 = vmov 0   ;;  %vm1557_vm6 = vcmask 1040384   ;;  %vm1558_vm7 = vcmask 1044484   ;;  %v5344_v29 = vld [vmem:[%s6852_s4] ss:$0 sm:$0xff] }
  0x18   : > { %4678 = vmatpush3.bf16.msra.mxu0 %v663_v1  ;;  %4712 = vmatpush3.bf16.msra.mxu1 %v663_v1  ;;  %s445_s25 = scalar_select %p444_p11, %s5159_s12, 1  ;;  %v5330_v21 = vshrl.u32 %v1478_v20, 7  ;;  %v1555_v25 = vsel %vm5333_vm4, 65537, %v5170_v24  ;;  %vm5347_vm8 = vmor %vm1557_vm6, %vm1558_vm7  ;;  %vm1277_vm9 = vcmask 27648   ;;  %vm1278_vm10 = vsmask.f32 7938 }
  0x19   : > { %v5339_v27 = vrot.slane %v1555_v25, 7  ;;  %vm954_vm11 = vsmask.f32 256  ;;  %vm955_vm12 = vsmask.f32 4368  ;;  %vm5373_vm13 = vmand %vm1277_vm9, %vm1278_vm10  ;;  %vm1315_vm14 = vcmask 24576  }
  0x1a   : > { %s4515_s26 = sshll.u32 %s445_s25, 7  ;;  %v1480_v22 = vadd.s32 8, %v5330_v21  ;;  %vm5385_vm15 = vmor %vm954_vm11, %vm955_vm12  ;;  %vm2014_vm6 = vcmask 1046528   ;;  %s5171_s28 = smov 8   ;;  %vm1766_vm7 = vsmask.f32 7424 }
  0x1b   : > { %s5288_s29 = scalar_lea.vmem %s6848_s0, %s4515_s26  ;;  %s466_s18 = scalar_lea.vmem %s6849_s1, %s4515_s26  ;;  %v1561_v30 = vrot.slane %v5339_v27, 4  ;;  %vm5425_vm0 = vmand %vm1315_vm14, %vm954_vm11  ;;  %vm1481_vm11 = vcmp.ne.s32.totalorder %v5330_v21, 0 }
  0x1c   : > { %v4986_v2 = vld [vmem:[%s5288_s29] sm:$0xff]   ;;  %s4518_s20 = sadd.s32 120, %s4515_s26  ;;  %v4988_v4 = vld [vmem:[%s5288_s29 + $0x8] sm:$0xff]   ;;  %v4990_v6 = vld [vmem:[%s5288_s29 + $0x10] sm:$0xff]   ;;  %vm1484_vm2 = vcmp.ne.s32.totalorder %v1480_v22, 15  ;;  %s5172_s15 = smov 4  }
  0x1d   : > { %v4987_v3 = vld [vmem:[%s466_s18] sm:$0xff]   ;;  %s483_s25 = scalar_lea.vmem %s6850_s2, %s4518_s20  ;;  %4679 = vmatprep.mubr.msk.bf16.mxu0 %vm612_vm1, %v4986_v2  ;;  %v4991_v7 = vld [vmem:[%s5288_s29 + $0x18] sm:$0xff]   ;;  %v4993_v9 = vld [vmem:[%s5288_s29 + $0x28] sm:$0xff]   ;;  %s440_s16 = sand.u32 1, %s5151_s10  }
  0x1e   : > { %4713 = vmatprep.mubr.msk.bf16.mxu1 %vm612_vm1, %v4987_v3  ;;  %v4989_v5 = vld [vmem:[%s483_s25] sm:$0xff]   ;;  %4680 = vmatmul.mubr.msk.bf16.vlgmr.msra.gmra.mrb[0].mxu0 %vm612_vm1, %v4988_v4  ;;  %v4994_v10 = vld [vmem:[%s5288_s29 + $0x30] sm:$0xff]   ;;  %v4995_v11 = vld [vmem:[%s5288_s29 + $0x38] sm:$0xff]   ;;  %s4219_s23 = sshll.u32 %s440_s16, 7  ;;  %s4587_s25 = sshll.u32 %s5159_s12, 11 }
  0x1f   : > { %4714 = vmatmul.mubr.msk.bf16.vlgmr.msra.gmra.mrb[0].mxu1 %vm612_vm1, %v4989_v5  ;;  %4683 = vmatprep.mubr.msk.bf16.mxu0 %vm612_vm1, %v4990_v6  ;;  %v4992_v8 = vld [vmem:[%s5288_s29 + $0x20] sm:$0xff]   ;;  %v4997_v13 = vld [vmem:[%s5288_s29 + $0x48] sm:$0xff]   ;;  %v4998_v14 = vld [vmem:[%s5288_s29 + $0x50] sm:$0xff]   ;;  %s6696_s24 = scalar_lea.vmem [#allocation3], %s4219_s23  ;;  %s6801_s12 = scalar_lea.sflag [#allocation4], %s440_s16 }
  0x20   : > { %v4996_v12 = vld [vmem:[%s5288_s29 + $0x40] sm:$0xff]   ;;  %v4999_v15 = vld [vmem:[%s5288_s29 + $0x58] sm:$0xff]   ;;  %v5001_v17 = vld [vmem:[%s5288_s29 + $0x68] sm:$0xff]   ;;  %s5173_s20 = smov [#allocation3]  }
  0x21   : > { %v5000_v16 = vld [vmem:[%s5288_s29 + $0x60] sm:$0xff]   ;;  %v5002_v18 = vld [vmem:[%s5288_s29 + $0x70] sm:$0xff]   ;;  %v5003_v19 = vld [vmem:[%s5288_s29 + $0x78] sm:$0xff]   ;;  %s5093_s23 = sshll.u32 %s5173_s20, 4  ;;  %s5094_s23 = int_to_ptr.vmem [resolvable:$false] %s5093_s23 }
  0x22   : > { %vm1554_vm5 = vmpackc.low %vm1484_vm2, %vm1484_vm2 }
  0x23   : > { %v1556_v26 = vsel %vm1554_vm5, 65537, %v5170_v24  ;;  %vm5452_vm2 = vmand %vm1315_vm14, %vm1278_vm10  ;;  %vm2278_vm10 = vcmask 1045504   ;;  %vm2245_vm14 = vcmask 97280  }
  0x24   : > { %v1562_v28 = vrot.slane %v1556_v26, 7  ;;  %vm6040_vm12 = vmpackc.low %vm1481_vm11, %vm1481_vm11 }
  0x26   : > { %4684 = vmatmul.mubr.msk.bf16.gmra.mrb[4].mxu0 %vm612_vm1, %v4991_v7  ;;  %v5351_v32 = vrot.slane %v1562_v28, 4  ;;  %v5358_v41 = vsel %vm5347_vm8, %v1561_v30, %v1562_v28 }
  0x27   : > { %4687 = vmatprep.mubr.msk.bf16.mxu0 %vm612_vm1, %v4992_v8  ;;  %vm1567_vm3 = vcmp.ne.s16.totalorder %v5358_v41, 0 }
  0x28   : > { %6867 = vst [vmem:[#allocation6_spill] sm:$0xff] %v5351_v32  ;;  %v1565_v47 = vsel %vm5347_vm8, %v5351_v32, %v5339_v27  ;;  %vm1569_vm8 = vcmp.ne.s16.totalorder %v5351_v32, 0 }
  0x29   : > { %vm5576_vm5 = vcmp.ne.s16.totalorder %v1565_v47, 0 }
  0x2e   : > { %4688 = vmatmul.mubr.msk.bf16.gmra.mrb[8].mxu0 %vm612_vm1, %v4993_v9 }
  0x2f   : > { %4691 = vmatprep.mubr.msk.bf16.mxu0 %vm612_vm1, %v4994_v10 }
  0x36   : > { %4692 = vmatmul.mubr.msk.bf16.gmra.mrb[12].mxu0 %vm612_vm1, %v4995_v11 }
  0x37   : > { %4695 = vmatprep.mubr.msk.bf16.mxu0 %vm612_vm1, %v4996_v12 }
  0x3e   : > { %4696 = vmatmul.mubr.msk.bf16.gmra.mrb[16].mxu0 %vm612_vm1, %v4997_v13 }
  0x3f   : > { %4699 = vmatprep.mubr.msk.bf16.mxu0 %vm612_vm1, %v4998_v14 }
  0x46   : > { %4700 = vmatmul.mubr.msk.bf16.gmra.mrb[20].mxu0 %vm612_vm1, %v4999_v15 }
  0x47   : > { %4703 = vmatprep.mubr.msk.bf16.mxu0 %vm612_vm1, %v5000_v16 }
  0x4e   : > { %4704 = vmatmul.mubr.msk.bf16.gmra.mrb[24].mxu0 %vm612_vm1, %v5001_v17 }
  0x4f   : > { %4707 = vmatprep.mubr.msk.bf16.mxu0 %vm612_vm1, %v5002_v18 }
  0x56   : > { %4708 = vmatmul.mubr.msk.bf16.gmra.mrb[28].mxu0 %vm612_vm1, %v5003_v19  ;;  %v1280_v19 = vld [vmem:[#allocation2 + $0x8] sm:$0xf] }
  0xf1   : > { %v4681_v33 = vpop.f32.mrb[0].mxu0 }
  0xf2   : > { %v708_v34 = vadd.f32 %v4681_v33, %v5344_v29  ;;  %v4715_v35 = vpop.f32.mrb[0].mxu1  ;;  %v699_v36 = vpop.f32.mrb[1].mxu0 }
  0xf3   : > { %v1383_v37 = vadd.f32 %v4715_v35, %v5344_v29  ;;  %v700_v38 = vadd.f32 %v5344_v29, %v699_v36  ;;  %v1374_v39 = vpop.f32.mrb[1].mxu1  ;;  %v4682_v40 = vpop.f32.mrb[2].mxu0 }
  0xf4   : > { %v828_v42 = vmax.f32 %v708_v34, 0.0  ;;  %v1375_v43 = vadd.f32 %v5344_v29, %v1374_v39  ;;  %v711_v44 = vadd.f32 %v4682_v40, %v5344_v29  ;;  %v702_v45 = vpop.f32.mrb[3].mxu0  ;;  %v4716_v46 = vpop.f32.mrb[2].mxu1 }
  0xf5   : > { %v1391_v48 = vmax.f32 %v1383_v37, 0.0  ;;  %v826_v49 = vmax.f32 %v700_v38, 0.0  ;;  %v703_v50 = vadd.f32 %v5344_v29, %v702_v45  ;;  %v1386_v51 = vadd.f32 %v4716_v46, %v5344_v29  ;;  %v1377_v52 = vpop.f32.mrb[3].mxu1 }
  0xf6   : > { %v4521_v53 = vpack.c.bf16 %v828_v42, %v828_v42  ;;  %v1389_v54 = vmax.f32 %v1375_v43, 0.0  ;;  %v829_v55 = vmax.f32 %v711_v44, 0.0  ;;  %v5369_v56 = vadd.f32 %v5344_v29, %v1377_v52  ;;  %v1428_v42 = vld [vmem:[#allocation2] sm:$0xf] }
  0xf7   : > { %v1436_v57 = vmul.f32 0.0, %v1391_v48  ;;  %v4519_v58 = vpack.c.bf16 %v826_v49, %v826_v49  ;;  %v827_v59 = vmax.f32 %v703_v50, 0.0  ;;  %v1392_v60 = vmax.f32 %v1386_v51, 0.0 }
  0xf8   : > { %v975_v61 = vshrl.u32 %v4521_v53, 16  ;;  %v978_v62 = vshll.u32 %v4521_v53, 16  ;;  %v1400_v63 = vmul.f32 0.0, %v1389_v54  ;;  %v4522_v0 = vpack.c.bf16 %v829_v55, %v829_v55 }
  0xf9   : > { %v4553_v1 = vpack.c.bf16 %v1436_v57, %v1436_v57  ;;  %v958_v2 = vshrl.u32 %v4519_v58, 16  ;;  %v961_v3 = vshll.u32 %v4519_v58, 16  ;;  %v4520_v4 = vpack.c.bf16 %v827_v59, %v827_v59  ;;  %v4685_v5 = vpop.f32.mrb[4].mxu0 }
  0xfa   : > { %v977_v6 = vrot.slane %v975_v61, 7  ;;  %v4551_v7 = vpack.c.bf16 %v1400_v63, %v1400_v63  ;;  %v984_v8 = vshrl.u32 %v4522_v0, 16  ;;  %v987_v9 = vshll.u32 %v4522_v0, 16  ;;  %v715_v10 = vpop.f32.mrb[5].mxu0 }
  0xfb   : > { %v1445_v11 = vshrl.u32 %v4553_v1, 16  ;;  %v1448_v12 = vshll.u32 %v4553_v1, 16  ;;  %v960_v13 = vrot.slane %v958_v2, 7  ;;  %v966_v14 = vshrl.u32 %v4520_v4, 16  ;;  %v4686_v15 = vpop.f32.mrb[6].mxu0 }
  0xfc   : > { %v980_v16 = vor.u32 %v978_v62, %v977_v6  ;;  %v982_v17 = vrot.slane %v977_v6, 4  ;;  %v1409_v20 = vshrl.u32 %v4551_v7, 16  ;;  %v1412_v22 = vshll.u32 %v4551_v7, 16  ;;  %v718_v24 = vpop.f32.mrb[7].mxu0 }
  0xfd   : > { %v5377_v25 = vrot.slane %v1445_v11, 7  ;;  %v963_v26 = vor.u32 %v961_v3, %v960_v13  ;;  %v964_v28 = vrot.slane %v960_v13, 4  ;;  %v5379_v30 = vrot.slane %v984_v8, 7 }
  0xfe   : > { %v5381_v33 = vrot.slane %v1409_v20, 7  ;;  %v968_v35 = vrot.slane %v966_v14, 7  ;;  %v969_v36 = vshll.u32 %v4520_v4, 16  ;;  %v1437_v37 = vmul.f32 0.0, %v1392_v60 }
  0xff   : > { %v5390_v38 = vor.u32 %v1448_v12, %v5377_v25  ;;  %v1451_v39 = vrot.slane %v5377_v25, 4  ;;  %v1281_v40 = vsel %vm5373_vm13, %v963_v26, %v1280_v19  ;;  %v989_v43 = vor.u32 %v987_v9, %v5379_v30  ;;  %v1468_v9 = vld [vmem:[#allocation2 + $0x90] sm:$0x1] }
 0x100   : > { %1282 = vst [vmem:[#allocation2 + $0x8] sm:$0xf] %v1281_v40  ;;  %v1414_v44 = vor.u32 %v1412_v22, %v5381_v33  ;;  %v1415_v45 = vrot.slane %v5381_v33, 4  ;;  %v991_v46 = vrot.slane %v5379_v30, 4  ;;  %v971_v48 = vor.u32 %v969_v36, %v968_v35 }
 0x101   : > { %v990_v49 = vsel %vm5385_vm15, %v982_v17, %v989_v43  ;;  %v973_v50 = vrot.slane %v968_v35, 4  ;;  %v4554_v51 = vpack.c.bf16 %v1437_v37, %v1437_v37  ;;  %v724_v52 = vadd.f32 %v4685_v5, %v5344_v29  ;;  %v4689_v53 = vpop.f32.mrb[8].mxu0 }
 0x102   : > { %v1429_v54 = vsel %vm5373_vm13, %v1414_v44, %v1428_v42  ;;  %1286 = vst.msk [vmem:[#allocation2 + $0x14] sm:$0xf] %vm1277_vm9, %v990_v49  ;;  %v972_v55 = vsel %vm5385_vm15, %v964_v28, %v971_v48  ;;  %v1390_v57 = vmax.f32 %v5369_v56, 0.0  ;;  %v716_v58 = vadd.f32 %v5344_v29, %v715_v10  ;;  %v731_v59 = vpop.f32.mrb[9].mxu0 }
 0x103   : > { %1430 = vst [vmem:[#allocation2] sm:$0xf] %v1429_v54  ;;  %v981_v60 = vsel %vm5385_vm15, %v973_v50, %v980_v16  ;;  %1284 = vst.msk [vmem:[#allocation2 + $0xc] sm:$0xf] %vm1277_vm9, %v972_v55  ;;  %v1453_v61 = vshrl.u32 %v4554_v51, 16  ;;  %v1456_v62 = vshll.u32 %v4554_v51, 16  ;;  %v727_v56 = vadd.f32 %v4686_v15, %v5344_v29 }
 0x104   : > { %v832_v63 = vmax.f32 %v724_v52, 0.0  ;;  %v5412_v0 = vpop.f32.mrb[10].mxu0  ;;  %1285 = vst.msk [vmem:[#allocation2 + $0x10] sm:$0xf] %vm1277_vm9, %v981_v60  ;;  %v1401_v1 = vmul.f32 0.0, %v1390_v57  ;;  %v830_v2 = vmax.f32 %v716_v58, 0.0  ;;  %v719_v3 = vadd.f32 %v5344_v29, %v718_v24 }
 0x105   : > { %v5417_v4 = vpop.f32.mrb[11].mxu0  ;;  %v1455_v5 = vrot.slane %v1453_v61, 7  ;;  %v740_v7 = vadd.f32 %v4689_v53, %v5344_v29  ;;  %v5421_v8 = vadd.f32 %v5344_v29, %v731_v59  ;;  %v833_v12 = vmax.f32 %v727_v56, 0.0 }
 0x106   : > { %v4525_v6 = vpack.c.bf16 %v832_v63, %v832_v63  ;;  %v4552_v10 = vpack.c.bf16 %v1401_v1, %v1401_v1  ;;  %v4523_v11 = vpack.c.bf16 %v830_v2, %v830_v2  ;;  %v831_v13 = vmax.f32 %v719_v3, 0.0 }
 0x107   : > { %v1458_v14 = vor.u32 %v1456_v62, %v1455_v5  ;;  %v1460_v16 = vrot.slane %v1455_v5, 4  ;;  %v4526_v36 = vpack.c.bf16 %v833_v12, %v833_v12  ;;  %v836_v48 = vmax.f32 %v740_v7, 0.0  ;;  %v1432_v52 = vld [vmem:[#allocation2 + $0x8] sm:$0x1] }
 0x108   : > { %v1011_v17 = vshrl.u32 %v4525_v6, 16  ;;  %v1014_v15 = vshll.u32 %v4525_v6, 16  ;;  %v1417_v20 = vshrl.u32 %v4552_v10, 16  ;;  %v1420_v22 = vshll.u32 %v4552_v10, 16 }
 0x109   : > { %v993_v24 = vshrl.u32 %v4523_v11, 16  ;;  %v996_v25 = vshll.u32 %v4523_v11, 16  ;;  %v1459_v26 = vsel %vm5385_vm15, %v1451_v39, %v1458_v14  ;;  %v1469_v28 = vsel %vm5425_vm0, %v1460_v16, %v1468_v9  ;;  %v5433_v37 = vpop.f32.mrb[12].mxu0 }
 0x10a   : > { %v1013_v35 = vrot.slane %v1011_v17, 7  ;;  %1467 = vst.msk [vmem:[#allocation2 + $0x8c] sm:$0xf] %vm1277_vm9, %v1459_v26  ;;  %1470 = vst [vmem:[#allocation2 + $0x90] sm:$0x1] %v1469_v28  ;;  %v1419_v42 = vrot.slane %v1417_v20, 7  ;;  %v4524_v44 = vpack.c.bf16 %v831_v13, %v831_v13  ;;  %v4529_v5 = vpack.c.bf16 %v836_v48, %v836_v48 }
 0x10b   : > { %v1471_v40 = vld [vmem:[#allocation2] sm:$0x1]  ;;  %v995_v43 = vrot.slane %v993_v24, 7  ;;  %v747_v49 = vpop.f32.mrb[13].mxu0  ;;  %v1020_v53 = vshrl.u32 %v4526_v36, 16  ;;  %v1023_v62 = vshll.u32 %v4526_v36, 16  ;;  %v743_v10 = vadd.f32 %v5412_v0, %v5344_v29 }
 0x10c   : > { %v1472_v50 = vsel %vm5425_vm0, 0, %v1471_v40  ;;  %v1016_v39 = vor.u32 %v1014_v15, %v1013_v35  ;;  %v1018_v51 = vrot.slane %v1013_v35, 4  ;;  %v4694_v54 = vpop.f32.mrb[14].mxu0  ;;  %v1422_v55 = vor.u32 %v1420_v22, %v1419_v42 }
 0x10d   : > { %1473 = vst [vmem:[#allocation2] sm:$0x1] %v1472_v50  ;;  %v1424_v57 = vrot.slane %v1419_v42, 4  ;;  %v998_v58 = vor.u32 %v996_v25, %v995_v43  ;;  %v1000_v59 = vrot.slane %v995_v43, 4  ;;  %v750_v60 = vpop.f32.mrb[15].mxu0  ;;  %v5438_v61 = vrot.slane %v1020_v53, 7 }
 0x10e   : > { %v1002_v63 = vshrl.u32 %v4524_v44, 16  ;;  %v1005_v1 = vshll.u32 %v4524_v44, 16  ;;  %v1423_v2 = vsel %vm5385_vm15, %v1415_v45, %v1422_v55  ;;  %v834_v7 = vmax.f32 %v5421_v8, 0.0 }
 0x10f   : > { %v1433_v56 = vsel %vm5425_vm0, %v1424_v57, %v1432_v52  ;;  %v999_v3 = vsel %vm5385_vm15, %v991_v46, %v998_v58  ;;  %1431 = vst.msk [vmem:[#allocation2 + $0x4] sm:$0xf] %vm1277_vm9, %v1423_v2  ;;  %v1025_v33 = vor.u32 %v1023_v62, %v5438_v61  ;;  %v1027_v45 = vrot.slane %v5438_v61, 4 }
 0x110   : > { %1434 = vst [vmem:[#allocation2 + $0x8] sm:$0x1] %v1433_v56  ;;  %1287 = vst.msk [vmem:[#allocation2 + $0x18] sm:$0xf] %vm1277_vm9, %v999_v3  ;;  %v1004_v30 = vrot.slane %v1002_v63, 7  ;;  %v1047_v46 = vshrl.u32 %v4529_v5, 16  ;;  %v735_v11 = vadd.f32 %v5344_v29, %v5417_v4  ;;  %v4527_v17 = vpack.c.bf16 %v834_v7, %v834_v7 }
 0x111   : > { %v1050_v9 = vshll.u32 %v4529_v5, 16  ;;  %v1475_v12 = vld [vmem:[#allocation2 + $0x90] sm:$0x1]  ;;  %v1026_v13 = vsel %vm5385_vm15, %v1018_v51, %v1025_v33  ;;  %v4697_v15 = vpop.f32.mrb[16].mxu0  ;;  %v837_v22 = vmax.f32 %v743_v10, 0.0  ;;  %v756_v50 = vadd.f32 %v5433_v37, %v5344_v29 }
 0x112   : > { %v1007_v14 = vor.u32 %v1005_v1, %v1004_v30  ;;  %v1009_v16 = vrot.slane %v1004_v30, 4  ;;  %v1476_v20 = vsel %vm5452_vm2, 0, %v1475_v12  ;;  %1290 = vst.msk [vmem:[#allocation2 + $0x24] sm:$0xf] %vm1277_vm9, %v1026_v13  ;;  %v1049_v8 = vrot.slane %v1047_v46, 7  ;;  %v763_v0 = vpop.f32.mrb[17].mxu0 }
 0x113   : > { %v835_v24 = vmax.f32 %v735_v11, 0.0  ;;  %1477 = vst [vmem:[#allocation2 + $0x90] sm:$0x1] %v1476_v20  ;;  %v1029_v26 = vshrl.u32 %v4527_v17, 16  ;;  %v1032_v28 = vshll.u32 %v4527_v17, 16  ;;  %v4698_v35 = vpop.f32.mrb[18].mxu0  ;;  %v4530_v42 = vpack.c.bf16 %v837_v22, %v837_v22 }
 0x114   : > { %v1008_v4 = vsel %vm5385_vm15, %v1000_v59, %v1007_v14  ;;  %v1017_v25 = vsel %vm5385_vm15, %v1009_v16, %v1016_v39  ;;  %v1052_v36 = vor.u32 %v1050_v9, %v1049_v8  ;;  %v1054_v40 = vrot.slane %v1049_v8, 4  ;;  %v766_v44 = vpop.f32.mrb[19].mxu0 }
 0x115   : > { %1288 = vst.msk [vmem:[#allocation2 + $0x1c] sm:$0xf] %vm1277_vm9, %v1008_v4  ;;  %1289 = vst.msk [vmem:[#allocation2 + $0x20] sm:$0xf] %vm1277_vm9, %v1017_v25  ;;  %v4528_v43 = vpack.c.bf16 %v835_v24, %v835_v24  ;;  %v1031_v48 = vrot.slane %v1029_v26, 7  ;;  %v748_v51 = vadd.f32 %v5344_v29, %v747_v49  ;;  %v759_v39 = vadd.f32 %v4694_v54, %v5344_v29 }
 0x116   : > { %v1056_v52 = vshrl.u32 %v4530_v42, 16  ;;  %v1059_v53 = vshll.u32 %v4530_v42, 16  ;;  %v840_v61 = vmax.f32 %v756_v50, 0.0  ;;  %v751_v56 = vadd.f32 %v5344_v29, %v750_v60 }
 0x117   : > { %v1038_v55 = vshrl.u32 %v4528_v43, 16  ;;  %v1041_v57 = vshll.u32 %v4528_v43, 16  ;;  %v1034_v58 = vor.u32 %v1032_v28, %v1031_v48  ;;  %v1036_v59 = vrot.slane %v1031_v48, 4 }
 0x118   : > { %v838_v62 = vmax.f32 %v748_v51, 0.0  ;;  %v1058_v63 = vrot.slane %v1056_v52, 7  ;;  %v841_v2 = vmax.f32 %v759_v39, 0.0  ;;  %v4533_v3 = vpack.c.bf16 %v840_v61, %v840_v61 }
 0x119   : > { %v1040_v1 = vrot.slane %v1038_v55, 7  ;;  %v1035_v37 = vsel %vm5385_vm15, %v1027_v45, %v1034_v58  ;;  %v772_v54 = vadd.f32 %v4697_v15, %v5344_v29  ;;  %v4701_v5 = vpop.f32.mrb[20].mxu0  ;;  %v839_v8 = vmax.f32 %v751_v56, 0.0 }
 0x11a   : > { %v4531_v49 = vpack.c.bf16 %v838_v62, %v838_v62  ;;  %1291 = vst.msk [vmem:[#allocation2 + $0x28] sm:$0xf] %vm1277_vm9, %v1035_v37  ;;  %v1061_v6 = vor.u32 %v1059_v53, %v1058_v63  ;;  %v1063_v33 = vrot.slane %v1058_v63, 4  ;;  %v5485_v46 = vpop.f32.mrb[21].mxu0  ;;  %v1083_v9 = vshrl.u32 %v4533_v3, 16 }
 0x11b   : > { %v1043_v30 = vor.u32 %v1041_v57, %v1040_v1  ;;  %v1045_v7 = vrot.slane %v1040_v1, 4  ;;  %v1086_v10 = vshll.u32 %v4533_v3, 16  ;;  %v5487_v12 = vpop.f32.mrb[22].mxu0  ;;  %v4534_v16 = vpack.c.bf16 %v841_v2, %v841_v2 }
 0x11c   : > { %v1065_v11 = vshrl.u32 %v4531_v49, 16  ;;  %v1068_v60 = vshll.u32 %v4531_v49, 16  ;;  %v1062_v45 = vsel %vm5385_vm15, %v1054_v40, %v1061_v6  ;;  %v5495_v17 = vpop.f32.mrb[23].mxu0  ;;  %v1085_v15 = vrot.slane %v1083_v9, 7 }
 0x11d   : > { %v1044_v13 = vsel %vm5385_vm15, %v1036_v59, %v1043_v30  ;;  %v1053_v14 = vsel %vm5385_vm15, %v1045_v7, %v1052_v36  ;;  %1294 = vst.msk [vmem:[#allocation2 + $0x34] sm:$0xf] %vm1277_vm9, %v1062_v45  ;;  %v844_v22 = vmax.f32 %v772_v54, 0.0  ;;  %v1092_v24 = vshrl.u32 %v4534_v16, 16 }
 0x11e   : > { %1292 = vst.msk [vmem:[#allocation2 + $0x2c] sm:$0xf] %vm1277_vm9, %v1044_v13  ;;  %1293 = vst.msk [vmem:[#allocation2 + $0x30] sm:$0xf] %vm1277_vm9, %v1053_v14  ;;  %v1067_v20 = vrot.slane %v1065_v11, 7  ;;  %v1095_v4 = vshll.u32 %v4534_v16, 16  ;;  %v764_v25 = vadd.f32 %v5344_v29, %v763_v0  ;;  %v775_v26 = vadd.f32 %v4698_v35, %v5344_v29 }
 0x11f   : > { %v1088_v28 = vor.u32 %v1086_v10, %v1085_v15  ;;  %v1090_v36 = vrot.slane %v1085_v15, 4  ;;  %v1094_v43 = vrot.slane %v1092_v24, 7  ;;  %v4532_v48 = vpack.c.bf16 %v839_v8, %v839_v8 }
 0x120   : > { %v1070_v40 = vor.u32 %v1068_v60, %v1067_v20  ;;  %v1072_v42 = vrot.slane %v1067_v20, 4  ;;  %v4537_v50 = vpack.c.bf16 %v844_v22, %v844_v22  ;;  %v842_v51 = vmax.f32 %v764_v25, 0.0 }
 0x121   : > { %v845_v52 = vmax.f32 %v775_v26, 0.0  ;;  %v767_v53 = vadd.f32 %v5344_v29, %v766_v44  ;;  %v788_v55 = vadd.f32 %v4701_v5, %v5344_v29  ;;  %v4705_v57 = vpop.f32.mrb[24].mxu0  ;;  %v1097_v0 = vor.u32 %v1095_v4, %v1094_v43 }
 0x122   : > { %v1071_v39 = vsel %vm5385_vm15, %v1063_v33, %v1070_v40  ;;  %v1099_v35 = vrot.slane %v1094_v43, 4  ;;  %v1074_v58 = vshrl.u32 %v4532_v48, 16  ;;  %v1077_v59 = vshll.u32 %v4532_v48, 16  ;;  %v795_v61 = vpop.f32.mrb[25].mxu0 }
 0x123   : > { %1295 = vst.msk [vmem:[#allocation2 + $0x38] sm:$0xf] %vm1277_vm9, %v1071_v39  ;;  %v1119_v62 = vshrl.u32 %v4537_v50, 16  ;;  %v1122_v63 = vshll.u32 %v4537_v50, 16  ;;  %v4535_v1 = vpack.c.bf16 %v842_v51, %v842_v51  ;;  %v4538_v2 = vpack.c.bf16 %v845_v52, %v845_v52  ;;  %v5507_v56 = vpop.f32.mrb[26].mxu0 }
 0x124   : > { %v1098_v37 = vsel %vm5385_vm15, %v1090_v36, %v1097_v0  ;;  %v1076_v44 = vrot.slane %v1074_v58, 7  ;;  %v843_v3 = vmax.f32 %v767_v53, 0.0  ;;  %v848_v49 = vmax.f32 %v788_v55, 0.0  ;;  %v5511_v54 = vpop.f32.mrb[27].mxu0 }
 0x125   : > { %1298 = vst.msk [vmem:[#allocation2 + $0x44] sm:$0xf] %vm1277_vm9, %v1098_v37  ;;  %v1121_v5 = vrot.slane %v1119_v62, 7  ;;  %v1101_v6 = vshrl.u32 %v4535_v1, 16  ;;  %v1104_v33 = vshll.u32 %v4535_v1, 16  ;;  %v1128_v30 = vshrl.u32 %v4538_v2, 16 }
 0x126   : > { %v1079_v7 = vor.u32 %v1077_v59, %v1076_v44  ;;  %v1081_v9 = vrot.slane %v1076_v44, 4  ;;  %v1131_v10 = vshll.u32 %v4538_v2, 16  ;;  %v4536_v11 = vpack.c.bf16 %v843_v3, %v843_v3 }
 0x127   : > { %v1124_v60 = vor.u32 %v1122_v63, %v1121_v5  ;;  %v1126_v45 = vrot.slane %v1121_v5, 4  ;;  %v1103_v13 = vrot.slane %v1101_v6, 7  ;;  %v5514_v14 = vrot.slane %v1128_v30, 7 }
 0x128   : > { %v1080_v16 = vsel %vm5385_vm15, %v1072_v42, %v1079_v7  ;;  %v1089_v15 = vsel %vm5385_vm15, %v1081_v9, %v1088_v28  ;;  %v1110_v20 = vshrl.u32 %v4536_v11, 16  ;;  %v1113_v8 = vshll.u32 %v4536_v11, 16 }
 0x129   : > { %1296 = vst.msk [vmem:[#allocation2 + $0x3c] sm:$0xf] %vm1277_vm9, %v1080_v16  ;;  %1297 = vst.msk [vmem:[#allocation2 + $0x40] sm:$0xf] %vm1277_vm9, %v1089_v15  ;;  %v1106_v22 = vor.u32 %v1104_v33, %v1103_v13  ;;  %v1108_v24 = vrot.slane %v1103_v13, 4  ;;  %v1133_v4 = vor.u32 %v1131_v10, %v5514_v14  ;;  %v1135_v25 = vrot.slane %v5514_v14, 4 }
 0x12a   : > { %v4709_v26 = vpop.f32.mrb[28].mxu0  ;;  %v1112_v36 = vrot.slane %v1110_v20, 7  ;;  %v4541_v40 = vpack.c.bf16 %v848_v49, %v848_v49  ;;  %v780_v42 = vadd.f32 %v5344_v29, %v5485_v46  ;;  %v791_v28 = vadd.f32 %v5487_v12, %v5344_v29 }
 0x12b   : > { %v5528_v43 = vpop.f32.mrb[29].mxu0  ;;  %v1107_v48 = vsel %vm5385_vm15, %v1099_v35, %v1106_v22  ;;  %v1134_v50 = vsel %vm5385_vm15, %v1126_v45, %v1133_v4  ;;  %v783_v51 = vadd.f32 %v5344_v29, %v5495_v17  ;;  %v804_v39 = vadd.f32 %v4705_v57, %v5344_v29 }
 0x12c   : > { %v5537_v52 = vpop.f32.mrb[30].mxu0  ;;  %1299 = vst.msk [vmem:[#allocation2 + $0x48] sm:$0xf] %vm1277_vm9, %v1107_v48  ;;  %1302 = vst.msk [vmem:[#allocation2 + $0x54] sm:$0xf] %vm1277_vm9, %v1134_v50  ;;  %v1115_v46 = vor.u32 %v1113_v8, %v1112_v36  ;;  %v1117_v12 = vrot.slane %v1112_v36, 4  ;;  %v796_v1 = vadd.f32 %v5344_v29, %v795_v61  ;;  %v807_v33 = vadd.f32 %v5507_v56, %v5344_v29 }
 0x12d   : > { %v1155_v53 = vshrl.u32 %v4541_v40, 16  ;;  %v1158_v55 = vshll.u32 %v4541_v40, 16  ;;  %v814_v0 = vpop.f32.mrb[31].mxu0  ;;  %v846_v35 = vmax.f32 %v780_v42, 0.0  ;;  %v849_v58 = vmax.f32 %v791_v28, 0.0 }
 0x12e   : > { %v847_v59 = vmax.f32 %v783_v51, 0.0  ;;  %v852_v62 = vmax.f32 %v804_v39, 0.0  ;;  %v1116_v17 = vsel %vm5385_vm15, %v1108_v24, %v1115_v46  ;;  %v1125_v57 = vsel %vm5385_vm15, %v1117_v12, %v1124_v60 }
 0x12f   : > { %v1157_v63 = vrot.slane %v1155_v53, 7  ;;  %1300 = vst.msk [vmem:[#allocation2 + $0x4c] sm:$0xf] %vm1277_vm9, %v1116_v17  ;;  %1301 = vst.msk [vmem:[#allocation2 + $0x50] sm:$0xf] %vm1277_vm9, %v1125_v57  ;;  %v4539_v2 = vpack.c.bf16 %v846_v35, %v846_v35  ;;  %v4542_v37 = vpack.c.bf16 %v849_v58, %v849_v58  ;;  %v850_v6 = vmax.f32 %v796_v1, 0.0 }
 0x130   : > { %v4540_v44 = vpack.c.bf16 %v847_v59, %v847_v59  ;;  %v4545_v3 = vpack.c.bf16 %v852_v62, %v852_v62  ;;  %v853_v15 = vmax.f32 %v807_v33, 0.0  ;;  %v799_v22 = vadd.f32 %v5344_v29, %v5511_v54 }
 0x131   : > { %v1160_v49 = vor.u32 %v1158_v55, %v1157_v63  ;;  %v1162_v5 = vrot.slane %v1157_v63, 4  ;;  %v1137_v30 = vshrl.u32 %v4539_v2, 16  ;;  %v1140_v7 = vshll.u32 %v4539_v2, 16 }
 0x132   : > { %v1164_v9 = vshrl.u32 %v4542_v37, 16  ;;  %v1167_v10 = vshll.u32 %v4542_v37, 16  ;;  %v1146_v11 = vshrl.u32 %v4540_v44, 16  ;;  %v1149_v61 = vshll.u32 %v4540_v44, 16 }
 0x133   : > { %v1191_v60 = vshrl.u32 %v4545_v3, 16  ;;  %v1194_v45 = vshll.u32 %v4545_v3, 16  ;;  %v1139_v13 = vrot.slane %v1137_v30, 7  ;;  %v4543_v16 = vpack.c.bf16 %v850_v6, %v850_v6 }
 0x134   : > { %v1166_v14 = vrot.slane %v1164_v9, 7  ;;  %v1148_v20 = vrot.slane %v1146_v11, 7  ;;  %v820_v24 = vadd.f32 %v4709_v26, %v5344_v29  ;;  %v4546_v53 = vpack.c.bf16 %v853_v15, %v853_v15 }
 0x135   : > { %v1193_v8 = vrot.slane %v1191_v60, 7  ;;  %v1142_v56 = vor.u32 %v1140_v7, %v1139_v13  ;;  %v1144_v4 = vrot.slane %v1139_v13, 4  ;;  %v1173_v46 = vshrl.u32 %v4543_v16, 16 }
 0x136   : > { %v1169_v36 = vor.u32 %v1167_v10, %v1166_v14  ;;  %v1171_v40 = vrot.slane %v1166_v14, 4  ;;  %v1151_v42 = vor.u32 %v1149_v61, %v1148_v20  ;;  %v1153_v28 = vrot.slane %v1148_v20, 4  ;;  %v5587_v15 = vld [vmem:[#allocation2 + $0x4c] sm:$0xf] }
 0x137   : > { %v1196_v48 = vor.u32 %v1194_v45, %v1193_v8  ;;  %v1198_v50 = vrot.slane %v1193_v8, 4  ;;  %v1143_v51 = vsel %vm5385_vm15, %v1135_v25, %v1142_v56  ;;  %v1176_v12 = vshll.u32 %v4543_v16, 16  ;;  %v5585_v16 = vld [vmem:[#allocation2 + $0x48] sm:$0xf] }
 0x138   : > { %v1170_v39 = vsel %vm5385_vm15, %v1162_v5, %v1169_v36  ;;  %1303 = vst.msk [vmem:[#allocation2 + $0x58] sm:$0xf] %vm1277_vm9, %v1143_v51  ;;  %v1152_v54 = vsel %vm5385_vm15, %v1144_v4, %v1151_v42  ;;  %v1161_v26 = vsel %vm5385_vm15, %v1153_v28, %v1160_v49  ;;  %v851_v55 = vmax.f32 %v799_v22, 0.0  ;;  %v5594_v42 = vld [vmem:[#allocation2 + $0x50] sm:$0xf] }
 0x139   : > { %1306 = vst.msk [vmem:[#allocation2 + $0x64] sm:$0xf] %vm1277_vm9, %v1170_v39  ;;  %1304 = vst.msk [vmem:[#allocation2 + $0x5c] sm:$0xf] %vm1277_vm9, %v1152_v54  ;;  %v1175_v25 = vrot.slane %v1173_v46, 7  ;;  %v856_v35 = vmax.f32 %v820_v24, 0.0  ;;  %v812_v58 = vadd.f32 %v5344_v29, %v5528_v43  ;;  %v823_v59 = vadd.f32 %v5537_v52, %v5344_v29 }
 0x13a   : > { %1305 = vst.msk [vmem:[#allocation2 + $0x60] sm:$0xf] %vm1277_vm9, %v1161_v26  ;;  %v1200_v62 = vshrl.u32 %v4546_v53, 16  ;;  %v1203_v17 = vshll.u32 %v4546_v53, 16  ;;  %v4544_v57 = vpack.c.bf16 %v851_v55, %v851_v55  ;;  %v815_v63 = vadd.f32 %v5344_v29, %v814_v0  ;;  %v5596_v28 = vld [vmem:[#allocation2 + $0x54] sm:$0xf] }
 0x13b   : > { %v1178_v43 = vor.u32 %v1176_v12, %v1175_v25  ;;  %v1180_v2 = vrot.slane %v1175_v25, 4  ;;  %v4549_v37 = vpack.c.bf16 %v856_v35, %v856_v35  ;;  %v854_v52 = vmax.f32 %v812_v58, 0.0  ;;  %v1317_v39 = vld [vmem:[#allocation2 + $0x88] sm:$0x1] }
 0x13c   : > { %v1202_v44 = vrot.slane %v1200_v62, 7  ;;  %v1182_v3 = vshrl.u32 %v4544_v57, 16  ;;  %v1185_v49 = vshll.u32 %v4544_v57, 16  ;;  %v857_v5 = vmax.f32 %v823_v59, 0.0 }
 0x13d   : > { %v1179_v29 = vsel %vm5385_vm15, %v1171_v40, %v1178_v43  ;;  %v1227_v0 = vshrl.u32 %v4549_v37, 16  ;;  %v1230_v31 = vshll.u32 %v4549_v37, 16  ;;  %v4547_v6 = vpack.c.bf16 %v854_v52, %v854_v52 }
 0x13e   : > { %1307 = vst.msk [vmem:[#allocation2 + $0x68] sm:$0xf] %vm1277_vm9, %v1179_v29  ;;  %v1205_v47 = vor.u32 %v1203_v17, %v1202_v44  ;;  %v1207_v33 = vrot.slane %v1202_v44, 4  ;;  %v1184_v30 = vrot.slane %v1182_v3, 7  ;;  %v4550_v7 = vpack.c.bf16 %v857_v5, %v857_v5 }
 0x13f   : > { %v1229_v9 = vrot.slane %v1227_v0, 7  ;;  %v1209_v10 = vshrl.u32 %v4547_v6, 16  ;;  %v1212_v11 = vshll.u32 %v4547_v6, 16  ;;  %v855_v61 = vmax.f32 %v815_v63, 0.0  ;;  %v1507_v55 = vld [vmem:[#allocation2 + $0x58] sm:$0xf] }
 0x140   : > { %v1206_v60 = vsel %vm5385_vm15, %v1198_v50, %v1205_v47  ;;  %v1187_v45 = vor.u32 %v1185_v49, %v1184_v30  ;;  %v1189_v13 = vrot.slane %v1184_v30, 4  ;;  %v1236_v14 = vshrl.u32 %v4550_v7, 16  ;;  %v1508_v62 = vld [vmem:[#allocation2 + $0x5c] sm:$0xf]  ;;  %v1510_v47 = vld [vmem:[#allocation2 + $0x64] sm:$0xf] }
 0x141   : > { %1310 = vst.msk [vmem:[#allocation2 + $0x74] sm:$0xf] %vm1277_vm9, %v1206_v60  ;;  %v1232_v20 = vor.u32 %v1230_v31, %v1229_v9  ;;  %v1234_v8 = vrot.slane %v1229_v9, 4  ;;  %v1211_v22 = vrot.slane %v1209_v10, 7  ;;  %v1239_v24 = vshll.u32 %v4550_v7, 16 }
 0x142   : > { %v1188_v56 = vsel %vm5385_vm15, %v1180_v2, %v1187_v45  ;;  %v1197_v4 = vsel %vm5385_vm15, %v1189_v13, %v1196_v48  ;;  %v1238_v36 = vrot.slane %v1236_v14, 7  ;;  %v4548_v40 = vpack.c.bf16 %v855_v61, %v855_v61  ;;  %v1509_v6 = vld [vmem:[#allocation2 + $0x60] sm:$0xf] }
 0x143   : > { %1308 = vst.msk [vmem:[#allocation2 + $0x6c] sm:$0xf] %vm1277_vm9, %v1188_v56  ;;  %1309 = vst.msk [vmem:[#allocation2 + $0x70] sm:$0xf] %vm1277_vm9, %v1197_v4  ;;  %v1214_v50 = vor.u32 %v1212_v11, %v1211_v22  ;;  %v1216_v51 = vrot.slane %v1211_v22, 4  ;;  %v1588_v46 = vsel %vm5576_vm5, %v5585_v16, 0  ;;  %v4324_v37 = vcombine.low %v5585_v16, %v5587_v15 }
 0x144   : > { %v1589_v48 = vsel %vm1567_vm3, %v5587_v15, 0  ;;  %v1241_v12 = vor.u32 %v1239_v24, %v1238_v36  ;;  %v1243_v54 = vrot.slane %v1238_v36, 4  ;;  %v1218_v26 = vshrl.u32 %v4548_v40, 16 }
 0x145   : > { %v1221_v53 = vshll.u32 %v4548_v40, 16  ;;  %v1215_v25 = vsel %vm5385_vm15, %v1207_v33, %v1214_v50  ;;  %v1590_v35 = vsel %vm5576_vm5, %v5594_v42, 0  ;;  %v1591_v58 = vsel %vm1567_vm3, %v5596_v28, 0  ;;  %v1511_v4 = vld [vmem:[#allocation2 + $0x68] sm:$0xf] }
 0x146   : > { %v5614_v59 = vcombine.low %v1588_v46, %v1589_v48  ;;  %1311 = vst.msk [vmem:[#allocation2 + $0x78] sm:$0xf] %vm1277_vm9, %v1215_v25  ;;  %v1242_v17 = vsel %vm5385_vm15, %v1234_v8, %v1241_v12  ;;  %v1318_v57 = vsel %vm5425_vm0, %v1243_v54, %v1317_v39  ;;  %v1220_v63 = vrot.slane %v1218_v26, 7 }
 0x147   : > { %v4342_v43 = vcombine.low %v1590_v35, %v1591_v58  ;;  %1314 = vst.msk [vmem:[#allocation2 + $0x84] sm:$0xf] %vm1277_vm9, %v1242_v17  ;;  %1319 = vst [vmem:[#allocation2 + $0x88] sm:$0x1] %v1318_v57  ;;  %v4325_v52 = vcombine.low %v5594_v42, %v5596_v28  ;;  %v1592_v44 = vsel %vm5576_vm5, %v1507_v55, 0  ;;  %v1593_v5 = vsel %vm1567_vm3, %v1508_v62, 0 }
 0x148   : > { %v2032_v2 = vrot.slane %v5614_v59, 1  ;;  %v1223_v3 = vor.u32 %v1221_v53, %v1220_v63  ;;  %v1225_v49 = vrot.slane %v1220_v63, 4  ;;  %v1839_v29 = vshll.u32 %v4324_v37, 16  ;;  %v1514_v8 = vld [vmem:[#allocation2 + $0x74] sm:$0xf] }
 0x149   : > { %v2034_v19 = vrot.slane %v4342_v43, 1  ;;  %v1847_v0 = vshll.u32 %v4325_v52, 16  ;;  %v5631_v31 = vcombine.low %v1592_v44, %v1593_v5  ;;  %v4326_v9 = vcombine.low %v1507_v55, %v1508_v62 }
 0x14a   : > { %v1224_v33 = vsel %vm5385_vm15, %v1216_v51, %v1223_v3  ;;  %v1233_v30 = vsel %vm5385_vm15, %v1225_v49, %v1232_v20  ;;  %v5643_v10 = vrot.slane %v1839_v29, 1  ;;  %v1843_v11 = vshrl.u32 %v4324_v37, 16  ;;  %v1512_v34 = vld [vmem:[#allocation2 + $0x6c] sm:$0xf]  ;;  %v5646_v20 = vld [vmem:[#allocation2 + $0x70] sm:$0xf] }
 0x14b   : > { %v2035_v7 = vsel %vm2014_vm6, %v2032_v2, %v2034_v19  ;;  %1312 = vst.msk [vmem:[#allocation2 + $0x7c] sm:$0xf] %vm1277_vm9, %v1224_v33  ;;  %1313 = vst.msk [vmem:[#allocation2 + $0x80] sm:$0xf] %vm1277_vm9, %v1233_v30  ;;  %v1849_v61 = vrot.slane %v1847_v0, 1  ;;  %v2036_v60 = vrot.slane %v5631_v31, 1  ;;  %v4327_v14 = vcombine.low %v1509_v6, %v1510_v47 }
 0x14c   : > { %2066 = vrot.lane.b32.xlu1 %v2035_v7, %s5171_s28  ;;  %v1851_v45 = vshrl.u32 %v4325_v52, 16  ;;  %v1855_v13 = vshll.u32 %v4326_v9, 16  ;;  %v1845_v22 = vor.u32 %v1843_v11, %v5643_v10  ;;  %v1594_v56 = vsel %vm5576_vm5, %v1509_v6, 0  ;;  %v1486_v31 = vld [vmem:[#allocation2 + $0x4] sm:$0xf] }
 0x14d   : > { %v2037_v24 = vsel %vm2014_vm6, %v2034_v19, %v2036_v60  ;;  %v1863_v51 = vshll.u32 %v4327_v14, 16  ;;  %v4328_v39 = vcombine.low %v1511_v4, %v1512_v34  ;;  %v1595_v12 = vsel %vm1567_vm3, %v1510_v47, 0  ;;  %v1515_v3 = vld [vmem:[#allocation2 + $0x78] sm:$0xf] }
 0x14e   : > { %v1464_v36 = vld [vmem:[#allocation2 + $0x88] sm:$0xf]  ;;  %v1853_v40 = vor.u32 %v1851_v45, %v1849_v61  ;;  %v1857_v50 = vrot.slane %v1855_v13, 1  ;;  %v1850_v48 = vsel %vm1766_vm7, %v1845_v22, %v1849_v61  ;;  %v4329_v54 = vcombine.low %v5646_v20, %v1514_v8  ;;  %v2164_v35 = vld [vmem:[#allocation2 + $0x84] sm:$0xf] }
 0x14f   : > { %v1465_v46 = vsel %vm5373_vm13, %v5390_v38, %v1464_v36  ;;  %1917 = vrot.lane.b32.xlu0 %v1850_v48, %s5172_s15  ;;  %v1859_v26 = vshrl.u32 %v4326_v9, 16  ;;  %v1865_v53 = vrot.slane %v1863_v51, 1  ;;  %v1867_v25 = vshrl.u32 %v4327_v14, 16 }
 0x150   : > { %2068 = vrot.lane.b32.xlu1 %v2037_v24, %s5171_s28  ;;  %1466 = vst [vmem:[#allocation2 + $0x88] sm:$0xf] %v1465_v46  ;;  %v1858_v55 = vsel %vm1766_vm7, %v1853_v40, %v1857_v50  ;;  %v1871_v18 = vshll.u32 %v4328_v39, 16  ;;  %v1879_v38 = vshll.u32 %v4329_v54, 16  ;;  %v4344_v58 = vcombine.low %v1594_v56, %v1595_v12  ;;  %v1488_v46 = vld [vmem:[#allocation2 + $0xc] sm:$0xf] }
 0x151   : > { %v1596_v62 = vsel %vm5576_vm5, %v1511_v4, 0  ;;  %v1597_v17 = vsel %vm1567_vm3, %v1512_v34, 0  ;;  %v1861_v43 = vor.u32 %v1859_v26, %v1857_v50  ;;  %v1869_v37 = vor.u32 %v1867_v25, %v1865_v53 }
 0x152   : > { %v1516_v57 = vld [vmem:[#allocation2 + $0x7c] sm:$0xf]  ;;  %v5668_v63 = vld [vmem:[#allocation2 + $0x80] sm:$0xf]  ;;  %v1873_v52 = vrot.slane %v1871_v18, 1  ;;  %v5670_v44 = vcombine.low %v1596_v62, %v1597_v17  ;;  %v1881_v49 = vrot.slane %v1879_v38, 1 }
 0x153   : > { %1919 = vrot.lane.b32.xlu0 %v1858_v55, %s5172_s15  ;;  %v4330_v19 = vcombine.low %v1515_v3, %v1516_v57  ;;  %v4350_v0 = vcombine.low %v5668_v63, %v2164_v35  ;;  %v2038_v6 = vrot.slane %v4344_v58, 1  ;;  %v1883_v47 = vshrl.u32 %v4329_v54, 16  ;;  %v1490_v55 = vld [vmem:[#allocation2 + $0x14] sm:$0xf]  ;;  %v1489_v62 = vld [vmem:[#allocation2 + $0x10] sm:$0xf] }
 0x154   : > { %v1874_v5 = vsel %vm1766_vm7, %v1869_v37, %v1873_v52  ;;  %v2040_v29 = vrot.slane %v5670_v44, 1  ;;  %v1866_v30 = vsel %vm1766_vm7, %v1861_v43, %v1865_v53  ;;  %v1875_v7 = vshrl.u32 %v4328_v39, 16  ;;  %v1485_v39 = vld [vmem:[#allocation2] sm:$0xf] }
 0x155   : > { %1923 = vrot.lane.b32.xlu1 %v1874_v5, %s5172_s15  ;;  %v1887_v33 = vshll.u32 %v4330_v19, 16  ;;  %v1598_v9 = vsel %vm5576_vm5, %v5646_v20, 0  ;;  %v1599_v11 = vsel %vm1567_vm3, %v1514_v8, 0  ;;  %v1885_v34 = vor.u32 %v1883_v47, %v1881_v49  ;;  %v1487_v8 = vld [vmem:[#allocation2 + $0x8] sm:$0xf] }
 0x156   : > { %v1600_v13 = vsel %vm5576_vm5, %v1515_v3, 0  ;;  %v1601_v14 = vsel %vm1567_vm3, %v1516_v57, 0  ;;  %v2041_v22 = vsel %vm2014_vm6, %v2038_v6, %v2040_v29  ;;  %v2187_v24 = vshll.u32 %v4350_v0, 16 }
 0x157   : > { %v2165_v61 = vld [vmem:[#allocation2 + $0x88] sm:$0x1]  ;;  %1921 = vrot.lane.b32.xlu0 %v1866_v30, %s5172_s15  ;;  %v1889_v45 = vrot.slane %v1887_v33, 1  ;;  %v4347_v56 = vcombine.low %v1600_v13, %v1601_v14  ;;  %v2039_v20 = vsel %vm2014_vm6, %v2036_v60, %v2038_v6  ;;  %v1877_v36 = vor.u32 %v1875_v7, %v1873_v52  ;;  %v1518_v33 = vld [vmem:[#allocation2] sm:$0xe] }
 0x158   : > { %v4351_v4 = vcombine.low %v2165_v61, %v2165_v61  ;;  %v4346_v40 = vcombine.low %v1598_v9, %v1599_v11  ;;  %v2189_v48 = vrot.slane %v2187_v24, 1  ;;  %v4316_v54 = vcombine.low %v1487_v8, %v1488_v46 }
 0x159   : > { %2072 = vrot.lane.b32.xlu1 %v2041_v22, %s5171_s28  ;;  %v1890_v50 = vsel %vm1766_vm7, %v1885_v34, %v1889_v45  ;;  %v5695_v12 = vrot.slane %v4347_v56, 1  ;;  %v1891_v60 = vshrl.u32 %v4330_v19, 16  ;;  %v2172_v26 = vsel %vm1569_vm8, %v2165_v61, 0 }
 0x15a   : > { %v2195_v51 = vshll.u32 %v4351_v4, 16  ;;  %v4315_v53 = vcombine.low %v1485_v39, %v1486_v31  ;;  %v1882_v25 = vsel %vm1766_vm7, %v1877_v36, %v1881_v49  ;;  %v2042_v18 = vrot.slane %v4346_v40, 1  ;;  %v1492_v49 = vld [vmem:[#allocation2 + $0x1c] sm:$0xf]  ;;  %v1494_v4 = vld [vmem:[#allocation2 + $0x24] sm:$0xf] }
 0x15b   : > { %2070 = vrot.lane.b32.xlu0 %v2039_v20, %s5171_s28  ;;  %v2191_v38 = vshrl.u32 %v4350_v0, 16  ;;  %v2170_v17 = vsel %vm5576_vm5, %v5668_v63, 0  ;;  %v2171_v57 = vsel %vm1567_vm3, %v2164_v35, 0  ;;  %v1775_v43 = vshll.u32 %v4316_v54, 16  ;;  %v1491_v35 = vld [vmem:[#allocation2 + $0x18] sm:$0xf] }
 0x15c   : > { %v2197_v58 = vrot.slane %v2195_v51, 1  ;;  %v5708_v37 = vor.u32 %v1891_v60, %v1889_v45  ;;  %v2045_v52 = vsel %vm2014_vm6, %v2042_v18, %v5695_v12  ;;  %v4354_v3 = vcombine.low %v2172_v26, %v2172_v26 }
 0x15d   : > { %1927 = vrot.lane.b32.xlu1 %v1890_v50, %s5172_s15  ;;  %v2193_v44 = vor.u32 %v2191_v38, %v2189_v48  ;;  %v1770_v19 = vshll.u32 %v4315_v53, 16  ;;  %v5713_v5 = vcombine.low %v1489_v62, %v1490_v55  ;;  %v2043_v0 = vsel %vm2014_vm6, %v2040_v29, %v2042_v18  ;;  %v1493_v50 = vld [vmem:[#allocation2 + $0x20] sm:$0xf]  ;;  %v1495_v18 = vld [vmem:[#allocation2 + $0x28] sm:$0xf] }
 0x15e   : > { %v4353_v63 = vcombine.low %v2170_v17, %v2171_v57  ;;  %v1777_v47 = vrot.slane %v1775_v43, 1  ;;  %v1572_v30 = vsel %vm5576_vm5, %v1487_v8, 0  ;;  %v4318_v7 = vcombine.low %v1491_v35, %v1492_v49 }
 0x15f   : > { %1925 = vrot.lane.b32.xlu0 %v1882_v25, %s5172_s15  ;;  %v2198_v6 = vsel %vm1766_vm7, %v2193_v44, %v2197_v58  ;;  %v2190_v9 = vsel %vm1766_vm7, %v5708_v37, %v2189_v48  ;;  %v2218_v11 = vrot.slane %v4354_v3, 1  ;;  %v1768_v61 = vshrl.u32 %v4315_v53, 16 }
 0x160   : > { %vm1566_vm9 = vcmp.ne.s16.totalorder %v5339_v27, 0  ;;  %v1772_v29 = vrot.slane %v1770_v19, 1  ;;  %v1779_v34 = vshrl.u32 %v4316_v54, 16  ;;  %v1783_v45 = vshll.u32 %v5713_v5, 16 }
 0x161   : > { %2076 = vrot.lane.b32.xlu1 %v2045_v52, %s5171_s28  ;;  %v5727_v13 = vsel %vm1567_vm3, %v1488_v46, 0  ;;  %v2216_v14 = vrot.slane %v4353_v63, 1  ;;  %v1570_v22 = vsel %vm1566_vm9, %v1518_v33, 0  ;;  %v1571_v24 = vsel %vm1567_vm3, %v1486_v31, 0  ;;  %v1496_v31 = vld [vmem:[#allocation2 + $0x2c] sm:$0xf] }
 0x162   : > { %v4333_v56 = vcombine.low %v1572_v30, %v5727_v13  ;;  %v1781_v20 = vor.u32 %v1779_v34, %v1777_v47  ;;  %v1574_v8 = vsel %vm5576_vm5, %v1489_v62, 0  ;;  %v1575_v36 = vsel %vm1567_vm3, %v1490_v55, 0  ;;  %v1497_v63 = vld [vmem:[#allocation2 + $0x30] sm:$0xf] }
 0x163   : > { %2074 = vrot.lane.b32.xlu0 %v2043_v0, %s5171_s28  ;;  %v1791_v40 = vshll.u32 %v4318_v7, 16  ;;  %v2219_v51 = vsel %vm2014_vm6, %v2216_v14, %v2218_v11  ;;  %v1773_v39 = vor.u32 %v1772_v29, %v1768_v61  ;;  %v1785_v46 = vrot.slane %v1783_v45, 1  ;;  %v1499_v45 = vld [vmem:[#allocation2 + $0x38] sm:$0xf] }
 0x164   : > { %v4332_v48 = vcombine.low %v1570_v22, %v1571_v24  ;;  %v2217_v54 = vsel %vm2014_vm6, %v5695_v12, %v2216_v14  ;;  %v4334_v60 = vcombine.low %v1574_v8, %v1575_v36  ;;  %v4319_v26 = vcombine.low %v1493_v50, %v1494_v4 }
 0x165   : > { %2201 = vrot.lane.b32.xlu1 %v2198_v6, %s5172_s15  ;;  %v1786_v53 = vsel %vm1766_vm7, %v1781_v20, %v1785_v46  ;;  %v2016_v55 = vrot.slane %v4333_v56, 1  ;;  %v1793_v25 = vrot.slane %v1791_v40, 1  ;;  %v1577_v38 = vsel %vm1567_vm3, %v1492_v49, 0  ;;  %v1498_v6 = vld [vmem:[#allocation2 + $0x34] sm:$0xf] }
 0x166   : > { %v1578_v58 = vsel %vm5576_vm5, %v1493_v50, 0  ;;  %v1579_v62 = vsel %vm1567_vm3, %v1494_v4, 0  ;;  %v4320_v17 = vcombine.low %v1495_v18, %v1496_v31  ;;  %v1778_v57 = vsel %vm1766_vm7, %v1773_v39, %v1777_v47  ;;  %v1501_v39 = vld [vmem:[#allocation2 + $0x40] sm:$0xf] }
 0x167   : > { %2199 = vrot.lane.b32.xlu0 %v2190_v9, %s5172_s15  ;;  %v2015_v43 = vrot.slane %v4332_v48, 1  ;;  %v5753_v52 = vrot.slane %v4334_v60, 1  ;;  %v1795_v44 = vshrl.u32 %v4318_v7, 16  ;;  %v1799_v3 = vshll.u32 %v4319_v26, 16  ;;  %v1500_v9 = vld [vmem:[#allocation2 + $0x3c] sm:$0xf] }
 0x168   : > { %v1576_v19 = vsel %vm5576_vm5, %v1491_v35, 0  ;;  %v5758_v0 = vcombine.low %v1578_v58, %v1579_v62  ;;  %v1807_v30 = vshll.u32 %v4320_v17, 16  ;;  %v1787_v11 = vshrl.u32 %v5713_v5, 16 }
 0x169   : > { %2224 = vrot.lane.b32.xlu1 %v2219_v51, %s5171_s28  ;;  %v4335_v49 = vcombine.low %v1576_v19, %v1577_v38  ;;  %v2019_v47 = vsel %vm2014_vm6, %v2016_v55, %v5753_v52  ;;  %v1797_v33 = vor.u32 %v1795_v44, %v1793_v25  ;;  %v2017_v7 = vsel %vm2014_vm6, %v2015_v43, %v2016_v55 }
 0x16a   : > { %v1801_v35 = vrot.slane %v1799_v3, 1  ;;  %v4321_v61 = vcombine.low %v1497_v63, %v1498_v6  ;;  %v2022_v34 = vrot.slane %v5758_v0, 1  ;;  %v1789_v14 = vor.u32 %v1787_v11, %v1785_v46  ;;  %v1502_v46 = vld [vmem:[#allocation2 + $0x44] sm:$0xf]  ;;  %v1517_v11 = vld [vmem:[#allocation2 + $0x80] sm:$0x1] }
 0x16b   : > { %2222 = vrot.lane.b32.xlu0 %v2217_v54, %s5171_s28  ;;  %v2020_v29 = vrot.slane %v4335_v49, 1  ;;  %v1809_v24 = vrot.slane %v1807_v30, 1  ;;  %v4322_v56 = vcombine.low %v1499_v45, %v1500_v9  ;;  %v1581_v4 = vsel %vm1567_vm3, %v1496_v31, 0 }
 0x16c   : > { %v1802_v22 = vsel %vm1766_vm7, %v1797_v33, %v1801_v35  ;;  %v1582_v5 = vsel %vm5576_vm5, %v1497_v63, 0  ;;  %v1583_v20 = vsel %vm1567_vm3, %v1498_v6, 0  ;;  %v1794_v8 = vsel %vm1766_vm7, %v1789_v14, %v1793_v25 }
 0x16d   : > { %1901 = vrot.lane.b32.xlu1 %v1786_v53, %s5172_s15  ;;  %v1811_v36 = vshrl.u32 %v4320_v17, 16  ;;  %v1815_v40 = vshll.u32 %v4321_v61, 16  ;;  %v2023_v50 = vsel %vm2014_vm6, %v2020_v29, %v2022_v34  ;;  %v1580_v51 = vsel %vm5576_vm5, %v1495_v18, 0 }
 0x16e   : > { %v4337_v31 = vcombine.low %v1580_v51, %v1581_v4  ;;  %v4338_v54 = vcombine.low %v1582_v5, %v1583_v20  ;;  %v1823_v60 = vshll.u32 %v4322_v56, 16  ;;  %v1803_v53 = vshrl.u32 %v4319_v26, 16  ;;  %v5811_v5 = vld [vmem:[#allocation2 + $0x18] sm:$0xf]  ;;  %v5819_v51 = vld [vmem:[#allocation2 + $0x20] sm:$0xf] }
 0x16f   : > { %1899 = vrot.lane.b32.xlu0 %v1778_v57, %s5172_s15  ;;  %v1813_v48 = vor.u32 %v1811_v36, %v1809_v24  ;;  %v2021_v55 = vsel %vm2014_vm6, %v5753_v52, %v2020_v29  ;;  %v1817_v25 = vrot.slane %v1815_v40, 1  ;;  %v4323_v38 = vcombine.low %v1501_v39, %v1502_v46  ;;  %v5802_v29 = vld [vmem:[#allocation2 + $0x14] sm:$0xf]  ;;  %v2166_v36 = vld [vmem:[#allocation2 + $0x8] sm:$0xe] }
 0x170   : > { %v1805_v58 = vor.u32 %v1803_v53, %v1801_v35  ;;  %v2024_v18 = vrot.slane %v4337_v31, 1  ;;  %v2026_v17 = vrot.slane %v4338_v54, 1  ;;  %v1825_v57 = vrot.slane %v1823_v60, 1  ;;  %v5800_v35 = vld [vmem:[#allocation2 + $0x10] sm:$0xf] }
 0x171   : > { %2050 = vrot.lane.b32.xlu1 %v2019_v47, %s5171_s28  ;;  %v1818_v62 = vsel %vm1766_vm7, %v1813_v48, %v1817_v25  ;;  %v1585_v43 = vsel %vm1567_vm3, %v1500_v9, 0  ;;  %v1586_v26 = vsel %vm5576_vm5, %v1501_v39, 0  ;;  %v1587_v44 = vsel %vm1567_vm3, %v1502_v46, 0  ;;  %v5821_v39 = vld [vmem:[#allocation2 + $0x24] sm:$0xf] }
 0x172   : > { %v1810_v3 = vsel %vm1766_vm7, %v1805_v58, %v1809_v24  ;;  %v1827_v19 = vshrl.u32 %v4322_v56, 16  ;;  %v1831_v49 = vshll.u32 %v4323_v38, 16  ;;  %v1584_v0 = vsel %vm5576_vm5, %v1499_v45, 0  ;;  %v5805_v56 = vld [vmem:[#allocation2 + $0x1c] sm:$0xf] }
 0x173   : > { %2048 = vrot.lane.b32.xlu0 %v2017_v7, %s5171_s28  ;;  %v2027_v63 = vsel %vm2014_vm6, %v2024_v18, %v2026_v17  ;;  %v4339_v47 = vcombine.low %v1584_v0, %v1585_v43  ;;  %v4340_v33 = vcombine.low %v1586_v26, %v1587_v44  ;;  %v2025_v30 = vsel %vm2014_vm6, %v2022_v34, %v2024_v18  ;;  %v2651_v53 = vld [vmem:[#allocation2 + $0x10] sm:$0xe]  ;;  %v5847_v26 = vld [vmem:[#allocation2 + $0x28] sm:$0xf] }
 0x174   : > { %v1829_v6 = vor.u32 %v1827_v19, %v1825_v57  ;;  %v1819_v9 = vshrl.u32 %v4321_v61, 16  ;;  %v1833_v7 = vrot.slane %v1831_v49, 1  ;;  %v1602_v61 = vsel %vm1569_vm8, %v1517_v11, 0 }
 0x175   : > { %1905 = vrot.lane.b32.xlu1 %v1802_v22, %s5172_s15  ;;  %v2028_v22 = vrot.slane %v4339_v47, 1  ;;  %v2030_v24 = vrot.slane %v4340_v33, 1  ;;  %v4331_v4 = vcombine.low %v1517_v11, %v1517_v11  ;;  %v4407_v20 = vcombine.low %v5800_v35, %v5802_v29  ;;  %v5864_v33 = vld [vmem:[#allocation2 + $0x30] sm:$0xf]  ;;  %v5871_v11 = vld [vmem:[#allocation2 + $0x34] sm:$0xf] }
 0x176   : > { %v1821_v14 = vor.u32 %v1819_v9, %v1817_v25  ;;  %v1834_v45 = vsel %vm1766_vm7, %v1829_v6, %v1833_v7  ;;  %v1835_v46 = vshrl.u32 %v4323_v38, 16  ;;  %v2169_v60 = vsel %vm1566_vm9, %v2166_v36, 0 }
 0x177   : > { %1903 = vrot.lane.b32.xlu0 %v1794_v8, %s5172_s15  ;;  %v4408_v8 = vcombine.low %v5811_v5, %v5805_v56  ;;  %v2031_v40 = vsel %vm2014_vm6, %v2028_v22, %v2030_v24  ;;  %v2029_v48 = vsel %vm2014_vm6, %v2026_v17, %v2028_v22  ;;  %v1895_v31 = vshll.u32 %v4331_v4, 16 }
 0x178   : > { %v1826_v34 = vsel %vm1766_vm7, %v1821_v14, %v1825_v57  ;;  %v2883_v54 = vshll.u32 %v4407_v20, 16  ;;  %v4352_v25 = vcombine.low %v2169_v60, %v5727_v13  ;;  %v5831_v58 = vcombine.low %v5819_v51, %v5821_v39  ;;  %v5873_v14 = vld [vmem:[#allocation2 + $0x38] sm:$0xf] }
 0x179   : > { %2054 = vrot.lane.b32.xlu1 %v2023_v50, %s5171_s28  ;;  %v4348_v50 = vcombine.low %v1602_v61, %v1602_v61  ;;  %v1837_v38 = vor.u32 %v1835_v46, %v1833_v7  ;;  %v2033_v18 = vsel %vm2014_vm6, %v2030_v24, %v2032_v2  ;;  %v2684_v57 = vsel %vm1566_vm9, %v2651_v53, 0 }
 0x17a   : > { %v2685_v13 = vsel %vm1567_vm3, %v5802_v29, 0  ;;  %v2687_v43 = vsel %vm1567_vm3, %v5805_v56, 0  ;;  %v1897_v2 = vrot.slane %v1895_v31, 1  ;;  %v2885_v44 = vrot.slane %v2883_v54, 1 }
 0x17b   : > { %2052 = vrot.lane.b32.xlu0 %v2021_v55, %s5171_s28  ;;  %v2888_v55 = vshll.u32 %v4408_v8, 16  ;;  %v2046_v17 = vrot.slane %v4348_v50, 1  ;;  %v1842_v59 = vsel %vm1766_vm7, %v1837_v38, %v5643_v10  ;;  %v2214_v19 = vrot.slane %v4352_v25, 1 }
 0x17c   : > { %v2896_v49 = vshll.u32 %v5831_v58, 16  ;;  %v2686_v0 = vsel %vm5576_vm5, %v5811_v5, 0  ;;  %v2881_v10 = vshrl.u32 %v4407_v20, 16  ;;  %v4424_v6 = vcombine.low %v2684_v57, %v2685_v13  ;;  %v5928_v57 = vld [vmem:[#allocation2 + $0x4c] sm:$0xf] }
 0x17d   : > { %1909 = vrot.lane.b32.xlu1 %v1818_v62, %s5172_s15  ;;  %v5833_v62 = vld [vmem:[#allocation2 + $0x2c] sm:$0xf]  ;;  %v2890_v27 = vrot.slane %v2888_v55, 1  ;;  %v5862_v47 = vcombine.low %v2686_v0, %v2687_v43  ;;  %v1898_v9 = vsel %vm1766_vm7, %v5708_v37, %v1897_v2  ;;  %v2892_v7 = vshrl.u32 %v4408_v8, 16  ;;  %v5892_v8 = vld [vmem:[#allocation2 + $0x44] sm:$0xf] }
 0x17e   : > { %v2689_v22 = vsel %vm1567_vm3, %v5821_v39, 0  ;;  %v5034_v37 = vld [vmem:[%s6853_s5 + $0x8] sm:$0x3f]   ;;  %v2215_v61 = vsel %vm2014_vm6, %v2214_v19, %v5753_v52  ;;  %v2898_v4 = vrot.slane %v2896_v49, 1  ;;  %v5898_v46 = vcombine.low %v5864_v33, %v5871_v11  ;;  %v5905_v52 = vld [vmem:[%s6853_s5] sm:$0x3f]  }
 0x17f   : > { %1907 = vrot.lane.b32.xlu0 %v1810_v3, %s5172_s15  ;;  %v5853_v3 = vcombine.low %v5847_v26, %v5833_v62  ;;  %v3128_v50 = vrot.slane %v5862_v47, 1  ;;  %6878 = vst [vmem:[#allocation7_spill] sm:$0xff] %v5905_v52  ;;  %v2900_v54 = vshrl.u32 %v5831_v58, 16  ;;  %v2691_v60 = vsel %vm1567_vm3, %v5833_v62, 0  ;;  %4922 = vmatprep.subr.msk.bf16.mxu1 %vm2278_vm10, %v5034_v37  ;;  %v5937_v49 = vld [vmem:[#allocation2 + $0x48] sm:$0xf] }
 0x180   : > { %v2692_v55 = vsel %vm5576_vm5, %v5864_v33, 0  ;;  %v2693_v25 = vsel %vm1567_vm3, %v5871_v11, 0  ;;  %v2280_v38 = vsel %vm2278_vm10, %v5034_v37, 0  ;;  %4921 = vmatprep.subr.msk.bf16.mxu0 %vm2278_vm10, %v5034_v37  ;;  %v2690_v58 = vsel %vm5576_vm5, %v5847_v26, 0 }
 0x181   : > { %2058 = vrot.lane.b32.xlu1 %v2027_v63, %s5171_s28  ;;  %v2047_v63 = vsel %vm2014_vm6, %v5695_v12, %v2046_v17  ;;  %v2688_v12 = vsel %vm5576_vm5, %v5819_v51, 0  ;;  %v2904_v24 = vshll.u32 %v5853_v3, 16  ;;  %4854 = vmatpush3.bf16.msra.mxu1 %v2280_v38  ;;  %v2902_v43 = vor.u32 %v2900_v54, %v2898_v4 }
 0x182   : > { %v4426_v31 = vcombine.low %v2688_v12, %v2689_v22  ;;  %v4427_v2 = vcombine.low %v2690_v58, %v2691_v60  ;;  %4923 = vmatprep.subr.msk.bf16.mxu1 %vm2278_vm10, %v5905_v52  ;;  %4718 = vmatpush3.bf16.msra.mxu0 %v2280_v38  ;;  %v4428_v19 = vcombine.low %v2692_v55, %v2693_v25  ;;  %v5963_v60 = vld [vmem:[#allocation2 + $0x50] sm:$0xf]  ;;  %v5969_v25 = vld [vmem:[#allocation2 + $0x58] sm:$0xf]  ;;  %vm2128_vm13 = vcmask 64512  }
 0x183   : > { %2056 = vrot.lane.b32.xlu0 %v2025_v30, %s5171_s28  ;;  %v5866_v30 = vld [vmem:[#allocation2 + $0x3c] sm:$0xf]  ;;  %v2906_v53 = vrot.slane %v2904_v24, 1  ;;  %v2694_v24 = vsel %vm5576_vm5, %v5873_v14, 0  ;;  %v6061_v52 = vld [vmem:[#allocation2 + $0x78] sm:$0xf] }
 0x184   : > { %v5890_v20 = vcombine.low %v5873_v14, %v5866_v30  ;;  %v3130_v0 = vrot.slane %v4426_v31, 1  ;;  %v3132_v22 = vrot.slane %v4427_v2, 1  ;;  %v3134_v37 = vrot.slane %v4428_v19, 1  ;;  %v5979_v2 = vld [vmem:[#allocation2 + $0x60] sm:$0xf] }
 0x185   : > { %1913 = vrot.lane.b32.xlu1 %v1834_v45, %s5172_s15  ;;  %v2886_v45 = vor.u32 %v2885_v44, %v2881_v10  ;;  %v2695_v10 = vsel %vm1567_vm3, %v5866_v30, 0 }
 0x187   : > { %1911 = vrot.lane.b32.xlu0 %v1826_v34, %s5172_s15  ;;  %v2894_v34 = vor.u32 %v2892_v7, %v2890_v27  ;;  %v2891_v36 = vsel %vm1766_vm7, %v2886_v45, %v2890_v27  ;;  %v2908_v27 = vshrl.u32 %v5853_v3, 16  ;;  %v2697_v7 = vsel %vm1567_vm3, %v5892_v8, 0 }
 0x189   : > { %2062 = vrot.lane.b32.xlu1 %v2031_v40, %s5171_s28  ;;  %v3127_v40 = vrot.slane %v4424_v6, 1  ;;  %v2899_v44 = vsel %vm1766_vm7, %v2894_v34, %v2898_v4  ;;  %v4414_v6 = vcombine.low %v5937_v49, %v5928_v57  ;;  %v2910_v45 = vor.u32 %v2908_v27, %v2906_v53  ;;  %v5957_v4 = vld [vmem:[#allocation2 + $0x5c] sm:$0xf] }
 0x18a   : > { %v4429_v34 = vcombine.low %v2694_v24, %v2695_v10  ;;  %v4416_v58 = vcombine.low %v5969_v25, %v5957_v4 }
 0x18b   : > { %2060 = vrot.lane.b32.xlu0 %v2029_v48, %s5171_s28  ;;  %v5900_v48 = vld [vmem:[#allocation2 + $0x40] sm:$0xf]  ;;  %v3129_v13 = vsel %vm2014_vm6, %v3127_v40, %v3128_v50  ;;  %v2916_v40 = vshrl.u32 %v5898_v46, 16  ;;  %v2936_v54 = vshll.u32 %v4414_v6, 16 }
 0x18c   : > { %v4413_v17 = vcombine.low %v5900_v48, %v5892_v8  ;;  %v2696_v3 = vsel %vm5576_vm5, %v5900_v48, 0 }
 0x18d   : > { %2064 = vrot.lane.b32.xlu1 %v2033_v18, %s5171_s28  ;;  %v2920_v18 = vshll.u32 %v5890_v20, 16  ;;  %v5961_v31 = vcombine.low %v2696_v3, %v2697_v7  ;;  %v2698_v3 = vsel %vm5576_vm5, %v5937_v49, 0  ;;  %v5993_v7 = vld [vmem:[#allocation2 + $0x6c] sm:$0xf] }
 0x18e   : > { %6879 = vst [vmem:[#allocation8_spill] sm:$0xff] %v5993_v7 }
 0x18f   : > { %1915 = vrot.lane.b32.xlu0 %v1842_v59, %s5172_s15  ;;  %v2912_v59 = vshll.u32 %v5898_v46, 16  ;;  %v2922_v47 = vrot.slane %v2920_v18, 1  ;;  %v3135_v18 = vsel %vm2014_vm6, %v3132_v22, %v3134_v37  ;;  %v3138_v19 = vrot.slane %v5961_v31, 1 }
 0x191   : > { %2078 = vrot.lane.b32.xlu1 %v2047_v63, %s5171_s28  ;;  %v2907_v63 = vsel %vm1766_vm7, %v2902_v43, %v2906_v53  ;;  %v2914_v12 = vrot.slane %v2912_v59, 1  ;;  %v5965_v53 = vld [vmem:[#allocation2 + $0x54] sm:$0xf]  ;;  %v2932_v43 = vshrl.u32 %v4413_v17, 16 }
 0x192   : > { %v4415_v59 = vcombine.low %v5963_v60, %v5965_v53 }
 0x193   : > { %1929 = vrot.lane.b32.xlu0 %v1898_v9, %s5172_s15  ;;  %v2928_v9 = vshll.u32 %v4413_v17, 16  ;;  %v2915_v38 = vsel %vm1766_vm7, %v2910_v45, %v2914_v12  ;;  %v2918_v46 = vor.u32 %v2916_v40, %v2914_v12  ;;  %v2701_v45 = vsel %vm1567_vm3, %v5965_v53, 0 }
 0x194   : > { %v2952_v12 = vshll.u32 %v4416_v58, 16  ;;  %v2944_v24 = vshll.u32 %v4415_v59, 16 }
 0x195   : > { %2220 = vrot.lane.b32.xlu1 %v2215_v61, %s5171_s28  ;;  %v2924_v61 = vshrl.u32 %v5890_v20, 16  ;;  %v2930_v20 = vrot.slane %v2928_v9, 1  ;;  %v2923_v27 = vsel %vm1766_vm7, %v2918_v46, %v2922_v47  ;;  %v2940_v9 = vshrl.u32 %v4414_v6, 16 }
 0x197   : > { %3012 = vrot.lane.b32.xlu0 %v2891_v36, %s5172_s15  ;;  %v3131_v36 = vsel %vm2014_vm6, %v3128_v50, %v3130_v0  ;;  %v2926_v55 = vor.u32 %v2924_v61, %v2922_v47  ;;  %v3133_v50 = vsel %vm2014_vm6, %v3130_v0, %v3132_v22  ;;  %v2938_v0 = vrot.slane %v2936_v54, 1 }
 0x198   : > { %v2934_v10 = vor.u32 %v2932_v43, %v2930_v20  ;;  %v2700_v47 = vsel %vm5576_vm5, %v5963_v60, 0  ;;  %v2954_v43 = vrot.slane %v2952_v12, 1 }
 0x199   : > { %3160 = vrot.lane.b32.xlu1 %v3129_v13, %s5171_s28  ;;  %v3136_v13 = vrot.slane %v4429_v34, 1  ;;  %v2931_v17 = vsel %vm1766_vm7, %v2926_v55, %v2930_v20  ;;  %v2703_v34 = vsel %vm1567_vm3, %v5957_v4, 0  ;;  %v2942_v54 = vor.u32 %v2940_v9, %v2938_v0  ;;  %v6016_v20 = vld [vmem:[#allocation2 + $0x74] sm:$0xf] }
 0x19a   : > { %v2939_v31 = vsel %vm1766_vm7, %v2934_v10, %v2938_v0  ;;  %v2956_v9 = vshrl.u32 %v4416_v58, 16 }
 0x19b   : > { %3014 = vrot.lane.b32.xlu0 %v2899_v44, %s5172_s15  ;;  %v5981_v44 = vld [vmem:[#allocation2 + $0x64] sm:$0xf]  ;;  %v3137_v6 = vsel %vm2014_vm6, %v3134_v37, %v3136_v13  ;;  %v3139_v40 = vsel %vm2014_vm6, %v3136_v13, %v3138_v19  ;;  %v4432_v37 = vcombine.low %v2700_v47, %v2701_v45  ;;  %v6028_v13 = vld [vmem:[#allocation2 + $0x70] sm:$0xf] }
 0x19c   : > { %v4417_v22 = vcombine.low %v5979_v2, %v5981_v44  ;;  %v2705_v46 = vsel %vm1567_vm3, %v5981_v44, 0 }
 0x19d   : > { %3016 = vrot.lane.b32.xlu1 %v2907_v63, %s5172_s15  ;;  %v2699_v63 = vsel %vm1567_vm3, %v5928_v57, 0  ;;  %v3142_v21 = vrot.slane %v4432_v37, 1 }
 0x19e   : > { %v4431_v61 = vcombine.low %v2698_v3, %v2699_v63  ;;  %v2946_v63 = vrot.slane %v2944_v24, 1  ;;  %v1540_v3 = vsel %vm5333_vm4, %v5587_v15, 0  ;;  %v6052_v24 = vld [vmem:[#allocation2 + $0x7c] sm:$0xf]  ;;  %v2948_v15 = vshrl.u32 %v4415_v59, 16 }
 0x19f   : > { %3162 = vrot.lane.b32.xlu0 %v3131_v36, %s5171_s28  ;;  %v6008_v36 = vld [vmem:[#allocation2 + $0x68] sm:$0xf]  ;;  %v6069_v59 = vcombine.low %v6061_v52, %v6052_v24 }
 0x1a0   : > { %v6014_v55 = vcombine.low %v6008_v36, %v5993_v7  ;;  %v3140_v10 = vrot.slane %v4431_v61, 1  ;;  %v2706_v58 = vsel %vm5576_vm5, %v6008_v36, 0  ;;  %v1539_v61 = vsel %vm6040_vm12, %v5585_v16, 0 }
 0x1a1   : > { %3164 = vrot.lane.b32.xlu1 %v3133_v50, %s5171_s28  ;;  %v2704_v50 = vsel %vm5576_vm5, %v5979_v2, 0  ;;  %v6065_v37 = vcombine.low %v1539_v61, %v1540_v3 }
 0x1a2   : > { %v4434_v45 = vcombine.low %v2704_v50, %v2705_v46  ;;  %v2968_v12 = vshll.u32 %v6014_v55, 16  ;;  %v2958_v50 = vor.u32 %v2956_v9, %v2954_v43 }
 0x1a3   : > { %3018 = vrot.lane.b32.xlu0 %v2915_v38, %s5172_s15  ;;  %v2702_v38 = vsel %vm5576_vm5, %v5969_v25, 0 }
 0x1a4   : > { %v4433_v0 = vcombine.low %v2702_v38, %v2703_v34  ;;  %v2947_v38 = vsel %vm1766_vm7, %v2942_v54, %v2946_v63  ;;  %v3146_v16 = vrot.slane %v4434_v45, 1  ;;  %v2972_v45 = vshrl.u32 %v6014_v55, 16 }
 0x1a5   : > { %3020 = vrot.lane.b32.xlu1 %v2923_v27, %s5172_s15  ;;  %v2960_v27 = vshll.u32 %v4417_v22, 16 }
 0x1a6   : > { %v3144_v32 = vrot.slane %v4433_v0, 1  ;;  %v2709_v0 = vsel %vm1567_vm3, %v6016_v20, 0 }
 0x1a7   : > { %3166 = vrot.lane.b32.xlu0 %v3135_v18, %s5171_s28  ;;  %v2707_v18 = vsel %vm1567_vm3, %v5993_v7, 0  ;;  %v2962_v46 = vrot.slane %v2960_v27, 1  ;;  %v3141_v7 = vsel %vm2014_vm6, %v3138_v19, %v3140_v10  ;;  %v3143_v27 = vsel %vm2014_vm6, %v3140_v10, %v3142_v21  ;;  %v6086_v10 = vld [vmem:[#allocation2 + $0x84] sm:$0xf] }
 0x1a8   : > { %v6058_v34 = vcombine.low %v2706_v58, %v2707_v18  ;;  %v2964_v18 = vshrl.u32 %v4417_v22, 16  ;;  %v2970_v58 = vrot.slane %v2968_v12, 1  ;;  %v2708_v19 = vsel %vm5576_vm5, %v6028_v13, 0 }
 0x1a9   : > { %3168 = vrot.lane.b32.xlu1 %v3137_v6, %s5171_s28  ;;  %v6047_v6 = vcombine.low %v6028_v13, %v6016_v20  ;;  %v2963_v22 = vsel %vm1766_vm7, %v2958_v50, %v2962_v46  ;;  %v3145_v9 = vsel %vm2014_vm6, %v3142_v21, %v3144_v32  ;;  %v1541_v12 = vsel %vm6040_vm12, %v5594_v42, 0 }
 0x1aa   : > { %v2966_v3 = vor.u32 %v2964_v18, %v2962_v46  ;;  %v3147_v21 = vsel %vm2014_vm6, %v3144_v32, %v3146_v16  ;;  %v6101_v46 = vcombine.low %v2708_v19, %v2709_v0  ;;  %v2710_v18 = vsel %vm5576_vm5, %v6061_v52, 0 }
 0x1ab   : > { %3022 = vrot.lane.b32.xlu0 %v2931_v17, %s5172_s15  ;;  %v2950_v17 = vor.u32 %v2948_v15, %v2946_v63  ;;  %v2976_v54 = vshll.u32 %v6047_v6, 16  ;;  %v2984_v15 = vshll.u32 %v6069_v59, 16  ;;  %v2654_v0 = vsel %vm6040_vm12, %v5811_v5, 0 }
 0x1ac   : > { %v2971_v61 = vsel %vm1766_vm7, %v2966_v3, %v2970_v58  ;;  %v2655_v3 = vsel %vm5333_vm4, %v5805_v56, 0  ;;  %v2659_v56 = vsel %vm5333_vm4, %v5833_v62, 0  ;;  %v2663_v62 = vsel %vm5333_vm4, %v5866_v30, 0 }
 0x1ad   : > { %3024 = vrot.lane.b32.xlu1 %v2939_v31, %s5172_s15  ;;  %v3148_v31 = vrot.slane %v6058_v34, 1  ;;  %v2955_v63 = vsel %vm1766_vm7, %v2950_v17, %v2954_v43  ;;  %v1542_v43 = vsel %vm5333_vm4, %v5596_v28, 0  ;;  %v6099_v50 = vrot.slane %v2976_v54, 1  ;;  %v6317_v34 = vld [vmem:[%s6853_s5 + $0x10] sm:$0x3f]  }
 0x1ae   : > { %v2980_v17 = vshrl.u32 %v6047_v6, 16  ;;  %v6129_v54 = vrot.slane %v2984_v15, 1  ;;  %v2667_v30 = vsel %vm5333_vm4, %v5928_v57, 0  ;;  %v2671_v57 = vsel %vm5333_vm4, %v5957_v4, 0 }
 0x1af   : > { %3170 = vrot.lane.b32.xlu0 %v3139_v40, %s5171_s28  ;;  %v6084_v40 = vld [vmem:[#allocation2 + $0x80] sm:$0xf]  ;;  %v6109_v55 = vsel %vm2014_vm6, %v3146_v16, %v3148_v31  ;;  %v2653_v16 = vsel %vm5333_vm4, %v5802_v29, 0  ;;  %v2657_v29 = vsel %vm5333_vm4, %v5821_v39, 0  ;;  %v2661_v39 = vsel %vm5333_vm4, %v5871_v11, 0 }
 0x1b0   : > { %v6114_v32 = vcombine.low %v6084_v40, %v6086_v10  ;;  %v2664_v11 = vsel %vm6040_vm12, %v5900_v48, 0  ;;  %v2669_v48 = vsel %vm5333_vm4, %v5965_v53, 0  ;;  %v2672_v53 = vsel %vm6040_vm12, %v5979_v2, 0 }
 0x1b1   : > { %3172 = vrot.lane.b32.xlu1 %v3141_v7, %s5171_s28  ;;  %v6104_v7 = vor.u32 %v2972_v45, %v2970_v58  ;;  %v2652_v58 = vsel %vm6040_vm12, %v5800_v35, 0  ;;  %v6139_v45 = vcombine.low %v2654_v0, %v2655_v3  ;;  %v2656_v35 = vsel %vm6040_vm12, %v5819_v51, 0  ;;  %v6206_v3 = vld [vmem:[#allocation2 + $0x88] sm:$0xf] }
 0x1b2   : > { %v6131_v19 = vcombine.low %v2652_v58, %v2653_v16  ;;  %v6151_v5 = vcombine.low %v2656_v35, %v2657_v29  ;;  %v2660_v51 = vsel %vm6040_vm12, %v5864_v33, 0  ;;  %v2665_v58 = vsel %vm5333_vm4, %v5892_v8, 0  ;;  %v2649_v35 = vld [vmem:[#allocation2 + $0x8c] sm:$0xf]  ;;  %v6882_v29 = vld [vmem:[#allocation8_spill] sm:$0xff] }
 0x1b3   : > { %3026 = vrot.lane.b32.xlu0 %v2947_v38, %s5172_s15  ;;  %v2711_v38 = vsel %vm1567_vm3, %v6052_v24, 0  ;;  %v6184_v16 = vcombine.low %v2664_v11, %v2665_v58  ;;  %v2676_v2 = vsel %vm6040_vm12, %v6028_v13, 0  ;;  %v2683_v11 = vsel %vm5333_vm4, %v2649_v35, 0 }
 0x1b5   : > { %3028 = vrot.lane.b32.xlu1 %v2955_v63, %s5172_s15  ;;  %v2658_v63 = vsel %vm6040_vm12, %v5847_v26, 0  ;;  %v6164_v26 = vcombine.low %v2660_v51, %v2661_v39  ;;  %v2679_v51 = vsel %vm5333_vm4, %v6052_v24, 0  ;;  %v6256_v24 = vcombine.low %v6206_v3, %v2649_v35 }
 0x1b6   : > { %v6162_v15 = vcombine.low %v2658_v63, %v2659_v56  ;;  %v2675_v63 = vsel %vm5333_vm4, %v6882_v29, 0 }
 0x1b7   : > { %3174 = vrot.lane.b32.xlu0 %v3143_v27, %s5171_s28  ;;  %v2662_v27 = vsel %vm6040_vm12, %v5873_v14, 0  ;;  %v2666_v14 = vsel %vm6040_vm12, %v5937_v49, 0  ;;  %v2670_v49 = vsel %vm6040_vm12, %v5969_v25, 0  ;;  %v2674_v25 = vsel %vm6040_vm12, %v6008_v36, 0 }
 0x1b8   : > { %v6173_v33 = vcombine.low %v2662_v27, %v2663_v62  ;;  %v6196_v8 = vcombine.low %v2666_v14, %v2667_v30  ;;  %v6231_v56 = vcombine.low %v2674_v25, %v2675_v63  ;;  %v2681_v27 = vsel %vm5333_vm4, %v6086_v10, 0 }
 0x1b9   : > { %3176 = vrot.lane.b32.xlu1 %v3145_v9, %s5171_s28  ;;  %v2668_v9 = vsel %vm6040_vm12, %v5963_v60, 0  ;;  %v6208_v60 = vcombine.low %v2670_v49, %v2671_v57  ;;  %v6253_v62 = vcombine.low %v2710_v18, %v2711_v38  ;;  %v2979_v14 = vsel %vm1766_vm7, %v6104_v7, %v6099_v50 }
 0x1ba   : > { %v6198_v0 = vcombine.low %v2668_v9, %v2669_v48  ;;  %v3150_v30 = vrot.slane %v6101_v46, 1  ;;  %v2982_v18 = vor.u32 %v2980_v17, %v6099_v50  ;;  %v2992_v48 = vshll.u32 %v6114_v32, 16 }
 0x1bb   : > { %3030 = vrot.lane.b32.xlu0 %v2963_v22, %s5172_s15  ;;  %v2673_v22 = vsel %vm5333_vm4, %v5981_v44, 0  ;;  %v2677_v44 = vsel %vm5333_vm4, %v6016_v20, 0  ;;  %v2680_v20 = vsel %vm6040_vm12, %v6084_v40, 0  ;;  %v2712_v7 = vsel %vm5576_vm5, %v6084_v40, 0  ;;  %v5043_v40 = vld [vmem:[#allocation2 + $0x5c] sm:$0xf] }
 0x1bc   : > { %v6220_v4 = vcombine.low %v2672_v53, %v2673_v22  ;;  %v6233_v36 = vcombine.low %v2676_v2, %v2677_v44  ;;  %v1544_v50 = vsel %vm5333_vm4, %v5043_v40, 0  ;;  %v2988_v17 = vshrl.u32 %v6069_v59, 16  ;;  %v2650_v22 = vld [vmem:[#allocation2 + $0x90] sm:$0x1]  ;;  %v5044_v44 = vld [vmem:[#allocation2 + $0x60] sm:$0xf] }
 0x1bd   : > { %3032 = vrot.lane.b32.xlu1 %v2971_v61, %s5172_s15  ;;  %v2678_v61 = vsel %vm6040_vm12, %v6061_v52, 0  ;;  %v2682_v52 = vsel %vm6040_vm12, %v6206_v3, 0  ;;  %v3152_v49 = vrot.slane %v6253_v62, 1  ;;  %v3000_v28 = vshll.u32 %v6256_v24, 16  ;;  %v5046_v62 = vld [vmem:[#allocation2 + $0x58] sm:$0xf] }
 0x1be   : > { %v2067_v39 = vpop.permute.xlu1 %2066  ;;  %v6242_v13 = vcombine.low %v2678_v61, %v2679_v51  ;;  %v6271_v38 = vcombine.low %v2682_v52, %v2683_v11  ;;  %v3151_v42 = vsel %vm2014_vm6, %v3148_v31, %v3150_v30  ;;  %v2714_v59 = vsel %vm5576_vm5, %v6206_v3, 0  ;;  %v5045_v3 = vld [vmem:[#allocation2 + $0x64] sm:$0xf] }
 0x1bf   : > { %3178 = vrot.lane.b32.xlu0 %v3147_v21, %s5171_s28  ;;  %v6258_v21 = vcombine.low %v2680_v20, %v2681_v27  ;;  %v2990_v29 = vor.u32 %v2988_v17, %v6129_v54  ;;  %v2994_v63 = vrot.slane %v2992_v48, 1  ;;  %v4423_v2 = vcombine.low %v2650_v22, %v2650_v22 }
 0x1c0   : > { %v1545_v1 = vsel %vm6040_vm12, %v5044_v44, 0  ;;  %v2715_v51 = vsel %vm1567_vm3, %v2649_v35, 0  ;;  %v2996_v20 = vshrl.u32 %v6114_v32, 16  ;;  %v3002_v27 = vrot.slane %v3000_v28, 1  ;;  %v5050_v44 = vld [vmem:[#allocation2 + $0x68] sm:$0xf] }
 0x1c1   : > { %v1918_v58 = vpop.permute.xlu0 %1917  ;;  %3180 = vrot.lane.b32.xlu1 %v6109_v55, %s5171_s28  ;;  %v2713_v55 = vsel %vm1567_vm3, %v6086_v10, 0  ;;  %v2987_v10 = vsel %vm1766_vm7, %v2982_v18, %v6129_v54  ;;  %v1546_v54 = vsel %vm5333_vm4, %v5045_v3, 0  ;;  %v4439_v52 = vcombine.low %v2714_v59, %v2715_v51 }
 0x1c2   : > { %v2109_v9 = vsel %vm612_vm1, %v6065_v37, %v1918_v58  ;;  %v2069_v6 = vpop.permute.xlu1 %2068  ;;  %v4309_v37 = vcombine.low %v1541_v12, %v1542_v43  ;;  %v6883_v12 = vld [vmem:[#allocation7_spill] sm:$0xff]  ;;  %v4438_v53 = vcombine.low %v2712_v7, %v2713_v55  ;;  %v1543_v11 = vsel %vm6040_vm12, %v5046_v62, 0 }
 0x1c3   : > { %v6283_v46 = vsel %vm2128_vm13, %v2109_v9, %v2067_v39  ;;  %3034 = vrot.lane.b32.xlu0 %v2979_v14, %s5172_s15  ;;  %v2455_v43 = vsel %vm2278_vm10, %v6883_v12, 0  ;;  %v3153_v39 = vsel %vm2014_vm6, %v3150_v30, %v3152_v49  ;;  %v2995_v41 = vsel %vm1766_vm7, %v2990_v29, %v2994_v63 }
 0x1c4   : > { %4735 = vmatprep.mubr.msk.bf16.mxu1 %vm2245_vm14, %v6283_v46  ;;  %v3154_v14 = vrot.slane %v4438_v53, 1  ;;  %v4311_v35 = vcombine.low %v1545_v1, %v1546_v54  ;;  %v2998_v18 = vor.u32 %v2996_v20, %v2994_v63  ;;  %v3008_v9 = vshll.u32 %v4423_v2, 16  ;;  %v5048_v53 = vld [vmem:[#allocation2 + $0x74] sm:$0xf] }
 0x1c5   : > { %v1920_v57 = vpop.permute.xlu0 %1919  ;;  %3036 = vrot.lane.b32.xlu1 %v2987_v10, %s5172_s15  ;;  %v4310_v32 = vcombine.low %v1543_v11, %v1544_v50  ;;  %v2716_v7 = vsel %vm1569_vm8, %v2650_v22, 0  ;;  %v3156_v40 = vrot.slane %v4439_v52, 1  ;;  %v1550_v22 = vsel %vm5333_vm4, %v5048_v53, 0  ;;  %v5051_v11 = vld [vmem:[%s5288_s29] sm:$0xff]  }
 0x1c6   : > { %v2112_v25 = vsel %vm612_vm1, %v4309_v37, %v1920_v57  ;;  %v3004_v37 = vshrl.u32 %v6256_v24, 16  ;;  %v3155_v28 = vsel %vm2014_vm6, %v3152_v49, %v3154_v14  ;;  %v3010_v12 = vrot.slane %v3008_v9, 1  ;;  %v5047_v24 = vld [vmem:[#allocation2 + $0x70] sm:$0xf] }
 0x1c7   : > { %v6320_v31 = vsel %vm2128_vm13, %v2112_v25, %v2069_v6  ;;  %3182 = vrot.lane.b32.xlu0 %v3151_v42, %s5171_s28  ;;  %v1924_v61 = vpop.permute.xlu1 %1923  ;;  %v3003_v6 = vsel %vm1766_vm7, %v2998_v18, %v3002_v27  ;;  %v1549_v49 = vsel %vm6040_vm12, %v5047_v24, 0  ;;  %v5049_v25 = vld [vmem:[#allocation2 + $0x6c] sm:$0xf]  ;;  %v3157_v63 = vsel %vm2014_vm6, %v3154_v14, %v3156_v40  ;;  %v5053_v18 = vld [vmem:[#allocation2 + $0x84] sm:$0xf] }
 0x1c8   : > { %4736 = vmatmul.mubr.msk.bf16.vlgmr.msra.gmra.mrb[4].mxu1 %vm2245_vm14, %v6320_v31  ;;  %v2118_v55 = vsel %vm612_vm1, %v4311_v35, %v1924_v61  ;;  %v3006_v42 = vor.u32 %v3004_v37, %v3002_v27  ;;  %v1548_v29 = vsel %vm5333_vm4, %v5049_v25, 0  ;;  %v1547_v1 = vsel %vm6040_vm12, %v5050_v44, 0  ;;  %v5062_v44 = vld [vmem:[#allocation2 + $0x4] sm:$0xf] }
 0x1c9   : > { %v1922_v58 = vpop.permute.xlu0 %1921  ;;  %4752 = vmatpush3.bf16.msra.mxu1 %v2455_v43  ;;  %3184 = vrot.lane.b32.xlu1 %v3153_v39, %s5171_s28  ;;  %v4440_v43 = vcombine.low %v2716_v7, %v2716_v7  ;;  %v4313_v54 = vcombine.low %v1549_v49, %v1550_v22  ;;  %v4312_v51 = vcombine.low %v1547_v1, %v1548_v29  ;;  %v2168_v9 = vsel %vm5333_vm4, %v5053_v18, 0  ;;  %v5058_v49 = vld [vmem:[%s5288_s29 + $0x20] sm:$0xff]   ;;  %v5060_v29 = vld [vmem:[%s5288_s29 + $0x18] sm:$0xff]  }
 0x1ca   : > { %4924 = vmatprep.subr.msk.bf16.mxu1 %vm2278_vm10, %v6317_v34  ;;  %v2115_v10 = vsel %vm612_vm1, %v4310_v32, %v1922_v58  ;;  %v3011_v3 = vsel %vm1766_vm7, %v3006_v42, %v3010_v12  ;;  %v1522_v1 = vsel %vm5333_vm4, %v5062_v44, 0  ;;  %v5066_v18 = vld [vmem:[%s5288_s29 + $0x40] sm:$0xff]   ;;  %v5075_v44 = vld [vmem:[#allocation2 + $0x2c] sm:$0xf] }
 0x1cb   : > { %3038 = vrot.lane.b32.xlu0 %v2995_v41, %s5172_s15  ;;  %v2073_v30 = vpop.permute.xlu1 %2072  ;;  %v3158_v61 = vrot.slane %v4440_v43, 1  ;;  %v5052_v41 = vld [vmem:[#allocation2 + $0x80] sm:$0xf] }
 0x1cc   : > { %v6348_v50 = vsel %vm2128_vm13, %v2118_v55, %v2073_v30  ;;  %v2167_v35 = vsel %vm6040_vm12, %v5052_v41, 0  ;;  %v5054_v30 = vld [vmem:[#allocation2 + $0x7c] sm:$0xf]  ;;  %v5055_v55 = vld [vmem:[%s5288_s29 + $0x10] sm:$0xff]  }
 0x1cd   : > { %v2071_v17 = vpop.permute.xlu0 %2070  ;;  %3040 = vrot.lane.b32.xlu1 %v3003_v6, %s5172_s15  ;;  %v3159_v14 = vsel %vm2014_vm6, %v3156_v40, %v3158_v61  ;;  %v1552_v48 = vsel %vm5333_vm4, %v5054_v30, 0  ;;  %v5056_v6 = vld [vmem:[#allocation2 + $0x78] sm:$0xf]  ;;  %v4349_v40 = vcombine.low %v2167_v35, %v2168_v9  ;;  %v5067_v30 = vld [vmem:[#allocation2 + $0x1c] sm:$0xf] }
 0x1ce   : > { %v6352_v57 = vsel %vm2128_vm13, %v2115_v10, %v2071_v17  ;;  %v1551_v37 = vsel %vm6040_vm12, %v5056_v6, 0  ;;  %v5069_v6 = vld [vmem:[#allocation2 + $0x10] sm:$0xf] }
 0x1cf   : > { %4739 = vmatprep.mubr.msk.bf16.mxu1 %vm2245_vm14, %v6352_v57  ;;  %3186 = vrot.lane.b32.xlu0 %v3155_v28, %s5171_s28  ;;  %v1928_v59 = vpop.permute.xlu1 %1927  ;;  %v6397_v10 = vcombine.low %v1551_v37, %v1552_v48  ;;  %v5057_v28 = vld [vmem:[%s5288_s29 + $0x8] sm:$0xff]   ;;  %v1528_v48 = vsel %vm5333_vm4, %v5067_v30, 0  ;;  %v1525_v37 = vsel %vm6040_vm12, %v5069_v6, 0 }
 0x1d0   : > { %4740 = vmatmul.mubr.msk.bf16.gmra.mrb[8].mxu1 %vm2245_vm14, %v6348_v50  ;;  %v2124_v20 = vsel %vm612_vm1, %v4313_v54, %v1928_v59  ;;  %v5059_v59 = vld [vmem:[#allocation2 + $0x8] sm:$0xf]  ;;  %v5063_v54 = vld [vmem:[#allocation2 + $0xc] sm:$0xf] }
 0x1d1   : > { %v1926_v2 = vpop.permute.xlu0 %1925  ;;  %3188 = vrot.lane.b32.xlu1 %v3157_v63, %s5171_s28  ;;  %v1523_v25 = vsel %vm6040_vm12, %v5059_v59, 0  ;;  %v5061_v63 = vld [vmem:[#allocation2] sm:$0xf]  ;;  %v1524_v61 = vsel %vm5333_vm4, %v5063_v54, 0  ;;  %v5076_v54 = vld [vmem:[%s5288_s29 + $0x58] sm:$0xff]  }
 0x1d2   : > { %v2121_v27 = vsel %vm612_vm1, %v4312_v51, %v1926_v2  ;;  %v1521_v2 = vsel %vm6040_vm12, %v5061_v63, 0  ;;  %v5064_v51 = vld [vmem:[%s5288_s29 + $0x30] sm:$0xff]   ;;  %v5074_v63 = vld [vmem:[%s5288_s29 + $0x60] sm:$0xff]  }
 0x1d3   : > { %3042 = vrot.lane.b32.xlu0 %v3011_v3, %s5172_s15  ;;  %v2077_v39 = vpop.permute.xlu1 %2076 }
 0x1d4   : > { %v6374_v62 = vsel %vm2128_vm13, %v2124_v20, %v2077_v39  ;;  %v4300_v39 = vcombine.low %v1523_v25, %v1524_v61  ;;  %v4299_v20 = vcombine.low %v1521_v2, %v1522_v1  ;;  %v1532_v1 = vsel %vm5333_vm4, %v5075_v44, 0  ;;  %v5077_v61 = vld [vmem:[#allocation2 + $0x20] sm:$0xf] }
 0x1d5   : > { %v2075_v52 = vpop.permute.xlu0 %2074  ;;  %3595 = vrot.lane.b32.xlu1 %v5051_v11, %s5172_s15 }
 0x1d6   : > { %v6379_v58 = vsel %vm2128_vm13, %v2121_v27, %v2075_v52  ;;  %v5065_v52 = vld [vmem:[%s5288_s29 + $0x28] sm:$0xff]  }
 0x1d7   : > { %4743 = vmatprep.mubr.msk.bf16.mxu1 %vm2245_vm14, %v6379_v58  ;;  %3190 = vrot.lane.b32.xlu0 %v3159_v14, %s5171_s28  ;;  %v2202_v32 = vpop.permute.xlu1 %2201  ;;  %s6789_s28 = scalar_lea.hbm %s6857_s9, %s4587_s25  ;;  %s5095_s25 = scalar_lea.vmem %s5094_s23, 4096 }
 0x1d8   : > { %4744 = vmatmul.mubr.msk.bf16.gmra.mrb[12].mxu1 %vm2245_vm14, %v6374_v62  ;;  %v2230_v42 = vsel %vm612_vm1, %v4349_v40, %v2202_v32  ;;  %v3313_v32 = vsel %vm2278_vm10, %v6317_v34, 0  ;;  %v5070_v40 = vld [vmem:[#allocation2 + $0x14] sm:$0xf] }
 0x1d9   : > { %v2200_v7 = vpop.permute.xlu0 %2199  ;;  %3599 = vrot.lane.b32.xlu1 %v5055_v55, %s5172_s15  ;;  %v5068_v55 = vld [vmem:[%s5288_s29 + $0x38] sm:$0xff]   ;;  %v1526_v34 = vsel %vm5333_vm4, %v5070_v40, 0 }
 0x1da   : > { %v2227_v12 = vsel %vm612_vm1, %v6397_v10, %v2200_v7 }
 0x1db   : > { %v2225_v17 = vpop.permute.xlu1 %2224  ;;  %3597 = vrot.lane.b32.xlu0 %v5057_v28, %s5172_s15  ;;  %v5071_v28 = vld [vmem:[#allocation2 + $0x18] sm:$0xf] }
 0x1dc   : > { %v2236_v24 = vsel %vm2128_vm13, %v2230_v42, %v2225_v17  ;;  %v1527_v42 = vsel %vm6040_vm12, %v5071_v28, 0  ;;  %v5084_v28 = vld [vmem:[#allocation2 + $0x30] sm:$0xf] }
 0x1dd   : > { %v2223_v43 = vpop.permute.xlu0 %2222  ;;  %3603 = vrot.lane.b32.xlu1 %v5058_v49, %s5172_s15 }
 0x1de   : > { %v2234_v53 = vsel %vm2128_vm13, %v2227_v12, %v2223_v43  ;;  %v5072_v12 = vld [vmem:[%s5288_s29 + $0x50] sm:$0xff]   ;;  %v4302_v43 = vcombine.low %v1527_v42, %v1528_v48  ;;  %v1533_v42 = vsel %vm6040_vm12, %v5084_v28, 0 }
 0x1df   : > { %4747 = vmatprep.mubr.msk.bf16.mxu1 %vm2245_vm14, %v2234_v53  ;;  %v1902_v22 = vpop.permute.xlu1 %1901  ;;  %3601 = vrot.lane.b32.xlu0 %v5060_v29, %s5172_s15  ;;  %v5073_v53 = vld [vmem:[%s5288_s29 + $0x48] sm:$0xff]  }
 0x1e0   : > { %4748 = vmatmul.mubr.msk.bf16.gmra.mrb[16].mxu1 %vm2245_vm14, %v2236_v24  ;;  %v6425_v11 = vsel %vm612_vm1, %v4300_v39, %v1902_v22  ;;  %v4301_v24 = vcombine.low %v1525_v37, %v1526_v34  ;;  %v5078_v39 = vld [vmem:[#allocation2 + $0x24] sm:$0xf]  ;;  %v5082_v37 = vld [vmem:[#allocation2 + $0x3c] sm:$0xf] }
 0x1e1   : > { %v1900_v3 = vpop.permute.xlu0 %1899  ;;  %3607 = vrot.lane.b32.xlu1 %v5064_v51, %s5172_s15  ;;  %v1529_v51 = vsel %vm6040_vm12, %v5077_v61, 0  ;;  %v1536_v40 = vsel %vm5333_vm4, %v5082_v37, 0 }
 0x1e2   : > { %v2082_v14 = vsel %vm612_vm1, %v4299_v20, %v1900_v3  ;;  %v1530_v20 = vsel %vm5333_vm4, %v5078_v39, 0 }
 0x1e3   : > { %v2051_v27 = vpop.permute.xlu1 %2050  ;;  %3605 = vrot.lane.b32.xlu0 %v5065_v52, %s5172_s15  ;;  %v5079_v52 = vld [vmem:[#allocation2 + $0x28] sm:$0xf] }
 0x1e4   : > { %v2132_v35 = vsel %vm2128_vm13, %v6425_v11, %v2051_v27 }
 0x1e5   : > { %v2049_v41 = vpop.permute.xlu0 %2048  ;;  %3611 = vrot.lane.b32.xlu1 %v5066_v18, %s5172_s15  ;;  %v4303_v18 = vcombine.low %v1529_v51, %v1530_v20  ;;  %v5088_v51 = vld [vmem:[#allocation2 + $0x44] sm:$0xf] }
 0x1e6   : > { %v2130_v9 = vsel %vm2128_vm13, %v2082_v14, %v2049_v41  ;;  %v1531_v14 = vsel %vm6040_vm12, %v5079_v52, 0  ;;  %v5080_v41 = vld [vmem:[%s5288_s29 + $0x70] sm:$0xff]   ;;  %v1538_v39 = vsel %vm5333_vm4, %v5088_v51, 0 }
 0x1e7   : > { %4753 = vmatprep.mubr.msk.bf16.mxu1 %vm2245_vm14, %v2130_v9  ;;  %v1906_v7 = vpop.permute.xlu1 %1905  ;;  %3609 = vrot.lane.b32.xlu0 %v5068_v55, %s5172_s15 }
 0x1e8   : > { %4754 = vmatmul.mubr.msk.bf16.vlgmr.msra.gmra.mrb[20].mxu1 %vm2245_vm14, %v2132_v35  ;;  %v2091_v22 = vsel %vm612_vm1, %v4302_v43, %v1906_v7  ;;  %v4304_v35 = vcombine.low %v1531_v14, %v1532_v1 }
 0x1e9   : > { %v1904_v17 = vpop.permute.xlu0 %1903  ;;  %4786 = vmatpush3.bf16.msra.mxu1 %v3313_v32  ;;  %3615 = vrot.lane.b32.xlu1 %v5072_v12, %s5172_s15  ;;  %v5081_v32 = vld [vmem:[%s5288_s29 + $0x68] sm:$0xff]   ;;  %v5085_v12 = vld [vmem:[#allocation2 + $0x34] sm:$0xf] }
 0x1ea   : > { %v2088_v59 = vsel %vm612_vm1, %v4301_v24, %v1904_v17  ;;  %v5083_v17 = vld [vmem:[%s5288_s29 + $0x78] sm:$0xff]   ;;  %v1534_v43 = vsel %vm5333_vm4, %v5085_v12, 0  ;;  %vm3715_vm4 = vcmask 1043456   ;;  %s4090_s29 = sshll.u32 %s6696_s24, 4  ;;  %s6793_s29 = int_to_ptr.vmem [resolvable:$true] %s4090_s29 }
 0x1eb   : > { %v2055_v49 = vpop.permute.xlu1 %2054  ;;  %3613 = vrot.lane.b32.xlu0 %v5073_v53, %s5172_s15  ;;  %s5089_s18 = scalar_lea.vmem %s6793_s29, 2048  ;;  %p5096_p1 = scmp.lt.s32.totalorder %s6793_s29, %s5094_s23 }
 0x1ec   : > { %v6454_v29 = vsel %vm2128_vm13, %v2091_v22, %v2055_v49  ;;  %v5086_v49 = vld [vmem:[#allocation2 + $0x38] sm:$0xf]  ;;  %p5090_p12 = scmp.ne.s32.totalorder %s6793_s29, %s5089_s18  ;;  %p5097_p2 = scmp.lt.s32.totalorder %s5095_s25, %s5089_s18 }
 0x1ed   : > { %v2053_v25 = vpop.permute.xlu0 %2052  ;;  %3619 = vrot.lane.b32.xlu1 %v5074_v63, %s5172_s15  ;;  %v1535_v53 = vsel %vm6040_vm12, %v5086_v49, 0 }
 0x1ee   : > { %v6459_v2 = vsel %vm2128_vm13, %v2088_v59, %v2053_v25  ;;  %v4306_v22 = vcombine.low %v1535_v53, %v1536_v40  ;;  %v4305_v59 = vcombine.low %v1533_v42, %v1534_v43  ;;  %p5091_p13 = pnand %p5090_p12, %p5265_p4  ;;  %p5098_p3 = por %p5097_p2, %p5096_p1 }
 0x1ef   : > { %4757 = vmatprep.mubr.msk.bf16.mxu1 %vm2245_vm14, %v6459_v2  ;;  %v1910_v3 = vpop.permute.xlu1 %1909  ;;  %3617 = vrot.lane.b32.xlu0 %v5076_v54, %s5172_s15  ;;  %v5087_v54 = vld [vmem:[#allocation2 + $0x40] sm:$0xf] }
 0x1f0   : > { %4758 = vmatmul.mubr.msk.bf16.gmra.mrb[24].mxu1 %vm2245_vm14, %v6454_v29  ;;  %v2097_v30 = vsel %vm612_vm1, %v4304_v35, %v1910_v3  ;;  %v1537_v61 = vsel %vm6040_vm12, %v5087_v54, 0  ;;  %p5092_p0 = pneg %p5091_p13 }
 0x1f1   : > { %v1908_v27 = vpop.permute.xlu0 %1907  ;;  %3623 = vrot.lane.b32.xlu1 %v5080_v41, %s5172_s15  ;;  %v4307_v52 = vcombine.low %v1537_v61, %v1538_v39 }
 0x1f2   : > { %v2094_v48 = vsel %vm612_vm1, %v4303_v18, %v1908_v27  ;;  %p5099_p5 = pnand %p5098_p3, %p5092_p0 }
 0x1f3   : > { %v2059_v9 = vpop.permute.xlu1 %2058  ;;  %3621 = vrot.lane.b32.xlu0 %v5081_v32, %s5172_s15 }
 0x1f4   : > { %v2140_v55 = vsel %vm2128_vm13, %v2097_v30, %v2059_v9 }
 0x1f5   : > { %v2057_v7 = vpop.permute.xlu0 %2056 }
 0x1f6   : > { %v2138_v6 = vsel %vm2128_vm13, %v2094_v48, %v2057_v7 }
 0x1f7   : > { %4761 = vmatprep.mubr.msk.bf16.mxu1 %vm2245_vm14, %v2138_v6  ;;  %v1914_v34 = vpop.permute.xlu1 %1913  ;;  %3625 = vrot.lane.b32.xlu0 %v5083_v17, %s5172_s15 }
 0x1f8   : > { %4762 = vmatmul.mubr.msk.bf16.gmra.mrb[28].mxu1 %vm2245_vm14, %v2140_v55  ;;  %v2103_v63 = vsel %vm612_vm1, %v4306_v22, %v1914_v34 }
 0x1f9   : > { %v1912_v24 = vpop.permute.xlu0 %1911 }
 0x1fa   : > { %v2100_v44 = vsel %vm612_vm1, %v4305_v59, %v1912_v24 }
 0x1fb   : > { %v2063_v25 = vpop.permute.xlu1 %2062 }
 0x1fc   : > { %v2144_v3 = vsel %vm2128_vm13, %v2103_v63, %v2063_v25 }
 0x1fd   : > { %v2061_v1 = vpop.permute.xlu0 %2060 }
 0x1fe   : > { %v2142_v20 = vsel %vm2128_vm13, %v2100_v44, %v2061_v1 }
 0x1ff   : > { %4765 = vmatprep.mubr.msk.bf16.mxu1 %vm2245_vm14, %v2142_v20  ;;  %v2065_v27 = vpop.permute.xlu1 %2064 }
 0x200   : > { %4766 = vmatmul.mubr.msk.bf16.gmra.mrb[32].mxu1 %vm2245_vm14, %v2144_v3 }
 0x201   : > { %v1916_v14 = vpop.permute.xlu0 %1915 }
 0x202   : > { %v2106_v41 = vsel %vm612_vm1, %v4307_v52, %v1916_v14 }
 0x203   : > { %v2146_v35 = vsel %vm2128_vm13, %v2106_v41, %v2065_v27  ;;  %v2079_v18 = vpop.permute.xlu1 %2078 }
 0x204   : > { %4769 = vmatprep.mubr.msk.bf16.mxu1 %vm2245_vm14, %v2146_v35 }
 0x205   : > { %v1930_v47 = vpop.permute.xlu0 %1929 }
 0x207   : > { %v2221_v9 = vpop.permute.xlu1 %2220 }
 0x208   : > { %4770 = vmatmul.mubr.msk.bf16.gmra.mrb[4].mxu1 %vm2245_vm14, %v6283_v46  ;;  %v2232_v23 = vsel %vm2128_vm13, %v6425_v11, %v2221_v9 }
 0x209   : > { %v3013_v32 = vpop.permute.xlu0 %3012  ;;  %4773 = vmatprep.mubr.msk.bf16.mxu1 %vm2245_vm14, %v6320_v31  ;;  %4719 = vmatprep.mubr.msk.bf16.mxu0 %vm2245_vm14, %v2232_v23 }
 0x20a   : > { %4720 = vmatmul.mubr.msk.bf16.vlgmr.msra.gmra.mrb[32].mxu0 %vm2245_vm14, %v6459_v2  ;;  %v3194_v37 = vsel %vm612_vm1, %v6131_v19, %v3013_v32 }
 0x20b   : > { %v3161_v30 = vpop.permute.xlu1 %3160  ;;  %4723 = vmatprep.mubr.msk.bf16.mxu0 %vm2245_vm14, %v6454_v29 }
 0x20d   : > { %v3015_v48 = vpop.permute.xlu0 %3014 }
 0x20e   : > { %v3197_v17 = vsel %vm612_vm1, %v6139_v45, %v3015_v48 }
 0x20f   : > { %v3017_v7 = vpop.permute.xlu1 %3016 }
 0x210   : > { %4774 = vmatmul.mubr.msk.bf16.gmra.mrb[8].mxu1 %vm2245_vm14, %v6352_v57  ;;  %v3200_v19 = vsel %vm612_vm1, %v6151_v5, %v3017_v7 }
 0x211   : > { %v3163_v46 = vpop.permute.xlu0 %3162  ;;  %4777 = vmatprep.mubr.msk.bf16.mxu1 %vm2245_vm14, %v6348_v50 }
 0x212   : > { %4724 = vmatmul.mubr.msk.bf16.gmra.mrb[36].mxu0 %vm2245_vm14, %v2138_v6  ;;  %v2127_v6 = vsel %vm612_vm1, %v6397_v10, %v1930_v47  ;;  %v3243_v28 = vsel %vm2128_vm13, %v3197_v17, %v3163_v46 }
 0x213   : > { %v3165_v31 = vpop.permute.xlu1 %3164  ;;  %4727 = vmatprep.mubr.msk.bf16.mxu0 %vm2245_vm14, %v2140_v55  ;;  %v2160_v55 = vsel %vm2128_vm13, %v2127_v6, %v2079_v18 }
 0x214   : > { %v3245_v42 = vsel %vm2128_vm13, %v3200_v19, %v3165_v31  ;;  %v6614_v19 = vld [vmem:[%s6854_s6] ss:$0 sm:$0xff] }
 0x215   : > { %v3019_v11 = vpop.permute.xlu0 %3018 }
 0x216   : > { %v3203_v24 = vsel %vm612_vm1, %v6162_v15, %v3019_v11 }
 0x217   : > { %v3021_v2 = vpop.permute.xlu1 %3020 }
 0x218   : > { %4778 = vmatmul.mubr.msk.bf16.gmra.mrb[12].mxu1 %vm2245_vm14, %v6379_v58  ;;  %v3241_v58 = vsel %vm2128_vm13, %v3194_v37, %v3161_v30  ;;  %v3206_v45 = vsel %vm612_vm1, %v6164_v26, %v3021_v2 }
 0x219   : > { %v3167_v29 = vpop.permute.xlu0 %3166  ;;  %4781 = vmatprep.mubr.msk.bf16.mxu1 %vm2245_vm14, %v6374_v62 }
 0x21a   : > { %4728 = vmatmul.mubr.msk.bf16.gmra.mrb[40].mxu0 %vm2245_vm14, %v2142_v20  ;;  %v3247_v49 = vsel %vm2128_vm13, %v3203_v24, %v3167_v29 }
 0x21b   : > { %v3169_v57 = vpop.permute.xlu1 %3168  ;;  %4731 = vmatprep.mubr.msk.bf16.mxu0 %vm2245_vm14, %v2144_v3 }
 0x21c   : > { %v3249_v53 = vsel %vm2128_vm13, %v3206_v45, %v3169_v57 }
 0x21d   : > { %v3023_v50 = vpop.permute.xlu0 %3022 }
 0x21e   : > { %v3209_v59 = vsel %vm612_vm1, %v6173_v33, %v3023_v50 }
 0x21f   : > { %v3025_v40 = vpop.permute.xlu1 %3024 }
 0x220   : > { %4782 = vmatmul.mubr.msk.bf16.gmra.mrb[16].mxu1 %vm2245_vm14, %v2160_v55  ;;  %v3212_v15 = vsel %vm612_vm1, %v6184_v16, %v3025_v40 }
 0x221   : > { %v3171_v62 = vpop.permute.xlu0 %3170  ;;  %4787 = vmatprep.mubr.msk.bf16.mxu1 %vm2245_vm14, %v3241_v58 }
 0x222   : > { %4732 = vmatmul.mubr.msk.bf16.gmra.mrb[44].mxu0 %vm2245_vm14, %v2146_v35  ;;  %v3251_v25 = vsel %vm2128_vm13, %v3209_v59, %v3171_v62 }
 0x223   : > { %v3173_v34 = vpop.permute.xlu1 %3172 }
 0x224   : > { %v3253_v44 = vsel %vm2128_vm13, %v3212_v15, %v3173_v34 }
 0x225   : > { %v3027_v10 = vpop.permute.xlu0 %3026 }
 0x226   : > { %v3215_v3 = vsel %vm612_vm1, %v6196_v8, %v3027_v10 }
 0x227   : > { %v3029_v12 = vpop.permute.xlu1 %3028 }
 0x228   : > { %4788 = vmatmul.mubr.msk.bf16.vlgmr.msra.gmra.mrb[20].mxu1 %vm2245_vm14, %v3243_v28  ;;  %v3218_v61 = vsel %vm612_vm1, %v6198_v0, %v3029_v12 }
 0x229   : > { %4791 = vmatprep.mubr.msk.bf16.mxu1 %vm2245_vm14, %v3245_v42  ;;  %v3175_v43 = vpop.permute.xlu0 %3174 }
 0x22a   : > { %v3255_v33 = vsel %vm2128_vm13, %v3215_v3, %v3175_v43 }
 0x22b   : > { %v3177_v5 = vpop.permute.xlu1 %3176 }
 0x22c   : > { %v3257_v16 = vsel %vm2128_vm13, %v3218_v61, %v3177_v5 }
 0x22d   : > { %v3031_v22 = vpop.permute.xlu0 %3030 }
 0x22e   : > { %v3221_v20 = vsel %vm612_vm1, %v6208_v60, %v3031_v22 }
 0x22f   : > { %v3033_v63 = vpop.permute.xlu1 %3032 }
 0x230   : > { %4792 = vmatmul.mubr.msk.bf16.gmra.mrb[24].mxu1 %vm2245_vm14, %v3247_v49  ;;  %v3224_v8 = vsel %vm612_vm1, %v6220_v4, %v3033_v63 }
 0x231   : > { %4795 = vmatprep.mubr.msk.bf16.mxu1 %vm2245_vm14, %v3249_v53  ;;  %v3179_v26 = vpop.permute.xlu0 %3178 }
 0x232   : > { %v3259_v27 = vsel %vm2128_vm13, %v3221_v20, %v3179_v26 }
 0x233   : > { %v3181_v1 = vpop.permute.xlu1 %3180 }
 0x234   : > { %v3261_v52 = vsel %vm2128_vm13, %v3224_v8, %v3181_v1 }
 0x235   : > { %v3035_v54 = vpop.permute.xlu0 %3034 }
 0x236   : > { %v3227_v41 = vsel %vm612_vm1, %v6231_v56, %v3035_v54 }
 0x237   : > { %v3037_v51 = vpop.permute.xlu1 %3036 }
 0x238   : > { %4796 = vmatmul.mubr.msk.bf16.gmra.mrb[28].mxu1 %vm2245_vm14, %v3251_v25  ;;  %v3230_v60 = vsel %vm612_vm1, %v6233_v36, %v3037_v51 }
 0x239   : > { %4799 = vmatprep.mubr.msk.bf16.mxu1 %vm2245_vm14, %v3253_v44  ;;  %v3183_v39 = vpop.permute.xlu0 %3182 }
 0x23a   : > { %v3263_v35 = vsel %vm2128_vm13, %v3227_v41, %v3183_v39 }
 0x23b   : > { %v3185_v0 = vpop.permute.xlu1 %3184 }
 0x23c   : > { %v3265_v47 = vsel %vm2128_vm13, %v3230_v60, %v3185_v0 }
 0x23d   : > { %v3039_v14 = vpop.permute.xlu0 %3038 }
 0x23e   : > { %v3233_v23 = vsel %vm612_vm1, %v6242_v13, %v3039_v14  ;;  %v3675_v13 = vld [vmem:[%s6855_s7] sm:$0xf] }
 0x23f   : > { %v3041_v18 = vpop.permute.xlu1 %3040  ;;  %4925 = vmatprep.subr.msk.bf16.mxu0 %vm3715_vm4, %v3675_v13 }
 0x240   : > { %4800 = vmatmul.mubr.msk.bf16.gmra.mrb[32].mxu1 %vm2245_vm14, %v3255_v33  ;;  %v3236_v30 = vsel %vm612_vm1, %v6258_v21, %v3041_v18  ;;  %v3717_v21 = vsel %vm3715_vm4, %v3675_v13, 0 }
 0x241   : > { %4803 = vmatprep.mubr.msk.bf16.mxu1 %vm2245_vm14, %v3257_v16  ;;  %v3187_v4 = vpop.permute.xlu0 %3186  ;;  %4820 = vmatpush3.bf16.msra.mxu0 %v3717_v21 }
 0x242   : > { %v3267_v56 = vsel %vm2128_vm13, %v3233_v23, %v3187_v4 }
 0x243   : > { %v3189_v9 = vpop.permute.xlu1 %3188 }
 0x244   : > { %v3269_v36 = vsel %vm2128_vm13, %v3236_v30, %v3189_v9 }
 0x245   : > { %v3043_v32 = vpop.permute.xlu0 %3042 }
 0x246   : > { %v3239_v7 = vsel %vm612_vm1, %v6271_v38, %v3043_v32 }
 0x247   : > { %v3596_v61 = vpop.permute.xlu1 %3595 }
 0x248   : > { %4804 = vmatmul.mubr.msk.bf16.gmra.mrb[4].mxu1 %vm2245_vm14, %v3259_v27 }
 0x249   : > { %4807 = vmatprep.mubr.msk.bf16.mxu1 %vm2245_vm14, %v3261_v52  ;;  %v3191_v48 = vpop.permute.xlu0 %3190 }
 0x24a   : > { %v3271_v46 = vsel %vm2128_vm13, %v3239_v7, %v3191_v48 }
 0x24b   : > { %v3600_v48 = vpop.permute.xlu1 %3599 }
 0x24d   : > { %v3598_v39 = vpop.permute.xlu0 %3597 }
 0x250   : > { %4808 = vmatmul.mubr.msk.bf16.gmra.mrb[8].mxu1 %vm2245_vm14, %v3263_v35 }
 0x251   : > { %4811 = vmatprep.mubr.msk.bf16.mxu1 %vm2245_vm14, %v3265_v47  ;;  %v3602_v13 = vpop.permute.xlu0 %3601 }
 0x258   : > { %4812 = vmatmul.mubr.msk.bf16.gmra.mrb[12].mxu1 %vm2245_vm14, %v3267_v56 }
 0x259   : > { %4815 = vmatprep.mubr.msk.bf16.mxu1 %vm2245_vm14, %v3269_v36 }
 0x260   : > { %4816 = vmatmul.mubr.msk.bf16.gmra.mrb[16].mxu1 %vm2245_vm14, %v3271_v46 }
 0x2dd   : > { %v4721_v31 = vpop.f32.mrb[32].mxu0 }
 0x2de   : > { %v2316_v11 = vpop.f32.mrb[33].mxu0 }
 0x2df   : > { %v4722_v2 = vpop.f32.mrb[34].mxu0 }
 0x2e0   : > { %v2319_v29 = vpop.f32.mrb[35].mxu0 }
 0x2e5   : > { %v4725_v57 = vpop.f32.mrb[36].mxu0 }
 0x2e6   : > { %v2332_v50 = vpop.f32.mrb[37].mxu0 }
 0x2e7   : > { %v4726_v6 = vpop.f32.mrb[38].mxu0 }
 0x2e8   : > { %v2335_v38 = vpop.f32.mrb[39].mxu0 }
 0x2ed   : > { %v4729_v55 = vpop.f32.mrb[40].mxu0 }
 0x2ee   : > { %v2348_v37 = vpop.f32.mrb[41].mxu0 }
 0x2ef   : > { %v4730_v40 = vpop.f32.mrb[42].mxu0 }
 0x2f0   : > { %v2351_v58 = vpop.f32.mrb[43].mxu0 }
 0x2f5   : > { %v6603_v62 = vpop.f32.mrb[44].mxu0 }
 0x2f6   : > { %v6605_v34 = vpop.f32.mrb[45].mxu0 }
 0x2f7   : > { %v6607_v17 = vpop.f32.mrb[46].mxu0 }
 0x2f8   : > { %v6609_v10 = vpop.f32.mrb[47].mxu0 }
 0x2fb   : > { %v4789_v28 = vpop.f32.mrb[20].mxu1 }
 0x2fc   : > { %v4855_v42 = vadd.f32 %v4789_v28, %v4721_v31  ;;  %v3349_v12 = vpop.f32.mrb[21].mxu1 }
 0x2fd   : > { %v4856_v43 = vadd.f32 %v3349_v12, %v2316_v11  ;;  %v4790_v24 = vpop.f32.mrb[22].mxu1 }
 0x2fe   : > { %v3517_v49 = vadd.f32 %v4855_v42, %v6614_v19  ;;  %v4857_v45 = vadd.f32 %v4790_v24, %v4722_v2  ;;  %v3352_v53 = vpop.f32.mrb[23].mxu1 }
 0x2ff   : > { %v3515_v5 = vadd.f32 %v4856_v43, %v6614_v19  ;;  %v4858_v22 = vadd.f32 %v3352_v53, %v2319_v29 }
 0x300   : > { %v3518_v59 = vadd.f32 %v4857_v45, %v6614_v19  ;;  %v3549_v15 = vmax.f32 %v3517_v49, 0.0 }
 0x301   : > { %v3516_v25 = vadd.f32 %v4858_v22, %v6614_v19  ;;  %v3547_v44 = vmax.f32 %v3515_v5, 0.0  ;;  %v3606_v5 = vpop.permute.xlu0 %3605 }
 0x302   : > { %v3550_v63 = vmax.f32 %v3518_v59, 0.0 }
 0x303   : > { %v3548_v26 = vmax.f32 %v3516_v25, 0.0  ;;  %v4793_v1 = vpop.f32.mrb[24].mxu1 }
 0x304   : > { %v3580_v3 = vpack.c.bf16 %v3550_v63, %v3549_v15  ;;  %v4859_v54 = vadd.f32 %v4793_v1, %v4725_v57  ;;  %v3365_v33 = vpop.f32.mrb[25].mxu1 }
 0x305   : > { %v3579_v16 = vpack.c.bf16 %v3548_v26, %v3547_v44  ;;  %v4860_v51 = vadd.f32 %v3365_v33, %v2332_v50  ;;  %v4794_v20 = vpop.f32.mrb[26].mxu1 }
 0x306   : > { %v3521_v27 = vadd.f32 %v4859_v54, %v6614_v19  ;;  %v4861_v8 = vadd.f32 %v4794_v20, %v4726_v6  ;;  %v3368_v52 = vpop.f32.mrb[27].mxu1  ;;  %v3632_v35 = vsel %vm612_vm1, %v3580_v3, %v3598_v39 }
 0x307   : > { %v3519_v0 = vadd.f32 %v4860_v51, %v6614_v19  ;;  %v3629_v14 = vsel %vm612_vm1, %v3579_v16, %v3596_v61  ;;  %v4862_v41 = vadd.f32 %v3368_v52, %v2335_v38 }
 0x308   : > { %v3522_v60 = vadd.f32 %v4861_v8, %v6614_v19  ;;  %4821 = vmatprep.mubr.msk.bf16.mxu0 %vm2128_vm13, %v3629_v14  ;;  %v3553_v47 = vmax.f32 %v3521_v27, 0.0  ;;  %v3610_v8 = vpop.permute.xlu0 %3609 }
 0x309   : > { %v3520_v18 = vadd.f32 %v4862_v41, %v6614_v19  ;;  %4822 = vmatmul.mubr.msk.bf16.vlgmr.msra.gmra.mrb[48].mxu0 %vm2128_vm13, %v3632_v35  ;;  %v3551_v9 = vmax.f32 %v3519_v0, 0.0 }
 0x30a   : > { %v3554_v4 = vmax.f32 %v3522_v60, 0.0 }
 0x30b   : > { %v3552_v23 = vmax.f32 %v3520_v18, 0.0  ;;  %v4797_v32 = vpop.f32.mrb[28].mxu1 }
 0x30c   : > { %v3582_v56 = vpack.c.bf16 %v3554_v4, %v3553_v47  ;;  %v4863_v30 = vadd.f32 %v4797_v32, %v4729_v55  ;;  %v3381_v36 = vpop.f32.mrb[29].mxu1 }
 0x30d   : > { %v3581_v7 = vpack.c.bf16 %v3552_v23, %v3551_v9  ;;  %v4864_v46 = vadd.f32 %v3381_v36, %v2348_v37  ;;  %v4798_v21 = vpop.f32.mrb[30].mxu1 }
 0x30e   : > { %v3525_v31 = vadd.f32 %v4863_v30, %v6614_v19  ;;  %v4865_v11 = vadd.f32 %v4798_v21, %v4730_v40  ;;  %v3384_v2 = vpop.f32.mrb[31].mxu1  ;;  %v3638_v6 = vsel %vm612_vm1, %v3582_v56, %v3602_v13 }
 0x30f   : > { %v3523_v29 = vadd.f32 %v4864_v46, %v6614_v19  ;;  %v3635_v57 = vsel %vm612_vm1, %v3581_v7, %v3600_v48  ;;  %v4866_v50 = vadd.f32 %v3384_v2, %v2351_v58  ;;  %v3604_v58 = vpop.permute.xlu1 %3603  ;;  %v3614_v7 = vpop.permute.xlu0 %3613 }
 0x310   : > { %v3526_v38 = vadd.f32 %v4865_v11, %v6614_v19  ;;  %4825 = vmatprep.mubr.msk.bf16.mxu0 %vm2128_vm13, %v3635_v57  ;;  %v3557_v37 = vmax.f32 %v3525_v31, 0.0 }
 0x311   : > { %v3524_v55 = vadd.f32 %v4866_v50, %v6614_v19  ;;  %4826 = vmatmul.mubr.msk.bf16.gmra.mrb[52].mxu0 %vm2128_vm13, %v3638_v6  ;;  %v3555_v42 = vmax.f32 %v3523_v29, 0.0 }
 0x312   : > { %v3558_v28 = vmax.f32 %v3526_v38, 0.0 }
 0x313   : > { %v3556_v40 = vmax.f32 %v3524_v55, 0.0  ;;  %v4801_v12 = vpop.f32.mrb[32].mxu1 }
 0x314   : > { %v3584_v43 = vpack.c.bf16 %v3558_v28, %v3557_v37  ;;  %v4867_v24 = vadd.f32 %v4801_v12, %v6603_v62  ;;  %v3397_v49 = vpop.f32.mrb[33].mxu1 }
 0x315   : > { %v3583_v45 = vpack.c.bf16 %v3556_v40, %v3555_v42  ;;  %v4868_v53 = vadd.f32 %v3397_v49, %v6605_v34  ;;  %v4802_v22 = vpop.f32.mrb[34].mxu1 }
 0x316   : > { %v3529_v59 = vadd.f32 %v4867_v24, %v6614_v19  ;;  %v4869_v25 = vadd.f32 %v4802_v22, %v6607_v17  ;;  %v3400_v15 = vpop.f32.mrb[35].mxu1  ;;  %v3644_v62 = vsel %vm612_vm1, %v3584_v43, %v3606_v5  ;;  %v3618_v43 = vpop.permute.xlu0 %3617 }
 0x317   : > { %v3527_v63 = vadd.f32 %v4868_v53, %v6614_v19  ;;  %v3641_v44 = vsel %vm612_vm1, %v3583_v45, %v3604_v58  ;;  %v4870_v26 = vadd.f32 %v3400_v15, %v6609_v10  ;;  %v3608_v10 = vpop.permute.xlu1 %3607 }
 0x318   : > { %v3530_v1 = vadd.f32 %v4869_v25, %v6614_v19  ;;  %4829 = vmatprep.mubr.msk.bf16.mxu0 %vm2128_vm13, %v3641_v44  ;;  %v3561_v3 = vmax.f32 %v3529_v59, 0.0 }
 0x319   : > { %v3528_v34 = vadd.f32 %v4870_v26, %v6614_v19  ;;  %4830 = vmatmul.mubr.msk.bf16.gmra.mrb[56].mxu0 %vm2128_vm13, %v3644_v62  ;;  %v3559_v17 = vmax.f32 %v3527_v63, 0.0 }
 0x31a   : > { %v3562_v54 = vmax.f32 %v3530_v1, 0.0 }
 0x31b   : > { %v3560_v33 = vmax.f32 %v3528_v34, 0.0  ;;  %v4805_v61 = vpop.f32.mrb[4].mxu1  ;;  %v3612_v32 = vpop.permute.xlu1 %3611 }
 0x31c   : > { %v3586_v16 = vpack.c.bf16 %v3562_v54, %v3561_v3  ;;  %v3533_v51 = vadd.f32 %v4805_v61, %v6614_v19  ;;  %v3413_v39 = vpop.f32.mrb[5].mxu1  ;;  %v3622_v54 = vpop.permute.xlu0 %3621 }
 0x31d   : > { %v3585_v20 = vpack.c.bf16 %v3560_v33, %v3559_v17  ;;  %v3531_v27 = vadd.f32 %v6614_v19, %v3413_v39  ;;  %v4806_v52 = vpop.f32.mrb[6].mxu1 }
 0x31e   : > { %v3534_v0 = vadd.f32 %v4806_v52, %v6614_v19  ;;  %v3416_v14 = vpop.f32.mrb[7].mxu1  ;;  %v3565_v60 = vmax.f32 %v3533_v51, 0.0  ;;  %v3650_v18 = vsel %vm612_vm1, %v3586_v16, %v3610_v8 }
 0x31f   : > { %v3647_v41 = vsel %vm612_vm1, %v3585_v20, %v3608_v10  ;;  %v3532_v35 = vadd.f32 %v6614_v19, %v3416_v14  ;;  %v3563_v4 = vmax.f32 %v3531_v27, 0.0  ;;  %v3616_v37 = vpop.permute.xlu1 %3615 }
 0x320   : > { %v3566_v47 = vmax.f32 %v3534_v0, 0.0  ;;  %4833 = vmatprep.mubr.msk.bf16.mxu0 %vm2128_vm13, %v3647_v41 }
 0x321   : > { %v3564_v9 = vmax.f32 %v3532_v35, 0.0  ;;  %4834 = vmatmul.mubr.msk.bf16.gmra.mrb[60].mxu0 %vm2128_vm13, %v3650_v18  ;;  %v3626_v35 = vpop.permute.xlu0 %3625 }
 0x322   : > { %v3588_v23 = vpack.c.bf16 %v3566_v47, %v3565_v60 }
 0x323   : > { %v3587_v56 = vpack.c.bf16 %v3564_v9, %v3563_v4  ;;  %v4809_v30 = vpop.f32.mrb[8].mxu1  ;;  %v3620_v26 = vpop.permute.xlu1 %3619 }
 0x324   : > { %v3537_v36 = vadd.f32 %v4809_v30, %v6614_v19  ;;  %v3429_v48 = vpop.f32.mrb[9].mxu1  ;;  %v3656_v29 = vsel %vm612_vm1, %v3588_v23, %v3614_v7 }
 0x325   : > { %v3653_v46 = vsel %vm612_vm1, %v3587_v56, %v3612_v32  ;;  %v3535_v13 = vadd.f32 %v6614_v19, %v3429_v48  ;;  %v4810_v21 = vpop.f32.mrb[10].mxu1 }
 0x326   : > { %v3538_v31 = vadd.f32 %v4810_v21, %v6614_v19  ;;  %v3432_v11 = vpop.f32.mrb[11].mxu1  ;;  %4837 = vmatprep.mubr.msk.bf16.mxu0 %vm2128_vm13, %v3653_v46  ;;  %v3569_v57 = vmax.f32 %v3537_v36, 0.0 }
 0x327   : > { %v3536_v2 = vadd.f32 %v6614_v19, %v3432_v11  ;;  %v3567_v6 = vmax.f32 %v3535_v13, 0.0  ;;  %v3624_v14 = vpop.permute.xlu1 %3623 }
 0x328   : > { %v3570_v50 = vmax.f32 %v3538_v31, 0.0 }
 0x329   : > { %v3568_v38 = vmax.f32 %v3536_v2, 0.0  ;;  %4838 = vmatmul.mubr.msk.bf16.gmra.mrb[64].mxu0 %vm2128_vm13, %v3656_v29 }
 0x32a   : > { %v3590_v55 = vpack.c.bf16 %v3570_v50, %v3569_v57 }
 0x32b   : > { %v3589_v28 = vpack.c.bf16 %v3568_v38, %v3567_v6  ;;  %v4813_v42 = vpop.f32.mrb[12].mxu1 }
 0x32c   : > { %v3541_v40 = vadd.f32 %v4813_v42, %v6614_v19  ;;  %v3445_v12 = vpop.f32.mrb[13].mxu1  ;;  %v3662_v22 = vsel %vm612_vm1, %v3590_v55, %v3618_v43 }
 0x32d   : > { %v3659_v24 = vsel %vm612_vm1, %v3589_v28, %v3616_v37  ;;  %v3539_v49 = vadd.f32 %v6614_v19, %v3445_v12  ;;  %v4814_v58 = vpop.f32.mrb[14].mxu1 }
 0x32e   : > { %v3542_v45 = vadd.f32 %v4814_v58, %v6614_v19  ;;  %v3448_v53 = vpop.f32.mrb[15].mxu1  ;;  %4841 = vmatprep.mubr.msk.bf16.mxu0 %vm2128_vm13, %v3659_v24  ;;  %v3573_v59 = vmax.f32 %v3541_v40, 0.0 }
 0x32f   : > { %v3540_v5 = vadd.f32 %v6614_v19, %v3448_v53  ;;  %v3571_v15 = vmax.f32 %v3539_v49, 0.0 }
 0x330   : > { %v3574_v25 = vmax.f32 %v3542_v45, 0.0 }
 0x331   : > { %v3572_v63 = vmax.f32 %v3540_v5, 0.0  ;;  %4842 = vmatmul.mubr.msk.bf16.gmra.mrb[68].mxu0 %vm2128_vm13, %v3662_v22 }
 0x332   : > { %v3592_v44 = vpack.c.bf16 %v3574_v25, %v3573_v59 }
 0x333   : > { %v3591_v62 = vpack.c.bf16 %v3572_v63, %v3571_v15  ;;  %v4817_v1 = vpop.f32.mrb[16].mxu1 }
 0x334   : > { %v3545_v34 = vadd.f32 %v4817_v1, %v6614_v19  ;;  %v3461_v3 = vpop.f32.mrb[17].mxu1  ;;  %v3668_v10 = vsel %vm612_vm1, %v3592_v44, %v3622_v54 }
 0x335   : > { %v3665_v17 = vsel %vm612_vm1, %v3591_v62, %v3620_v26  ;;  %v3543_v33 = vadd.f32 %v6614_v19, %v3461_v3  ;;  %v4818_v61 = vpop.f32.mrb[18].mxu1 }
 0x336   : > { %v3546_v16 = vadd.f32 %v4818_v61, %v6614_v19  ;;  %v3464_v51 = vpop.f32.mrb[19].mxu1  ;;  %4845 = vmatprep.mubr.msk.bf16.mxu0 %vm2128_vm13, %v3665_v17  ;;  %v3577_v20 = vmax.f32 %v3545_v34, 0.0 }
 0x337   : > { %v3544_v39 = vadd.f32 %v6614_v19, %v3464_v51  ;;  %v3575_v8 = vmax.f32 %v3543_v33, 0.0  ;;  %v6688_v19 = vld [vmem:[%s6856_s8] ss:$0 sm:$0xff] }
 0x338   : > { %v3578_v27 = vmax.f32 %v3546_v16, 0.0 }
 0x339   : > { %v3576_v52 = vmax.f32 %v3544_v39, 0.0  ;;  %4846 = vmatmul.mubr.msk.bf16.gmra.mrb[72].mxu0 %vm2128_vm13, %v3668_v10 }
 0x33a   : > { %v3594_v0 = vpack.c.bf16 %v3578_v27, %v3577_v20 }
 0x33b   : > { %v3593_v41 = vpack.c.bf16 %v3576_v52, %v3575_v8 }
 0x33c   : > { %v3674_v18 = vsel %vm612_vm1, %v3594_v0, %v3626_v35 }
 0x33d   : > { %v3671_v60 = vsel %vm612_vm1, %v3593_v41, %v3624_v14  ;;  %vm4040_vm1 = vcmask 125952  }
 0x33e   : > { %4849 = vmatprep.mubr.msk.bf16.mxu0 %vm2128_vm13, %v3671_v60 }
 0x341   : > { %4850 = vmatmul.mubr.msk.bf16.gmra.mrb[76].mxu0 %vm2128_vm13, %v3674_v18 }
 0x3dc   : > { %v4823_v47 = vpop.f32.mrb[48].mxu0 }
 0x3dd   : > { %v3762_v4 = vadd.f32 %v4823_v47, %v6688_v19  ;;  %v3753_v9 = vpop.f32.mrb[49].mxu0 }
 0x3de   : > { %v3754_v23 = vadd.f32 %v6688_v19, %v3753_v9  ;;  %v4824_v32 = vpop.f32.mrb[50].mxu0 }
 0x3df   : > { %v3882_v56 = vmax.f32 %v3762_v4, 0.0  ;;  %v3765_v30 = vadd.f32 %v4824_v32, %v6688_v19  ;;  %v3756_v36 = vpop.f32.mrb[51].mxu0 }
 0x3e0   : > { %v3880_v48 = vmax.f32 %v3754_v23, 0.0  ;;  %v3757_v7 = vadd.f32 %v6688_v19, %v3756_v36 }
 0x3e1   : > { %v4557_v46 = vpack.c.bf16 %v3882_v56, %v3882_v56  ;;  %v3883_v13 = vmax.f32 %v3765_v30, 0.0 }
 0x3e2   : > { %v4555_v21 = vpack.c.bf16 %v3880_v48, %v3880_v48  ;;  %v3881_v31 = vmax.f32 %v3757_v7, 0.0 }
 0x3e3   : > { %4043 = vst.msk [vmem:[%s6696_s24 + $0x8] sm:$0xf] %vm4040_vm1, %v4557_v46  ;;  %v4558_v11 = vpack.c.bf16 %v3883_v13, %v3883_v13 }
 0x3e4   : > { %4041 = vst.msk [vmem:[%s6696_s24] sm:$0xf] %vm4040_vm1, %v4555_v21  ;;  %v4556_v2 = vpack.c.bf16 %v3881_v31, %v3881_v31  ;;  %v4827_v29 = vpop.f32.mrb[52].mxu0 }
 0x3e5   : > { %4044 = vst.msk [vmem:[%s6696_s24 + $0xc] sm:$0xf] %vm4040_vm1, %v4558_v11  ;;  %v3778_v57 = vadd.f32 %v4827_v29, %v6688_v19  ;;  %v3769_v50 = vpop.f32.mrb[53].mxu0 }
 0x3e6   : > { %4042 = vst.msk [vmem:[%s6696_s24 + $0x4] sm:$0xf] %vm4040_vm1, %v4556_v2  ;;  %v3770_v6 = vadd.f32 %v6688_v19, %v3769_v50  ;;  %v4828_v38 = vpop.f32.mrb[54].mxu0 }
 0x3e7   : > { %v3886_v55 = vmax.f32 %v3778_v57, 0.0  ;;  %v3781_v37 = vadd.f32 %v4828_v38, %v6688_v19  ;;  %v3772_v28 = vpop.f32.mrb[55].mxu0 }
 0x3e8   : > { %v3884_v42 = vmax.f32 %v3770_v6, 0.0  ;;  %v3773_v40 = vadd.f32 %v6688_v19, %v3772_v28 }
 0x3e9   : > { %v4561_v12 = vpack.c.bf16 %v3886_v55, %v3886_v55  ;;  %v3887_v43 = vmax.f32 %v3781_v37, 0.0 }
 0x3ea   : > { %v4559_v24 = vpack.c.bf16 %v3884_v42, %v3884_v42  ;;  %v3885_v49 = vmax.f32 %v3773_v40, 0.0 }
 0x3eb   : > { %4047 = vst.msk [vmem:[%s6696_s24 + $0x18] sm:$0xf] %vm4040_vm1, %v4561_v12  ;;  %v4562_v58 = vpack.c.bf16 %v3887_v43, %v3887_v43 }
 0x3ec   : > { %4045 = vst.msk [vmem:[%s6696_s24 + $0x10] sm:$0xf] %vm4040_vm1, %v4559_v24  ;;  %v4560_v45 = vpack.c.bf16 %v3885_v49, %v3885_v49  ;;  %v4831_v53 = vpop.f32.mrb[56].mxu0 }
 0x3ed   : > { %4048 = vst.msk [vmem:[%s6696_s24 + $0x1c] sm:$0xf] %vm4040_vm1, %v4562_v58  ;;  %v3794_v5 = vadd.f32 %v4831_v53, %v6688_v19  ;;  %v3785_v22 = vpop.f32.mrb[57].mxu0 }
 0x3ee   : > { %4046 = vst.msk [vmem:[%s6696_s24 + $0x14] sm:$0xf] %vm4040_vm1, %v4560_v45  ;;  %v3786_v59 = vadd.f32 %v6688_v19, %v3785_v22  ;;  %v4832_v25 = vpop.f32.mrb[58].mxu0 }
 0x3ef   : > { %v3890_v15 = vmax.f32 %v3794_v5, 0.0  ;;  %v3797_v63 = vadd.f32 %v4832_v25, %v6688_v19  ;;  %v3788_v44 = vpop.f32.mrb[59].mxu0 }
 0x3f0   : > { %v3888_v26 = vmax.f32 %v3786_v59, 0.0  ;;  %v3789_v62 = vadd.f32 %v6688_v19, %v3788_v44 }
 0x3f1   : > { %v4565_v1 = vpack.c.bf16 %v3890_v15, %v3890_v15  ;;  %v3891_v34 = vmax.f32 %v3797_v63, 0.0 }
 0x3f2   : > { %v4563_v3 = vpack.c.bf16 %v3888_v26, %v3888_v26  ;;  %v3889_v54 = vmax.f32 %v3789_v62, 0.0 }
 0x3f3   : > { %4051 = vst.msk [vmem:[%s6696_s24 + $0x28] sm:$0xf] %vm4040_vm1, %v4565_v1  ;;  %v4566_v17 = vpack.c.bf16 %v3891_v34, %v3891_v34 }
 0x3f4   : > { %4049 = vst.msk [vmem:[%s6696_s24 + $0x20] sm:$0xf] %vm4040_vm1, %v4563_v3  ;;  %v4564_v33 = vpack.c.bf16 %v3889_v54, %v3889_v54  ;;  %v4835_v61 = vpop.f32.mrb[60].mxu0 }
 0x3f5   : > { %4052 = vst.msk [vmem:[%s6696_s24 + $0x2c] sm:$0xf] %vm4040_vm1, %v4566_v17  ;;  %v3810_v16 = vadd.f32 %v4835_v61, %v6688_v19  ;;  %v3801_v51 = vpop.f32.mrb[61].mxu0 }
 0x3f6   : > { %4050 = vst.msk [vmem:[%s6696_s24 + $0x24] sm:$0xf] %vm4040_vm1, %v4564_v33  ;;  %v3802_v39 = vadd.f32 %v6688_v19, %v3801_v51  ;;  %v4836_v10 = vpop.f32.mrb[62].mxu0 }
 0x3f7   : > { %v3894_v20 = vmax.f32 %v3810_v16, 0.0  ;;  %v3813_v27 = vadd.f32 %v4836_v10, %v6688_v19  ;;  %v3804_v8 = vpop.f32.mrb[63].mxu0 }
 0x3f8   : > { %v3892_v52 = vmax.f32 %v3802_v39, 0.0  ;;  %v3805_v0 = vadd.f32 %v6688_v19, %v3804_v8 }
 0x3f9   : > { %v4569_v14 = vpack.c.bf16 %v3894_v20, %v3894_v20  ;;  %v3895_v41 = vmax.f32 %v3813_v27, 0.0 }
 0x3fa   : > { %v4567_v35 = vpack.c.bf16 %v3892_v52, %v3892_v52  ;;  %v3893_v60 = vmax.f32 %v3805_v0, 0.0 }
 0x3fb   : > { %4055 = vst.msk [vmem:[%s6696_s24 + $0x38] sm:$0xf] %vm4040_vm1, %v4569_v14  ;;  %v4570_v18 = vpack.c.bf16 %v3895_v41, %v3895_v41 }
 0x3fc   : > { %4053 = vst.msk [vmem:[%s6696_s24 + $0x30] sm:$0xf] %vm4040_vm1, %v4567_v35  ;;  %v4568_v47 = vpack.c.bf16 %v3893_v60, %v3893_v60  ;;  %v4839_v4 = vpop.f32.mrb[64].mxu0 }
 0x3fd   : > { %4056 = vst.msk [vmem:[%s6696_s24 + $0x3c] sm:$0xf] %vm4040_vm1, %v4570_v18  ;;  %v3826_v9 = vadd.f32 %v4839_v4, %v6688_v19  ;;  %v3817_v23 = vpop.f32.mrb[65].mxu0 }
 0x3fe   : > { %4054 = vst.msk [vmem:[%s6696_s24 + $0x34] sm:$0xf] %vm4040_vm1, %v4568_v47  ;;  %v3818_v32 = vadd.f32 %v6688_v19, %v3817_v23  ;;  %v4840_v56 = vpop.f32.mrb[66].mxu0 }
 0x3ff   : > { %v3898_v30 = vmax.f32 %v3826_v9, 0.0  ;;  %v3829_v36 = vadd.f32 %v4840_v56, %v6688_v19  ;;  %v3820_v48 = vpop.f32.mrb[67].mxu0 }
 0x400   : > { %v3896_v7 = vmax.f32 %v3818_v32, 0.0  ;;  %v3821_v46 = vadd.f32 %v6688_v19, %v3820_v48 }
 0x401   : > { %v4573_v13 = vpack.c.bf16 %v3898_v30, %v3898_v30  ;;  %v3899_v21 = vmax.f32 %v3829_v36, 0.0 }
 0x402   : > { %v4571_v31 = vpack.c.bf16 %v3896_v7, %v3896_v7  ;;  %v3897_v11 = vmax.f32 %v3821_v46, 0.0 }
 0x403   : > { %4059 = vst.msk [vmem:[%s6696_s24 + $0x48] sm:$0xf] %vm4040_vm1, %v4573_v13  ;;  %v4574_v2 = vpack.c.bf16 %v3899_v21, %v3899_v21 }
 0x404   : > { %4057 = vst.msk [vmem:[%s6696_s24 + $0x40] sm:$0xf] %vm4040_vm1, %v4571_v31  ;;  %v4572_v29 = vpack.c.bf16 %v3897_v11, %v3897_v11  ;;  %v4843_v57 = vpop.f32.mrb[68].mxu0 }
 0x405   : > { %4060 = vst.msk [vmem:[%s6696_s24 + $0x4c] sm:$0xf] %vm4040_vm1, %v4574_v2  ;;  %v3842_v50 = vadd.f32 %v4843_v57, %v6688_v19  ;;  %v3833_v6 = vpop.f32.mrb[69].mxu0 }
 0x406   : > { %4058 = vst.msk [vmem:[%s6696_s24 + $0x44] sm:$0xf] %vm4040_vm1, %v4572_v29  ;;  %v3834_v38 = vadd.f32 %v6688_v19, %v3833_v6  ;;  %v4844_v55 = vpop.f32.mrb[70].mxu0 }
 0x407   : > { %v3902_v37 = vmax.f32 %v3842_v50, 0.0  ;;  %v3845_v28 = vadd.f32 %v4844_v55, %v6688_v19  ;;  %v3836_v42 = vpop.f32.mrb[71].mxu0 }
 0x408   : > { %v3900_v40 = vmax.f32 %v3834_v38, 0.0  ;;  %v3837_v12 = vadd.f32 %v6688_v19, %v3836_v42 }
 0x409   : > { %v4577_v43 = vpack.c.bf16 %v3902_v37, %v3902_v37  ;;  %v3903_v24 = vmax.f32 %v3845_v28, 0.0 }
 0x40a   : > { %v4575_v49 = vpack.c.bf16 %v3900_v40, %v3900_v40  ;;  %v3901_v58 = vmax.f32 %v3837_v12, 0.0 }
 0x40b   : > { %4063 = vst.msk [vmem:[%s6696_s24 + $0x58] sm:$0xf] %vm4040_vm1, %v4577_v43  ;;  %v4578_v45 = vpack.c.bf16 %v3903_v24, %v3903_v24 }
 0x40c   : > { %4061 = vst.msk [vmem:[%s6696_s24 + $0x50] sm:$0xf] %vm4040_vm1, %v4575_v49  ;;  %v4576_v53 = vpack.c.bf16 %v3901_v58, %v3901_v58  ;;  %v4847_v5 = vpop.f32.mrb[72].mxu0 }
 0x40d   : > { %4064 = vst.msk [vmem:[%s6696_s24 + $0x5c] sm:$0xf] %vm4040_vm1, %v4578_v45  ;;  %v3858_v22 = vadd.f32 %v4847_v5, %v6688_v19  ;;  %v3849_v59 = vpop.f32.mrb[73].mxu0 }
 0x40e   : > { %4062 = vst.msk [vmem:[%s6696_s24 + $0x54] sm:$0xf] %vm4040_vm1, %v4576_v53  ;;  %v3850_v25 = vadd.f32 %v6688_v19, %v3849_v59  ;;  %v4848_v15 = vpop.f32.mrb[74].mxu0 }
 0x40f   : > { %v3906_v63 = vmax.f32 %v3858_v22, 0.0  ;;  %v3861_v44 = vadd.f32 %v4848_v15, %v6688_v19  ;;  %v3852_v26 = vpop.f32.mrb[75].mxu0 }
 0x410   : > { %v3904_v62 = vmax.f32 %v3850_v25, 0.0  ;;  %v3853_v1 = vadd.f32 %v6688_v19, %v3852_v26 }
 0x411   : > { %v4581_v34 = vpack.c.bf16 %v3906_v63, %v3906_v63  ;;  %v3907_v3 = vmax.f32 %v3861_v44, 0.0 }
 0x412   : > { %v4579_v54 = vpack.c.bf16 %v3904_v62, %v3904_v62  ;;  %v3905_v17 = vmax.f32 %v3853_v1, 0.0 }
 0x413   : > { %4067 = vst.msk [vmem:[%s6696_s24 + $0x68] sm:$0xf] %vm4040_vm1, %v4581_v34  ;;  %v4582_v33 = vpack.c.bf16 %v3907_v3, %v3907_v3 }
 0x414   : > { %4065 = vst.msk [vmem:[%s6696_s24 + $0x60] sm:$0xf] %vm4040_vm1, %v4579_v54  ;;  %v4580_v61 = vpack.c.bf16 %v3905_v17, %v3905_v17  ;;  %v4851_v16 = vpop.f32.mrb[76].mxu0 }
 0x415   : > { %4068 = vst.msk [vmem:[%s6696_s24 + $0x6c] sm:$0xf] %vm4040_vm1, %v4582_v33  ;;  %v3874_v51 = vadd.f32 %v4851_v16, %v6688_v19  ;;  %v3865_v39 = vpop.f32.mrb[77].mxu0 }
 0x416   : > { %4066 = vst.msk [vmem:[%s6696_s24 + $0x64] sm:$0xf] %vm4040_vm1, %v4580_v61  ;;  %v3866_v10 = vadd.f32 %v6688_v19, %v3865_v39  ;;  %v4852_v20 = vpop.f32.mrb[78].mxu0 }
 0x417   : > { %v3910_v27 = vmax.f32 %v3874_v51, 0.0  ;;  %v3877_v8 = vadd.f32 %v4852_v20, %v6688_v19  ;;  %v3868_v52 = vpop.f32.mrb[79].mxu0 }
 0x418   : > { %v3908_v0 = vmax.f32 %v3866_v10, 0.0  ;;  %v3869_v14 = vadd.f32 %v6688_v19, %v3868_v52 }
 0x419   : > { %v4585_v41 = vpack.c.bf16 %v3910_v27, %v3910_v27  ;;  %v3911_v35 = vmax.f32 %v3877_v8, 0.0 }
 0x41a   : > { %v4583_v60 = vpack.c.bf16 %v3908_v0, %v3908_v0  ;;  %v3909_v18 = vmax.f32 %v3869_v14, 0.0 }
 0x41b   : > { %4071 = vst.msk [vmem:[%s6696_s24 + $0x78] sm:$0xf] %vm4040_vm1, %v4585_v41  ;;  %v4586_v47 = vpack.c.bf16 %v3911_v35, %v3911_v35 }
 0x41c   : > { %4069 = vst.msk [vmem:[%s6696_s24 + $0x70] sm:$0xf] %vm4040_vm1, %v4583_v60  ;;  %v4584_v4 = vpack.c.bf16 %v3909_v18, %v3909_v18 }
 0x41d   : > { %4072 = vst.msk [vmem:[%s6696_s24 + $0x7c] sm:$0xf] %vm4040_vm1, %v4586_v47 }
 0x41e   : > { %4070 = vst.msk [vmem:[%s6696_s24 + $0x74] sm:$0xf] %vm4040_vm1, %v4584_v4 }
 0x41f   : > { %5102 = shalt.err (!%p5099_p5)
}
 0x420   : > { %s5103_s16 = scalar_lea.hbm %s6789_s28, 2048  ;;  %s5107_s27 = scalar_lea.hbm %s6857_s9, 4096 }
 0x421   : > { %p5104_p6 = scmp.ne.s32.totalorder %s6789_s28, %s5103_s16  ;;  %p5108_p10 = scmp.lt.u32.totalorder %s6789_s28, %s6857_s9 }
 0x422   : > { %p5109_p11 = scmp.lt.u32.totalorder %s5107_s27, %s5103_s16  ;;  %p5111_p13 = scmp.lt.u32.totalorder %s5103_s16, %s6789_s28 }
 0x423   : > { %p5105_p7 = pnand %p5104_p6, %p5265_p4 }
 0x424   : > { %p5110_p12 = por %p5109_p11, %p5108_p10 }
 0x425   : > { %p5106_p9 = pneg %p5105_p7 }
 0x426   : > { %p5112_p0 = por %p5111_p13, %p5110_p12 }
 0x428   : > { %p5113_p1 = pnand %p5112_p0, %p5106_p9 }
 0x42a   : > { %5116 = shalt.err (!%p5113_p1)
}
 0x42b   : > { %s5174_s18 = smov 64  }
 0x42c   : > { %4926 = dma.vmem_to_hbm [thread:$0]  (%p5265_p4), %s6793_s29, 2048, %s6789_s28, %s6801_s12, %s5174_s18, %s5174_s18, %s5172_s15  }
 0x42d PF: > { %p4932_p2 = scmp.ge.s32.totalorder %s5167_s14, 2  ;;  %s4105_s25 = sand.u32 1, %s5147_s30  }
 0x42e   : > { %s4106_s16 = scalar_lea.sflag [#allocation4], %s4105_s25 }
 0x42f   : > { %p4929_p3 = pnand %p4932_p2, %p5272_p8 }
 0x431   : > { %5142 = dma.done.wait (!%p4929_p3), %s4106_s16, 2048  }
 0x432   : > { %5144 = vsyncadd (!%p4929_p3), %s4106_s16, 4294965248  ;;  %s22_s14 = sadd.s32 1, %s5167_s14   ;;  %s6885_s30 = smov %s5151_s10 }
 0x433   : > { %p19_p5 = scmp.ge.s32.totalorder %s22_s14, 4   ;;  %s6886_s10 = smov %s5155_s11 }
 0x434   : > { %s6887_s11 = smov %s5278_s22  ;;  %s6888_s12 = smov %s5163_s13 }
 0x435   : > { %s6889_s13 = smov %s6891_s17  ;;  %21 = sbr.rel (!%p19_p5) target bundleno = 4 (0x4), region = 99 }
 0x43c   :  { %4111 = vsyncpa [#allocation4], 1 }
 0x43d   :  { %4113 = vsyncpa [#allocation4 + $0x1], 1 }

</bundles_post_ra>
